<compile_context>
chip_gen: v6e
topology: v6e:2x2x1
jax: 0.10.0
libtpu: 0.0.40
codegen_flags: <defaults>
</compile_context>

<pallas_src>
import functools

import jax
import jax.numpy as jnp
from jax.experimental import pallas as pl
from jax.experimental.pallas import tpu as pltpu


def _round_up(x, m):
    return ((x + m - 1) // m) * m


# ---------------------------------------------------------------------------
# Pallas kernel 1: implicit-GEMM conv (stride already removed via space-to-depth)
# ---------------------------------------------------------------------------
def _conv_tap_kernel(offsets, m_rows, x_ref, w_ref, b_ref, o_ref):
    """One image per grid step.

    x_ref: (1, R, Cin)    spatial rows flattened row-major (padded with zeros)
    w_ref: (T, Cin, Cout) one (Cin, Cout) matrix per kernel tap (resident)
    b_ref: (1, Cout)      f32 bias (resident)
    o_ref: (1, M, Cout)   M = OH * Ws rows; the k'-1 wrap-around ("junk")
                          columns per output row are sliced off in the wrapper.
    """
    cout = o_ref.shape[-1]
    acc = jnp.zeros((m_rows, cout), jnp.float32)
    for t, off in enumerate(offsets):
        lhs = x_ref[0, pl.ds(off, m_rows), :]          # static shifted slice of the VMEM tile
        acc += jnp.dot(lhs, w_ref[t], preferred_element_type=jnp.float32)
    acc = jnp.maximum(acc + b_ref[...], 0.0)           # bias + ReLU in f32
    o_ref[0] = acc.astype(o_ref.dtype)


def _space_to_depth(x, s):
    """(B, H, W, C) -> (B, H//s, W//s, s*s*C), channel order (sh, sw, c)."""
    if s == 1:
        return x
    b, h, w, c = x.shape
    x = x.reshape(b, h // s, s, w // s, s, c)
    x = x.transpose(0, 1, 3, 2, 4, 5)
    return x.reshape(b, h // s, w // s, s * s * c)


def conv2d_implicit_gemm(x_nhwc, w_taps, bias, k_eff):
    """x_nhwc: (B, Hs, Ws, Cs) bf16 (stride already folded away),
    w_taps: (k_eff*k_eff, Cs, Cout) bf16, bias: (1, Cout) f32
    -> (B, OH, OW, Cout) bf16  (conv + ReLU)."""
    B, Hs, Ws, Cs = x_nhwc.shape
    Cout = w_taps.shape[-1]
    OH = Hs - k_eff + 1
    OW = Ws - k_eff + 1
    M = OH * Ws                                  # includes k_eff-1 junk columns per output row
    offsets = tuple(kh * Ws + kw for kh in range(k_eff) for kw in range(k_eff))
    R = max(Hs * Ws, offsets[-1] + M)            # pad rows so every tap slice stays in-bounds

    x_flat = x_nhwc.reshape(B, Hs * Ws, Cs)
    if R > Hs * Ws:
        x_flat = jnp.pad(x_flat, ((0, 0), (0, R - Hs * Ws), (0, 0)))

    cost = pl.CostEstimate(
        flops=int(2 * B * M * Cs * Cout * len(offsets)),
        transcendentals=0,
        bytes_accessed=int(2 * B * R * Cs + 2 * w_taps.size + 4 * bias.size + 2 * B * M * Cout),
    )
    out = pl.pallas_call(
        functools.partial(_conv_tap_kernel, offsets, M),
        out_shape=jax.ShapeDtypeStruct((B, M, Cout), jnp.bfloat16),
        grid=(B,),
        in_specs=[
            pl.BlockSpec((1, R, Cs), lambda b: (b, 0, 0)),       # one image per step
            pl.BlockSpec(w_taps.shape, lambda b: (0, 0, 0)),     # tap weights: resident
            pl.BlockSpec(bias.shape, lambda b: (0, 0)),          # bias: resident
        ],
        out_specs=pl.BlockSpec((1, M, Cout), lambda b: (b, 0, 0)),
        compiler_params=pltpu.CompilerParams(
            dimension_semantics=("parallel",),                    # megacore over batch
            vmem_limit_bytes=32 * 1024 * 1024,
        ),
        cost_estimate=cost,
    )(x_flat, w_taps, bias)

    # Drop the wrap-around columns of the flattened implicit GEMM.
    return out.reshape(B, OH, Ws, Cout)[:, :, :OW, :]


# ---------------------------------------------------------------------------
# Pallas kernel 2: fused dense head (vision FC + command enc + state MLP +
# action-mean MLP); the torch.cat is eliminated by splitting am1 into row blocks.
# ---------------------------------------------------------------------------
def _head_kernel(vis_ref, cmd_ref, st_ref,
                 vfc_w, vfc_b, cmd_w, cmd_b,
                 st1_w, st1_b, st2_w, st2_b,
                 am1_wv, am1_wc, am1_ws, am1_b,
                 am2_w, am2_b, am3_w, am3_b,
                 mean_ref):
    def dot(a, b):
        return jnp.dot(a, b, preferred_element_type=jnp.float32)

    def bf(t):
        return t.astype(jnp.bfloat16)

    # Encoders (bf16 operands, f32 accumulation)
    vis_feat = dot(vis_ref[...], vfc_w[...]) + vfc_b[...]                 # (TB, H)
    cmd_feat = dot(cmd_ref[...], cmd_w[...]) + cmd_b[...]                 # (TB, H)
    st_h = jnp.maximum(dot(st_ref[...], st1_w[...]) + st1_b[...], 0.0)
    st_feat = dot(bf(st_h), st2_w[...]) + st2_b[...]                      # (TB, H)

    # action_mean layer 1 on the "concatenated" features via three partial dots
    h = (dot(bf(vis_feat), am1_wv[...]) + dot(bf(cmd_feat), am1_wc[...])
         + dot(bf(st_feat), am1_ws[...]) + am1_b[...])
    h = jnp.maximum(h, 0.0)
    h = jnp.maximum(dot(bf(h), am2_w[...]) + am2_b[...], 0.0)
    # Lane-dense (TB, 128) tanh store; columns 4..127 are zero-padded weights.
    mean_ref[...] = jnp.tanh(dot(bf(h), am3_w[...]) + am3_b[...]).astype(mean_ref.dtype)


def _choose_batch_tile(batch):
    """Batch tile: multiple of 16 (bf16 rows), >=2 grid steps once padded batch
    reaches 32 (v7x megacore), capped at 1024 rows (v7x 64 MiB VMEM budget)."""
    bp = _round_up(max(batch, 1), 16)
    if bp < 32:
        tb = bp
    else:
        tb = min(1024, _round_up((bp + 1) // 2, 16))
    bp = _round_up(bp, tb)          # no ragged last block
    return bp, tb


def head_forward(prep, vis_flat, cmd, st, hidden):
    batch = vis_flat.shape[0]
    bp, tb = _choose_batch_tile(batch)

    def pad_rows(x):
        return x if x.shape[0] == bp else jnp.pad(x, ((0, bp - x.shape[0]), (0, 0)))

    acts = [pad_rows(vis_flat), pad_rows(cmd), pad_rows(st)]
    weights = [prep["vfc_w"], prep["vfc_b"], prep["cmd_w"], prep["cmd_b"],
               prep["st1_w"], prep["st1_b"], prep["st2_w"], prep["st2_b"],
               prep["am1_wv"], prep["am1_wc"], prep["am1_ws"], prep["am1_b"],
               prep["am2_w"], prep["am2_b"], prep["am3_w"], prep["am3_b"]]

    act_specs = [pl.BlockSpec((tb, a.shape[1]), lambda i: (i, 0)) for a in acts]
    w_specs = [pl.BlockSpec(w.shape, lambda i: (0, 0)) for w in weights]   # resident

    h = hidden
    vis_d, cmd_d, st_d = (a.shape[1] for a in acts)
    flops = 2 * bp * (vis_d * h + cmd_d * h + st_d * (h // 2) + (h // 2) * h
                      + 3 * h * h + h * (h // 2) + (h // 2) * 128)
    bytes_accessed = (sum(int(a.size) * 2 for a in acts)
                      + sum(int(w.size) * w.dtype.itemsize for w in weights)
                      + bp * 128 * 4)
    cost = pl.CostEstimate(flops=int(flops), transcendentals=int(bp * 128),
                           bytes_accessed=int(bytes_accessed))

    out = pl.pallas_call(
        _head_kernel,
        out_shape=jax.ShapeDtypeStruct((bp, 128), jnp.float32),
        grid=(bp // tb,),
        in_specs=act_specs + w_specs,
        out_specs=pl.BlockSpec((tb, 128), lambda i: (i, 0)),
        compiler_params=pltpu.CompilerParams(
            dimension_semantics=("parallel",),
            vmem_limit_bytes=48 * 1024 * 1024,
        ),
        cost_estimate=cost,
    )(*acts, *weights)
    return out[:batch, :4]


# ---------------------------------------------------------------------------
# Parameter init (PyTorch layout, uniform(-1/sqrt(fan_in), ...)) + kernel prep
# ---------------------------------------------------------------------------
def _linear_init(key, fan_in, fan_out):
    kw, kb = jax.random.split(key)
    bound = 1.0 / float(fan_in) ** 0.5
    w = jax.random.uniform(kw, (fan_in, fan_out), jnp.float32, -bound, bound)
    b = jax.random.uniform(kb, (fan_out,), jnp.float32, -bound, bound)
    return w, b


def _conv_init(key, cin, cout, k):
    kw, kb = jax.random.split(key)
    fan_in = cin * k * k
    bound = 1.0 / float(fan_in) ** 0.5
    w = jax.random.uniform(kw, (cout, cin, k, k), jnp.float32, -bound, bound)
    b = jax.random.uniform(kb, (cout,), jnp.float32, -bound, bound)
    return w, b


def init_params(key, vision_channels=3, hidden_size=256):
    keys = jax.random.split(key, 10)
    p = {}
    p["conv1_w"], p["conv1_b"] = _conv_init(keys[0], vision_channels, 32, 8)
    p["conv2_w"], p["conv2_b"] = _conv_init(keys[1], 32, 64, 4)
    p["conv3_w"], p["conv3_b"] = _conv_init(keys[2], 64, 64, 3)
    p["vfc_w"], p["vfc_b"] = _linear_init(keys[3], 64 * 7 * 7, hidden_size)
    p["cmd_w"], p["cmd_b"] = _linear_init(keys[4], 768, hidden_size)
    p["st1_w"], p["st1_b"] = _linear_init(keys[5], 3, hidden_size // 2)
    p["st2_w"], p["st2_b"] = _linear_init(keys[6], hidden_size // 2, hidden_size)
    p["am1_w"], p["am1_b"] = _linear_init(keys[7], hidden_size * 3, hidden_size)
    p["am2_w"], p["am2_b"] = _linear_init(keys[8], hidden_size, hidden_size // 2)
    p["am3_w"], p["am3_b"] = _linear_init(keys[9], hidden_size // 2, 4)
    p["action_log_std"] = jnp.zeros((1, 4), jnp.float32)
    return p


def _prep_conv_weight(w, stride):
    """(Cout, Cin, k, k) PyTorch conv weight -> (ke*ke, stride*stride*Cin, Cout)
    tap matrices matching the (sh, sw, c) space-to-depth channel order."""
    cout, cin, k, _ = w.shape
    ke = k // stride
    w = w.reshape(cout, cin, ke, stride, ke, stride)    # (co, c, kh', sh, kw', sw)
    w = w.transpose(2, 4, 3, 5, 1, 0)                   # (kh', kw', sh, sw, c, co)
    return w.reshape(ke * ke, stride * stride * cin, cout)


def prepare_params(p):
    bf = jnp.bfloat16
    hidden = p["cmd_w"].shape[1]

    def bias(b):
        return b.astype(jnp.float32).reshape(1, -1)

    prep = {}
    prep["c1_w"] = _prep_conv_weight(p["conv1_w"], 4).astype(bf)   # (4, 48, 32)
    prep["c1_b"] = bias(p["conv1_b"])
    prep["c2_w"] = _prep_conv_weight(p["conv2_w"], 2).astype(bf)   # (4, 128, 64)
    prep["c2_b"] = bias(p["conv2_b"])
    prep["c3_w"] = _prep_conv_weight(p["conv3_w"], 1).astype(bf)   # (9, 64, 64)
    prep["c3_b"] = bias(p["conv3_b"])

    # Vision FC: permute rows from PyTorch's NCHW flatten (c*49 + i*7 + j) to the
    # NHWC flatten ((i*7 + j)*64 + c) produced by the conv stack above.
    vfc = p["vfc_w"].reshape(64, 7, 7, hidden).transpose(1, 2, 0, 3).reshape(64 * 7 * 7, hidden)
    prep["vfc_w"] = vfc.astype(bf)
    prep["vfc_b"] = bias(p["vfc_b"])

    prep["cmd_w"] = p["cmd_w"].astype(bf)
    prep["cmd_b"] = bias(p["cmd_b"])

    prep["st1_w"] = jnp.pad(p["st1_w"], ((0, 13), (0, 0))).astype(bf)  # K: 3 -> 16
    prep["st1_b"] = bias(p["st1_b"])
    prep["st2_w"] = p["st2_w"].astype(bf)
    prep["st2_b"] = bias(p["st2_b"])

    am1 = p["am1_w"]
    prep["am1_wv"] = am1[:hidden].astype(bf)
    prep["am1_wc"] = am1[hidden:2 * hidden].astype(bf)
    prep["am1_ws"] = am1[2 * hidden:].astype(bf)
    prep["am1_b"] = bias(p["am1_b"])
    prep["am2_w"] = p["am2_w"].astype(bf)
    prep["am2_b"] = bias(p["am2_b"])
    # Lane-dense final layer: zero-pad 4 -> 128 output columns (sliced in wrapper).
    prep["am3_w"] = jnp.pad(p["am3_w"], ((0, 0), (0, 124))).astype(bf)
    prep["am3_b"] = jnp.pad(bias(p["am3_b"]), ((0, 0), (0, 124)))

    prep["action_log_std"] = p["action_log_std"]
    return prep


# ---------------------------------------------------------------------------
# Forward pass (eval-mode semantics: action = mean)
# ---------------------------------------------------------------------------
def robot_control_forward(prep, vision, command_embedding, robot_state):
    batch = vision.shape[0]
    hidden = prep["cmd_w"].shape[1]

    # One NCHW -> NHWC transpose; stride removal via space-to-depth (layout glue
    # on small tensors; the CostEstimates let XLA overlap it with the kernels).
    x = jnp.transpose(vision, (0, 2, 3, 1)).astype(jnp.bfloat16)              # (B, 84, 84, 3)
    h = conv2d_implicit_gemm(_space_to_depth(x, 4), prep["c1_w"], prep["c1_b"], 2)  # (B,20,20,32)
    h = conv2d_implicit_gemm(_space_to_depth(h, 2), prep["c2_w"], prep["c2_b"], 2)  # (B, 9, 9,64)
    h = conv2d_implicit_gemm(h, prep["c3_w"], prep["c3_b"], 3)                      # (B, 7, 7,64)
    # TODO(synk): conv3 could be folded into the head kernel to drop one dispatch.
    vis_flat = h.reshape(batch, 7 * 7 * 64)                                   # NHWC flatten, bf16

    cmd = command_embedding.astype(jnp.bfloat16)                              # (B, 768)
    st = jnp.pad(robot_state, ((0, 0), (0, 13))).astype(jnp.bfloat16)         # (B, 16)

    mean = head_forward(prep, vis_flat, cmd, st, hidden)                      # (B, 4) f32

    std = jnp.exp(prep["action_log_std"])                                     # (1, 4)
    # TODO(synk): Normal(mean, std).rsample() (training mode) not implemented;
    # the distribution is represented by (mean, std); eval-mode action = mean.
    action = mean
    return (mean, std), action


# ---------------------------------------------------------------------------
# Pure-JAX f32 reference (for a loose bf16-tolerance cross-check)
# ---------------------------------------------------------------------------
def reference_forward(p, vision, command_embedding, robot_state):
    def conv(x, w, b, s):
        y = jax.lax.conv_general_dilated(
            x, w, (s, s), "VALID", dimension_numbers=("NCHW", "OIHW", "NCHW"))
        return jax.nn.relu(y + b.reshape(1, -1, 1, 1))

    h = conv(vision, p["conv1_w"], p["conv1_b"], 4)
    h = conv(h, p["conv2_w"], p["conv2_b"], 2)
    h = conv(h, p["conv3_w"], p["conv3_b"], 1)
    vis = h.reshape(h.shape[0], -1) @ p["vfc_w"] + p["vfc_b"]
    cmdf = command_embedding @ p["cmd_w"] + p["cmd_b"]
    stf = jax.nn.relu(robot_state @ p["st1_w"] + p["st1_b"]) @ p["st2_w"] + p["st2_b"]
    comb = jnp.concatenate([vis, cmdf, stf], axis=1)
    h1 = jax.nn.relu(comb @ p["am1_w"] + p["am1_b"])
    h2 = jax.nn.relu(h1 @ p["am2_w"] + p["am2_b"])
    return jnp.tanh(h2 @ p["am3_w"] + p["am3_b"])


# ---------------------------------------------------------------------------
if __name__ == "__main__":
    HIDDEN = 32          # small hidden_size for the demo
    VISION_CH = 3
    BATCH = 2

    root = jax.random.PRNGKey(0)
    k_params, k1, k2, k3 = jax.random.split(root, 4)

    params = init_params(k_params, VISION_CH, HIDDEN)
    prep = prepare_params(params)

    # Conv stack (k8/s4 -> k4/s2 -> k3/s1 -> 7x7 before the fixed 64*7*7 Linear)
    # structurally implies an 84x84 vision input.
    vision = jax.random.normal(k1, (BATCH, VISION_CH, 84, 84), jnp.float32)
    command_embedding = jax.random.normal(k2, (BATCH, 768), jnp.float32)
    robot_state = jax.random.normal(k3, (BATCH, 3), jnp.float32)

    fwd = jax.jit(robot_control_forward)
    (mean, std), action = fwd(prep, vision, command_embedding, robot_state)
    jax.block_until_ready((mean, std, action))

    assert mean.shape == (BATCH, 4) and std.shape == (1, 4) and action.shape == (BATCH, 4)
    assert bool(jnp.all(jnp.isfinite(mean)))

    # Cross-check against the f32 reference (bf16 kernels -> loose tolerance).
    ref_mean = reference_forward(params, vision, command_embedding, robot_state)
    max_err = float(jnp.max(jnp.abs(mean - ref_mean)))
    assert max_err < 0.1, max_err

    print("KERNEL_OK")
</pallas_src>

<mosaic_0001>
module attributes {stable_mosaic.version = 11 : i64} {
  func.func @_conv_tap_kernel(%arg0: i32, %arg1: memref<1x442x48xbf16, #tpu.memory_space<vmem>>, %arg2: memref<4x48x32xbf16, #tpu.memory_space<vmem>>, %arg3: memref<1x32xf32, #tpu.memory_space<vmem>>, %arg4: memref<1x420x32xbf16, #tpu.memory_space<vmem>>) attributes {dimension_semantics = [#tpu.dimension_semantics<parallel>], iteration_bounds = array<i64: 2>, scalar_prefetch = 0 : i64, scratch_operands = 0 : i64, tpu.core_type = #tpu.core_type<tc>, window_params = [{transform_indices = @transform_0, window_bounds = array<i64: 1, 442, 48>}, {pipeline_mode = #tpu.pipeline_mode<synchronous>, transform_indices = @transform_1, window_bounds = array<i64: 4, 48, 32>}, {pipeline_mode = #tpu.pipeline_mode<synchronous>, transform_indices = @transform_2, window_bounds = array<i64: 1, 32>}, {transform_indices = @transform_3, window_bounds = array<i64: 1, 420, 32>}]} {
    %cst = arith.constant 0.000000e+00 : f32
    %0 = vector.broadcast %cst : f32 to vector<420x32xf32>
    %c0 = arith.constant 0 : index
    %c0_0 = arith.constant 0 : index
    %c0_1 = arith.constant 0 : index
    %1 = vector.load %arg1[%c0, %c0_0, %c0_1] : memref<1x442x48xbf16, #tpu.memory_space<vmem>>, vector<1x420x48xbf16>
    %2 = vector.shape_cast %1 : vector<1x420x48xbf16> to vector<420x48xbf16>
    %c0_2 = arith.constant 0 : index
    %c0_3 = arith.constant 0 : index
    %c0_4 = arith.constant 0 : index
    %3 = vector.load %arg2[%c0_2, %c0_3, %c0_4] : memref<4x48x32xbf16, #tpu.memory_space<vmem>>, vector<1x48x32xbf16>
    %4 = vector.shape_cast %3 : vector<1x48x32xbf16> to vector<48x32xbf16>
    %cst_5 = arith.constant dense<0.000000e+00> : vector<420x32xf32>
    %5 = tpu.matmul %2, %4, %cst_5 {dimension_numbers = #tpu.dot_dimension_numbers<[1], [0], [0], [1], [0, 0, 1, 1], [], []>} : vector<420x48xbf16>, vector<48x32xbf16>, vector<420x32xf32> -> vector<420x32xf32>
    %6 = arith.addf %0, %5 : vector<420x32xf32>
    %c0_6 = arith.constant 0 : index
    %c1 = arith.constant 1 : index
    %c0_7 = arith.constant 0 : index
    %7 = vector.load %arg1[%c0_6, %c1, %c0_7] : memref<1x442x48xbf16, #tpu.memory_space<vmem>>, vector<1x420x48xbf16>
    %8 = vector.shape_cast %7 : vector<1x420x48xbf16> to vector<420x48xbf16>
    %c1_8 = arith.constant 1 : index
    %c0_9 = arith.constant 0 : index
    %c0_10 = arith.constant 0 : index
    %9 = vector.load %arg2[%c1_8, %c0_9, %c0_10] : memref<4x48x32xbf16, #tpu.memory_space<vmem>>, vector<1x48x32xbf16>
    %10 = vector.shape_cast %9 : vector<1x48x32xbf16> to vector<48x32xbf16>
    %cst_11 = arith.constant dense<0.000000e+00> : vector<420x32xf32>
    %11 = tpu.matmul %8, %10, %cst_11 {dimension_numbers = #tpu.dot_dimension_numbers<[1], [0], [0], [1], [0, 0, 1, 1], [], []>} : vector<420x48xbf16>, vector<48x32xbf16>, vector<420x32xf32> -> vector<420x32xf32>
    %12 = arith.addf %6, %11 : vector<420x32xf32>
    %c0_12 = arith.constant 0 : index
    %c21 = arith.constant 21 : index
    %c0_13 = arith.constant 0 : index
    %13 = vector.load %arg1[%c0_12, %c21, %c0_13] : memref<1x442x48xbf16, #tpu.memory_space<vmem>>, vector<1x420x48xbf16>
    %14 = vector.shape_cast %13 : vector<1x420x48xbf16> to vector<420x48xbf16>
    %c2 = arith.constant 2 : index
    %c0_14 = arith.constant 0 : index
    %c0_15 = arith.constant 0 : index
    %15 = vector.load %arg2[%c2, %c0_14, %c0_15] : memref<4x48x32xbf16, #tpu.memory_space<vmem>>, vector<1x48x32xbf16>
    %16 = vector.shape_cast %15 : vector<1x48x32xbf16> to vector<48x32xbf16>
    %cst_16 = arith.constant dense<0.000000e+00> : vector<420x32xf32>
    %17 = tpu.matmul %14, %16, %cst_16 {dimension_numbers = #tpu.dot_dimension_numbers<[1], [0], [0], [1], [0, 0, 1, 1], [], []>} : vector<420x48xbf16>, vector<48x32xbf16>, vector<420x32xf32> -> vector<420x32xf32>
    %18 = arith.addf %12, %17 : vector<420x32xf32>
    %c0_17 = arith.constant 0 : index
    %c22 = arith.constant 22 : index
    %c0_18 = arith.constant 0 : index
    %19 = vector.load %arg1[%c0_17, %c22, %c0_18] : memref<1x442x48xbf16, #tpu.memory_space<vmem>>, vector<1x420x48xbf16>
    %20 = vector.shape_cast %19 : vector<1x420x48xbf16> to vector<420x48xbf16>
    %c3 = arith.constant 3 : index
    %c0_19 = arith.constant 0 : index
    %c0_20 = arith.constant 0 : index
    %21 = vector.load %arg2[%c3, %c0_19, %c0_20] : memref<4x48x32xbf16, #tpu.memory_space<vmem>>, vector<1x48x32xbf16>
    %22 = vector.shape_cast %21 : vector<1x48x32xbf16> to vector<48x32xbf16>
    %cst_21 = arith.constant dense<0.000000e+00> : vector<420x32xf32>
    %23 = tpu.matmul %20, %22, %cst_21 {dimension_numbers = #tpu.dot_dimension_numbers<[1], [0], [0], [1], [0, 0, 1, 1], [], []>} : vector<420x48xbf16>, vector<48x32xbf16>, vector<420x32xf32> -> vector<420x32xf32>
    %24 = arith.addf %18, %23 : vector<420x32xf32>
    %c0_22 = arith.constant 0 : index
    %c0_23 = arith.constant 0 : index
    %25 = vector.load %arg3[%c0_22, %c0_23] : memref<1x32xf32, #tpu.memory_space<vmem>>, vector<1x32xf32>
    %26 = vector.broadcast %25 : vector<1x32xf32> to vector<420x32xf32>
    %27 = arith.addf %24, %26 : vector<420x32xf32>
    %cst_24 = arith.constant 0.000000e+00 : f32
    %28 = vector.broadcast %cst_24 : f32 to vector<420x32xf32>
    %29 = arith.maximumf %27, %28 : vector<420x32xf32>
    %30 = arith.truncf %29 : vector<420x32xf32> to vector<420x32xbf16>
    %c0_25 = arith.constant 0 : index
    %c0_26 = arith.constant 0 : index
    %c0_27 = arith.constant 0 : index
    %31 = vector.load %arg4[%c0_25, %c0_26, %c0_27] : memref<1x420x32xbf16, #tpu.memory_space<vmem>>, vector<1x420x32xbf16>
    %32 = vector.shape_cast %31 : vector<1x420x32xbf16> to vector<420x32xbf16>
    %33 = vector.shape_cast %30 : vector<420x32xbf16> to vector<1x420x32xbf16>
    tpu.vector_store %arg4[%c0_25, %c0_26, %c0_27], %33 {strides = array<i32>} : memref<1x420x32xbf16, #tpu.memory_space<vmem>>, vector<1x420x32xbf16>,
    return
  }
  func.func @transform_0(%arg0: i32) -> (i32, i32, i32) {
    %c0_i32 = arith.constant 0 : i32
    %c0_i32_0 = arith.constant 0 : i32
    %c0_i32_1 = arith.constant 0 : i32
    return %arg0, %c0_i32, %c0_i32_0 : i32, i32, i32
  }
  func.func @transform_1(%arg0: i32) -> (i32, i32, i32) {
    %c0_i32 = arith.constant 0 : i32
    %c0_i32_0 = arith.constant 0 : i32
    %c0_i32_1 = arith.constant 0 : i32
    %c0_i32_2 = arith.constant 0 : i32
    return %c0_i32, %c0_i32_0, %c0_i32_1 : i32, i32, i32
  }
  func.func @transform_2(%arg0: i32) -> (i32, i32) {
    %c0_i32 = arith.constant 0 : i32
    %c0_i32_0 = arith.constant 0 : i32
    %c0_i32_1 = arith.constant 0 : i32
    return %c0_i32, %c0_i32_0 : i32, i32
  }
  func.func @transform_3(%arg0: i32) -> (i32, i32, i32) {
    %c0_i32 = arith.constant 0 : i32
    %c0_i32_0 = arith.constant 0 : i32
    %c0_i32_1 = arith.constant 0 : i32
    return %arg0, %c0_i32, %c0_i32_0 : i32, i32, i32
  }
}

module attributes {stable_mosaic.version = 11 : i64} {
  func.func @_conv_tap_kernel(%arg0: i32, %arg1: memref<1x101x128xbf16, #tpu.memory_space<vmem>>, %arg2: memref<4x128x64xbf16, #tpu.memory_space<vmem>>, %arg3: memref<1x64xf32, #tpu.memory_space<vmem>>, %arg4: memref<1x90x64xbf16, #tpu.memory_space<vmem>>) attributes {dimension_semantics = [#tpu.dimension_semantics<parallel>], iteration_bounds = array<i64: 2>, scalar_prefetch = 0 : i64, scratch_operands = 0 : i64, tpu.core_type = #tpu.core_type<tc>, window_params = [{transform_indices = @transform_0, window_bounds = array<i64: 1, 101, 128>}, {pipeline_mode = #tpu.pipeline_mode<synchronous>, transform_indices = @transform_1, window_bounds = array<i64: 4, 128, 64>}, {pipeline_mode = #tpu.pipeline_mode<synchronous>, transform_indices = @transform_2, window_bounds = array<i64: 1, 64>}, {transform_indices = @transform_3, window_bounds = array<i64: 1, 90, 64>}]} {
    %cst = arith.constant 0.000000e+00 : f32
    %0 = vector.broadcast %cst : f32 to vector<90x64xf32>
    %c0 = arith.constant 0 : index
    %c0_0 = arith.constant 0 : index
    %c0_1 = arith.constant 0 : index
    %1 = vector.load %arg1[%c0, %c0_0, %c0_1] : memref<1x101x128xbf16, #tpu.memory_space<vmem>>, vector<1x90x128xbf16>
    %2 = vector.shape_cast %1 : vector<1x90x128xbf16> to vector<90x128xbf16>
    %c0_2 = arith.constant 0 : index
    %c0_3 = arith.constant 0 : index
    %c0_4 = arith.constant 0 : index
    %3 = vector.load %arg2[%c0_2, %c0_3, %c0_4] : memref<4x128x64xbf16, #tpu.memory_space<vmem>>, vector<1x128x64xbf16>
    %4 = vector.shape_cast %3 : vector<1x128x64xbf16> to vector<128x64xbf16>
    %cst_5 = arith.constant dense<0.000000e+00> : vector<90x64xf32>
    %5 = tpu.matmul %2, %4, %cst_5 {dimension_numbers = #tpu.dot_dimension_numbers<[1], [0], [0], [1], [0, 0, 1, 1], [], []>} : vector<90x128xbf16>, vector<128x64xbf16>, vector<90x64xf32> -> vector<90x64xf32>
    %6 = arith.addf %0, %5 : vector<90x64xf32>
    %c0_6 = arith.constant 0 : index
    %c1 = arith.constant 1 : index
    %c0_7 = arith.constant 0 : index
    %7 = vector.load %arg1[%c0_6, %c1, %c0_7] : memref<1x101x128xbf16, #tpu.memory_space<vmem>>, vector<1x90x128xbf16>
    %8 = vector.shape_cast %7 : vector<1x90x128xbf16> to vector<90x128xbf16>
    %c1_8 = arith.constant 1 : index
    %c0_9 = arith.constant 0 : index
    %c0_10 = arith.constant 0 : index
    %9 = vector.load %arg2[%c1_8, %c0_9, %c0_10] : memref<4x128x64xbf16, #tpu.memory_space<vmem>>, vector<1x128x64xbf16>
    %10 = vector.shape_cast %9 : vector<1x128x64xbf16> to vector<128x64xbf16>
    %cst_11 = arith.constant dense<0.000000e+00> : vector<90x64xf32>
    %11 = tpu.matmul %8, %10, %cst_11 {dimension_numbers = #tpu.dot_dimension_numbers<[1], [0], [0], [1], [0, 0, 1, 1], [], []>} : vector<90x128xbf16>, vector<128x64xbf16>, vector<90x64xf32> -> vector<90x64xf32>
    %12 = arith.addf %6, %11 : vector<90x64xf32>
    %c0_12 = arith.constant 0 : index
    %c10 = arith.constant 10 : index
    %c0_13 = arith.constant 0 : index
    %13 = vector.load %arg1[%c0_12, %c10, %c0_13] : memref<1x101x128xbf16, #tpu.memory_space<vmem>>, vector<1x90x128xbf16>
    %14 = vector.shape_cast %13 : vector<1x90x128xbf16> to vector<90x128xbf16>
    %c2 = arith.constant 2 : index
    %c0_14 = arith.constant 0 : index
    %c0_15 = arith.constant 0 : index
    %15 = vector.load %arg2[%c2, %c0_14, %c0_15] : memref<4x128x64xbf16, #tpu.memory_space<vmem>>, vector<1x128x64xbf16>
    %16 = vector.shape_cast %15 : vector<1x128x64xbf16> to vector<128x64xbf16>
    %cst_16 = arith.constant dense<0.000000e+00> : vector<90x64xf32>
    %17 = tpu.matmul %14, %16, %cst_16 {dimension_numbers = #tpu.dot_dimension_numbers<[1], [0], [0], [1], [0, 0, 1, 1], [], []>} : vector<90x128xbf16>, vector<128x64xbf16>, vector<90x64xf32> -> vector<90x64xf32>
    %18 = arith.addf %12, %17 : vector<90x64xf32>
    %c0_17 = arith.constant 0 : index
    %c11 = arith.constant 11 : index
    %c0_18 = arith.constant 0 : index
    %19 = vector.load %arg1[%c0_17, %c11, %c0_18] : memref<1x101x128xbf16, #tpu.memory_space<vmem>>, vector<1x90x128xbf16>
    %20 = vector.shape_cast %19 : vector<1x90x128xbf16> to vector<90x128xbf16>
    %c3 = arith.constant 3 : index
    %c0_19 = arith.constant 0 : index
    %c0_20 = arith.constant 0 : index
    %21 = vector.load %arg2[%c3, %c0_19, %c0_20] : memref<4x128x64xbf16, #tpu.memory_space<vmem>>, vector<1x128x64xbf16>
    %22 = vector.shape_cast %21 : vector<1x128x64xbf16> to vector<128x64xbf16>
    %cst_21 = arith.constant dense<0.000000e+00> : vector<90x64xf32>
    %23 = tpu.matmul %20, %22, %cst_21 {dimension_numbers = #tpu.dot_dimension_numbers<[1], [0], [0], [1], [0, 0, 1, 1], [], []>} : vector<90x128xbf16>, vector<128x64xbf16>, vector<90x64xf32> -> vector<90x64xf32>
    %24 = arith.addf %18, %23 : vector<90x64xf32>
    %c0_22 = arith.constant 0 : index
    %c0_23 = arith.constant 0 : index
    %25 = vector.load %arg3[%c0_22, %c0_23] : memref<1x64xf32, #tpu.memory_space<vmem>>, vector<1x64xf32>
    %26 = vector.broadcast %25 : vector<1x64xf32> to vector<90x64xf32>
    %27 = arith.addf %24, %26 : vector<90x64xf32>
    %cst_24 = arith.constant 0.000000e+00 : f32
    %28 = vector.broadcast %cst_24 : f32 to vector<90x64xf32>
    %29 = arith.maximumf %27, %28 : vector<90x64xf32>
    %30 = arith.truncf %29 : vector<90x64xf32> to vector<90x64xbf16>
    %c0_25 = arith.constant 0 : index
    %c0_26 = arith.constant 0 : index
    %c0_27 = arith.constant 0 : index
    %31 = vector.load %arg4[%c0_25, %c0_26, %c0_27] : memref<1x90x64xbf16, #tpu.memory_space<vmem>>, vector<1x90x64xbf16>
    %32 = vector.shape_cast %31 : vector<1x90x64xbf16> to vector<90x64xbf16>
    %33 = vector.shape_cast %30 : vector<90x64xbf16> to vector<1x90x64xbf16>
    tpu.vector_store %arg4[%c0_25, %c0_26, %c0_27], %33 {strides = array<i32>} : memref<1x90x64xbf16, #tpu.memory_space<vmem>>, vector<1x90x64xbf16>,
    return
  }
  func.func @transform_0(%arg0: i32) -> (i32, i32, i32) {
    %c0_i32 = arith.constant 0 : i32
    %c0_i32_0 = arith.constant 0 : i32
    %c0_i32_1 = arith.constant 0 : i32
    return %arg0, %c0_i32, %c0_i32_0 : i32, i32, i32
  }
  func.func @transform_1(%arg0: i32) -> (i32, i32, i32) {
    %c0_i32 = arith.constant 0 : i32
    %c0_i32_0 = arith.constant 0 : i32
    %c0_i32_1 = arith.constant 0 : i32
    %c0_i32_2 = arith.constant 0 : i32
    return %c0_i32, %c0_i32_0, %c0_i32_1 : i32, i32, i32
  }
  func.func @transform_2(%arg0: i32) -> (i32, i32) {
    %c0_i32 = arith.constant 0 : i32
    %c0_i32_0 = arith.constant 0 : i32
    %c0_i32_1 = arith.constant 0 : i32
    return %c0_i32, %c0_i32_0 : i32, i32
  }
  func.func @transform_3(%arg0: i32) -> (i32, i32, i32) {
    %c0_i32 = arith.constant 0 : i32
    %c0_i32_0 = arith.constant 0 : i32
    %c0_i32_1 = arith.constant 0 : i32
    return %arg0, %c0_i32, %c0_i32_0 : i32, i32, i32
  }
}

module attributes {stable_mosaic.version = 11 : i64} {
  func.func @_conv_tap_kernel(%arg0: i32, %arg1: memref<1x83x64xbf16, #tpu.memory_space<vmem>>, %arg2: memref<9x64x64xbf16, #tpu.memory_space<vmem>>, %arg3: memref<1x64xf32, #tpu.memory_space<vmem>>, %arg4: memref<1x63x64xbf16, #tpu.memory_space<vmem>>) attributes {dimension_semantics = [#tpu.dimension_semantics<parallel>], iteration_bounds = array<i64: 2>, scalar_prefetch = 0 : i64, scratch_operands = 0 : i64, tpu.core_type = #tpu.core_type<tc>, window_params = [{transform_indices = @transform_0, window_bounds = array<i64: 1, 83, 64>}, {pipeline_mode = #tpu.pipeline_mode<synchronous>, transform_indices = @transform_1, window_bounds = array<i64: 9, 64, 64>}, {pipeline_mode = #tpu.pipeline_mode<synchronous>, transform_indices = @transform_2, window_bounds = array<i64: 1, 64>}, {transform_indices = @transform_3, window_bounds = array<i64: 1, 63, 64>}]} {
    %cst = arith.constant 0.000000e+00 : f32
    %0 = vector.broadcast %cst : f32 to vector<63x64xf32>
    %c0 = arith.constant 0 : index
    %c0_0 = arith.constant 0 : index
    %c0_1 = arith.constant 0 : index
    %1 = vector.load %arg1[%c0, %c0_0, %c0_1] : memref<1x83x64xbf16, #tpu.memory_space<vmem>>, vector<1x63x64xbf16>
    %2 = vector.shape_cast %1 : vector<1x63x64xbf16> to vector<63x64xbf16>
    %c0_2 = arith.constant 0 : index
    %c0_3 = arith.constant 0 : index
    %c0_4 = arith.constant 0 : index
    %3 = vector.load %arg2[%c0_2, %c0_3, %c0_4] : memref<9x64x64xbf16, #tpu.memory_space<vmem>>, vector<1x64x64xbf16>
    %4 = vector.shape_cast %3 : vector<1x64x64xbf16> to vector<64x64xbf16>
    %cst_5 = arith.constant dense<0.000000e+00> : vector<63x64xf32>
    %5 = tpu.matmul %2, %4, %cst_5 {dimension_numbers = #tpu.dot_dimension_numbers<[1], [0], [0], [1], [0, 0, 1, 1], [], []>} : vector<63x64xbf16>, vector<64x64xbf16>, vector<63x64xf32> -> vector<63x64xf32>
    %6 = arith.addf %0, %5 : vector<63x64xf32>
    %c0_6 = arith.constant 0 : index
    %c1 = arith.constant 1 : index
    %c0_7 = arith.constant 0 : index
    %7 = vector.load %arg1[%c0_6, %c1, %c0_7] : memref<1x83x64xbf16, #tpu.memory_space<vmem>>, vector<1x63x64xbf16>
    %8 = vector.shape_cast %7 : vector<1x63x64xbf16> to vector<63x64xbf16>
    %c1_8 = arith.constant 1 : index
    %c0_9 = arith.constant 0 : index
    %c0_10 = arith.constant 0 : index
    %9 = vector.load %arg2[%c1_8, %c0_9, %c0_10] : memref<9x64x64xbf16, #tpu.memory_space<vmem>>, vector<1x64x64xbf16>
    %10 = vector.shape_cast %9 : vector<1x64x64xbf16> to vector<64x64xbf16>
    %cst_11 = arith.constant dense<0.000000e+00> : vector<63x64xf32>
    %11 = tpu.matmul %8, %10, %cst_11 {dimension_numbers = #tpu.dot_dimension_numbers<[1], [0], [0], [1], [0, 0, 1, 1], [], []>} : vector<63x64xbf16>, vector<64x64xbf16>, vector<63x64xf32> -> vector<63x64xf32>
    %12 = arith.addf %6, %11 : vector<63x64xf32>
    %c0_12 = arith.constant 0 : index
    %c2 = arith.constant 2 : index
    %c0_13 = arith.constant 0 : index
    %13 = vector.load %arg1[%c0_12, %c2, %c0_13] : memref<1x83x64xbf16, #tpu.memory_space<vmem>>, vector<1x63x64xbf16>
    %14 = vector.shape_cast %13 : vector<1x63x64xbf16> to vector<63x64xbf16>
    %c2_14 = arith.constant 2 : index
    %c0_15 = arith.constant 0 : index
    %c0_16 = arith.constant 0 : index
    %15 = vector.load %arg2[%c2_14, %c0_15, %c0_16] : memref<9x64x64xbf16, #tpu.memory_space<vmem>>, vector<1x64x64xbf16>
    %16 = vector.shape_cast %15 : vector<1x64x64xbf16> to vector<64x64xbf16>
    %cst_17 = arith.constant dense<0.000000e+00> : vector<63x64xf32>
    %17 = tpu.matmul %14, %16, %cst_17 {dimension_numbers = #tpu.dot_dimension_numbers<[1], [0], [0], [1], [0, 0, 1, 1], [], []>} : vector<63x64xbf16>, vector<64x64xbf16>, vector<63x64xf32> -> vector<63x64xf32>
    %18 = arith.addf %12, %17 : vector<63x64xf32>
    %c0_18 = arith.constant 0 : index
    %c9 = arith.constant 9 : index
    %c0_19 = arith.constant 0 : index
    %19 = vector.load %arg1[%c0_18, %c9, %c0_19] : memref<1x83x64xbf16, #tpu.memory_space<vmem>>, vector<1x63x64xbf16>
    %20 = vector.shape_cast %19 : vector<1x63x64xbf16> to vector<63x64xbf16>
    %c3 = arith.constant 3 : index
    %c0_20 = arith.constant 0 : index
    %c0_21 = arith.constant 0 : index
    %21 = vector.load %arg2[%c3, %c0_20, %c0_21] : memref<9x64x64xbf16, #tpu.memory_space<vmem>>, vector<1x64x64xbf16>
    %22 = vector.shape_cast %21 : vector<1x64x64xbf16> to vector<64x64xbf16>
    %cst_22 = arith.constant dense<0.000000e+00> : vector<63x64xf32>
    %23 = tpu.matmul %20, %22, %cst_22 {dimension_numbers = #tpu.dot_dimension_numbers<[1], [0], [0], [1], [0, 0, 1, 1], [], []>} : vector<63x64xbf16>, vector<64x64xbf16>, vector<63x64xf32> -> vector<63x64xf32>
    %24 = arith.addf %18, %23 : vector<63x64xf32>
    %c0_23 = arith.constant 0 : index
    %c10 = arith.constant 10 : index
    %c0_24 = arith.constant 0 : index
    %25 = vector.load %arg1[%c0_23, %c10, %c0_24] : memref<1x83x64xbf16, #tpu.memory_space<vmem>>, vector<1x63x64xbf16>
    %26 = vector.shape_cast %25 : vector<1x63x64xbf16> to vector<63x64xbf16>
    %c4 = arith.constant 4 : index
    %c0_25 = arith.constant 0 : index
    %c0_26 = arith.constant 0 : index
    %27 = vector.load %arg2[%c4, %c0_25, %c0_26] : memref<9x64x64xbf16, #tpu.memory_space<vmem>>, vector<1x64x64xbf16>
    %28 = vector.shape_cast %27 : vector<1x64x64xbf16> to vector<64x64xbf16>
    %cst_27 = arith.constant dense<0.000000e+00> : vector<63x64xf32>
    %29 = tpu.matmul %26, %28, %cst_27 {dimension_numbers = #tpu.dot_dimension_numbers<[1], [0], [0], [1], [0, 0, 1, 1], [], []>} : vector<63x64xbf16>, vector<64x64xbf16>, vector<63x64xf32> -> vector<63x64xf32>
    %30 = arith.addf %24, %29 : vector<63x64xf32>
    %c0_28 = arith.constant 0 : index
    %c11 = arith.constant 11 : index
    %c0_29 = arith.constant 0 : index
    %31 = vector.load %arg1[%c0_28, %c11, %c0_29] : memref<1x83x64xbf16, #tpu.memory_space<vmem>>, vector<1x63x64xbf16>
    %32 = vector.shape_cast %31 : vector<1x63x64xbf16> to vector<63x64xbf16>
    %c5 = arith.constant 5 : index
    %c0_30 = arith.constant 0 : index
    %c0_31 = arith.constant 0 : index
    %33 = vector.load %arg2[%c5, %c0_30, %c0_31] : memref<9x64x64xbf16, #tpu.memory_space<vmem>>, vector<1x64x64xbf16>
    %34 = vector.shape_cast %33 : vector<1x64x64xbf16> to vector<64x64xbf16>
    %cst_32 = arith.constant dense<0.000000e+00> : vector<63x64xf32>
    %35 = tpu.matmul %32, %34, %cst_32 {dimension_numbers = #tpu.dot_dimension_numbers<[1], [0], [0], [1], [0, 0, 1, 1], [], []>} : vector<63x64xbf16>, vector<64x64xbf16>, vector<63x64xf32> -> vector<63x64xf32>
    %36 = arith.addf %30, %35 : vector<63x64xf32>
    %c0_33 = arith.constant 0 : index
    %c18 = arith.constant 18 : index
    %c0_34 = arith.constant 0 : index
    %37 = vector.load %arg1[%c0_33, %c18, %c0_34] : memref<1x83x64xbf16, #tpu.memory_space<vmem>>, vector<1x63x64xbf16>
    %38 = vector.shape_cast %37 : vector<1x63x64xbf16> to vector<63x64xbf16>
    %c6 = arith.constant 6 : index
    %c0_35 = arith.constant 0 : index
    %c0_36 = arith.constant 0 : index
    %39 = vector.load %arg2[%c6, %c0_35, %c0_36] : memref<9x64x64xbf16, #tpu.memory_space<vmem>>, vector<1x64x64xbf16>
    %40 = vector.shape_cast %39 : vector<1x64x64xbf16> to vector<64x64xbf16>
    %cst_37 = arith.constant dense<0.000000e+00> : vector<63x64xf32>
    %41 = tpu.matmul %38, %40, %cst_37 {dimension_numbers = #tpu.dot_dimension_numbers<[1], [0], [0], [1], [0, 0, 1, 1], [], []>} : vector<63x64xbf16>, vector<64x64xbf16>, vector<63x64xf32> -> vector<63x64xf32>
    %42 = arith.addf %36, %41 : vector<63x64xf32>
    %c0_38 = arith.constant 0 : index
    %c19 = arith.constant 19 : index
    %c0_39 = arith.constant 0 : index
    %43 = vector.load %arg1[%c0_38, %c19, %c0_39] : memref<1x83x64xbf16, #tpu.memory_space<vmem>>, vector<1x63x64xbf16>
    %44 = vector.shape_cast %43 : vector<1x63x64xbf16> to vector<63x64xbf16>
    %c7 = arith.constant 7 : index
    %c0_40 = arith.constant 0 : index
    %c0_41 = arith.constant 0 : index
    %45 = vector.load %arg2[%c7, %c0_40, %c0_41] : memref<9x64x64xbf16, #tpu.memory_space<vmem>>, vector<1x64x64xbf16>
    %46 = vector.shape_cast %45 : vector<1x64x64xbf16> to vector<64x64xbf16>
    %cst_42 = arith.constant dense<0.000000e+00> : vector<63x64xf32>
    %47 = tpu.matmul %44, %46, %cst_42 {dimension_numbers = #tpu.dot_dimension_numbers<[1], [0], [0], [1], [0, 0, 1, 1], [], []>} : vector<63x64xbf16>, vector<64x64xbf16>, vector<63x64xf32> -> vector<63x64xf32>
    %48 = arith.addf %42, %47 : vector<63x64xf32>
    %c0_43 = arith.constant 0 : index
    %c20 = arith.constant 20 : index
    %c0_44 = arith.constant 0 : index
    %49 = vector.load %arg1[%c0_43, %c20, %c0_44] : memref<1x83x64xbf16, #tpu.memory_space<vmem>>, vector<1x63x64xbf16>
    %50 = vector.shape_cast %49 : vector<1x63x64xbf16> to vector<63x64xbf16>
    %c8 = arith.constant 8 : index
    %c0_45 = arith.constant 0 : index
    %c0_46 = arith.constant 0 : index
    %51 = vector.load %arg2[%c8, %c0_45, %c0_46] : memref<9x64x64xbf16, #tpu.memory_space<vmem>>, vector<1x64x64xbf16>
    %52 = vector.shape_cast %51 : vector<1x64x64xbf16> to vector<64x64xbf16>
    %cst_47 = arith.constant dense<0.000000e+00> : vector<63x64xf32>
    %53 = tpu.matmul %50, %52, %cst_47 {dimension_numbers = #tpu.dot_dimension_numbers<[1], [0], [0], [1], [0, 0, 1, 1], [], []>} : vector<63x64xbf16>, vector<64x64xbf16>, vector<63x64xf32> -> vector<63x64xf32>
    %54 = arith.addf %48, %53 : vector<63x64xf32>
    %c0_48 = arith.constant 0 : index
    %c0_49 = arith.constant 0 : index
    %55 = vector.load %arg3[%c0_48, %c0_49] : memref<1x64xf32, #tpu.memory_space<vmem>>, vector<1x64xf32>
    %56 = vector.broadcast %55 : vector<1x64xf32> to vector<63x64xf32>
    %57 = arith.addf %54, %56 : vector<63x64xf32>
    %cst_50 = arith.constant 0.000000e+00 : f32
    %58 = vector.broadcast %cst_50 : f32 to vector<63x64xf32>
    %59 = arith.maximumf %57, %58 : vector<63x64xf32>
    %60 = arith.truncf %59 : vector<63x64xf32> to vector<63x64xbf16>
    %c0_51 = arith.constant 0 : index
    %c0_52 = arith.constant 0 : index
    %c0_53 = arith.constant 0 : index
    %61 = vector.load %arg4[%c0_51, %c0_52, %c0_53] : memref<1x63x64xbf16, #tpu.memory_space<vmem>>, vector<1x63x64xbf16>
    %62 = vector.shape_cast %61 : vector<1x63x64xbf16> to vector<63x64xbf16>
    %63 = vector.shape_cast %60 : vector<63x64xbf16> to vector<1x63x64xbf16>
    tpu.vector_store %arg4[%c0_51, %c0_52, %c0_53], %63 {strides = array<i32>} : memref<1x63x64xbf16, #tpu.memory_space<vmem>>, vector<1x63x64xbf16>,
    return
  }
  func.func @transform_0(%arg0: i32) -> (i32, i32, i32) {
    %c0_i32 = arith.constant 0 : i32
    %c0_i32_0 = arith.constant 0 : i32
    %c0_i32_1 = arith.constant 0 : i32
    return %arg0, %c0_i32, %c0_i32_0 : i32, i32, i32
  }
  func.func @transform_1(%arg0: i32) -> (i32, i32, i32) {
    %c0_i32 = arith.constant 0 : i32
    %c0_i32_0 = arith.constant 0 : i32
    %c0_i32_1 = arith.constant 0 : i32
    %c0_i32_2 = arith.constant 0 : i32
    return %c0_i32, %c0_i32_0, %c0_i32_1 : i32, i32, i32
  }
  func.func @transform_2(%arg0: i32) -> (i32, i32) {
    %c0_i32 = arith.constant 0 : i32
    %c0_i32_0 = arith.constant 0 : i32
    %c0_i32_1 = arith.constant 0 : i32
    return %c0_i32, %c0_i32_0 : i32, i32
  }
  func.func @transform_3(%arg0: i32) -> (i32, i32, i32) {
    %c0_i32 = arith.constant 0 : i32
    %c0_i32_0 = arith.constant 0 : i32
    %c0_i32_1 = arith.constant 0 : i32
    return %arg0, %c0_i32, %c0_i32_0 : i32, i32, i32
  }
}

module attributes {stable_mosaic.version = 11 : i64} {
  func.func @_head_kernel(%arg0: i32, %arg1: memref<16x3136xbf16, #tpu.memory_space<vmem>>, %arg2: memref<16x768xbf16, #tpu.memory_space<vmem>>, %arg3: memref<16x16xbf16, #tpu.memory_space<vmem>>, %arg4: memref<3136x32xbf16, #tpu.memory_space<vmem>>, %arg5: memref<1x32xf32, #tpu.memory_space<vmem>>, %arg6: memref<768x32xbf16, #tpu.memory_space<vmem>>, %arg7: memref<1x32xf32, #tpu.memory_space<vmem>>, %arg8: memref<16x16xbf16, #tpu.memory_space<vmem>>, %arg9: memref<1x16xf32, #tpu.memory_space<vmem>>, %arg10: memref<16x32xbf16, #tpu.memory_space<vmem>>, %arg11: memref<1x32xf32, #tpu.memory_space<vmem>>, %arg12: memref<32x32xbf16, #tpu.memory_space<vmem>>, %arg13: memref<32x32xbf16, #tpu.memory_space<vmem>>, %arg14: memref<32x32xbf16, #tpu.memory_space<vmem>>, %arg15: memref<1x32xf32, #tpu.memory_space<vmem>>, %arg16: memref<32x16xbf16, #tpu.memory_space<vmem>>, %arg17: memref<1x16xf32, #tpu.memory_space<vmem>>, %arg18: memref<16x128xbf16, #tpu.memory_space<vmem>>, %arg19: memref<1x128xf32, #tpu.memory_space<vmem>>, %arg20: memref<16x128xf32, #tpu.memory_space<vmem>>) attributes {dimension_semantics = [#tpu.dimension_semantics<parallel>], iteration_bounds = array<i64: 1>, scalar_prefetch = 0 : i64, scratch_operands = 0 : i64, tpu.core_type = #tpu.core_type<tc>, window_params = [{transform_indices = @transform_0, window_bounds = array<i64: 16, 3136>}, {transform_indices = @transform_1, window_bounds = array<i64: 16, 768>}, {transform_indices = @transform_2, window_bounds = array<i64: 16, 16>}, {pipeline_mode = #tpu.pipeline_mode<synchronous>, transform_indices = @transform_3, window_bounds = array<i64: 3136, 32>}, {pipeline_mode = #tpu.pipeline_mode<synchronous>, transform_indices = @transform_4, window_bounds = array<i64: 1, 32>}, {pipeline_mode = #tpu.pipeline_mode<synchronous>, transform_indices = @transform_5, window_bounds = array<i64: 768, 32>}, {pipeline_mode = #tpu.pipeline_mode<synchronous>, transform_indices = @transform_6, window_bounds = array<i64: 1, 32>}, {pipeline_mode = #tpu.pipeline_mode<synchronous>, transform_indices = @transform_7, window_bounds = array<i64: 16, 16>}, {pipeline_mode = #tpu.pipeline_mode<synchronous>, transform_indices = @transform_8, window_bounds = array<i64: 1, 16>}, {pipeline_mode = #tpu.pipeline_mode<synchronous>, transform_indices = @transform_9, window_bounds = array<i64: 16, 32>}, {pipeline_mode = #tpu.pipeline_mode<synchronous>, transform_indices = @transform_10, window_bounds = array<i64: 1, 32>}, {pipeline_mode = #tpu.pipeline_mode<synchronous>, transform_indices = @transform_11, window_bounds = array<i64: 32, 32>}, {pipeline_mode = #tpu.pipeline_mode<synchronous>, transform_indices = @transform_12, window_bounds = array<i64: 32, 32>}, {pipeline_mode = #tpu.pipeline_mode<synchronous>, transform_indices = @transform_13, window_bounds = array<i64: 32, 32>}, {pipeline_mode = #tpu.pipeline_mode<synchronous>, transform_indices = @transform_14, window_bounds = array<i64: 1, 32>}, {pipeline_mode = #tpu.pipeline_mode<synchronous>, transform_indices = @transform_15, window_bounds = array<i64: 32, 16>}, {pipeline_mode = #tpu.pipeline_mode<synchronous>, transform_indices = @transform_16, window_bounds = array<i64: 1, 16>}, {pipeline_mode = #tpu.pipeline_mode<synchronous>, transform_indices = @transform_17, window_bounds = array<i64: 16, 128>}, {pipeline_mode = #tpu.pipeline_mode<synchronous>, transform_indices = @transform_18, window_bounds = array<i64: 1, 128>}, {transform_indices = @transform_19, window_bounds = array<i64: 16, 128>}]} {
    %c0 = arith.constant 0 : index
    %c0_0 = arith.constant 0 : index
    %0 = vector.load %arg1[%c0, %c0_0] : memref<16x3136xbf16, #tpu.memory_space<vmem>>, vector<16x3136xbf16>
    %c0_1 = arith.constant 0 : index
    %c0_2 = arith.constant 0 : index
    %1 = vector.load %arg4[%c0_1, %c0_2] : memref<3136x32xbf16, #tpu.memory_space<vmem>>, vector<3136x32xbf16>
    %cst = arith.constant dense<0.000000e+00> : vector<16x32xf32>
    %2 = tpu.matmul %0, %1, %cst {dimension_numbers = #tpu.dot_dimension_numbers<[1], [0], [0], [1], [0, 0, 1, 1], [], []>} : vector<16x3136xbf16>, vector<3136x32xbf16>, vector<16x32xf32> -> vector<16x32xf32>
    %c0_3 = arith.constant 0 : index
    %c0_4 = arith.constant 0 : index
    %3 = vector.load %arg5[%c0_3, %c0_4] : memref<1x32xf32, #tpu.memory_space<vmem>>, vector<1x32xf32>
    %4 = vector.broadcast %3 : vector<1x32xf32> to vector<16x32xf32>
    %5 = arith.addf %2, %4 : vector<16x32xf32>
    %c0_5 = arith.constant 0 : index
    %c0_6 = arith.constant 0 : index
    %6 = vector.load %arg2[%c0_5, %c0_6] : memref<16x768xbf16, #tpu.memory_space<vmem>>, vector<16x768xbf16>
    %c0_7 = arith.constant 0 : index
    %c0_8 = arith.constant 0 : index
    %7 = vector.load %arg6[%c0_7, %c0_8] : memref<768x32xbf16, #tpu.memory_space<vmem>>, vector<768x32xbf16>
    %cst_9 = arith.constant dense<0.000000e+00> : vector<16x32xf32>
    %8 = tpu.matmul %6, %7, %cst_9 {dimension_numbers = #tpu.dot_dimension_numbers<[1], [0], [0], [1], [0, 0, 1, 1], [], []>} : vector<16x768xbf16>, vector<768x32xbf16>, vector<16x32xf32> -> vector<16x32xf32>
    %c0_10 = arith.constant 0 : index
    %c0_11 = arith.constant 0 : index
    %9 = vector.load %arg7[%c0_10, %c0_11] : memref<1x32xf32, #tpu.memory_space<vmem>>, vector<1x32xf32>
    %10 = vector.broadcast %9 : vector<1x32xf32> to vector<16x32xf32>
    %11 = arith.addf %8, %10 : vector<16x32xf32>
    %c0_12 = arith.constant 0 : index
    %c0_13 = arith.constant 0 : index
    %12 = vector.load %arg3[%c0_12, %c0_13] : memref<16x16xbf16, #tpu.memory_space<vmem>>, vector<16x16xbf16>
    %c0_14 = arith.constant 0 : index
    %c0_15 = arith.constant 0 : index
    %13 = vector.load %arg8[%c0_14, %c0_15] : memref<16x16xbf16, #tpu.memory_space<vmem>>, vector<16x16xbf16>
    %cst_16 = arith.constant dense<0.000000e+00> : vector<16x16xf32>
    %14 = tpu.matmul %12, %13, %cst_16 {dimension_numbers = #tpu.dot_dimension_numbers<[1], [0], [0], [1], [0, 0, 1, 1], [], []>} : vector<16x16xbf16>, vector<16x16xbf16>, vector<16x16xf32> -> vector<16x16xf32>
    %c0_17 = arith.constant 0 : index
    %c0_18 = arith.constant 0 : index
    %15 = vector.load %arg9[%c0_17, %c0_18] : memref<1x16xf32, #tpu.memory_space<vmem>>, vector<1x16xf32>
    %16 = vector.broadcast %15 : vector<1x16xf32> to vector<16x16xf32>
    %17 = arith.addf %14, %16 : vector<16x16xf32>
    %cst_19 = arith.constant 0.000000e+00 : f32
    %18 = vector.broadcast %cst_19 : f32 to vector<16x16xf32>
    %19 = arith.maximumf %17, %18 : vector<16x16xf32>
    %20 = arith.truncf %19 : vector<16x16xf32> to vector<16x16xbf16>
    %c0_20 = arith.constant 0 : index
    %c0_21 = arith.constant 0 : index
    %21 = vector.load %arg10[%c0_20, %c0_21] : memref<16x32xbf16, #tpu.memory_space<vmem>>, vector<16x32xbf16>
    %cst_22 = arith.constant dense<0.000000e+00> : vector<16x32xf32>
    %22 = tpu.matmul %20, %21, %cst_22 {dimension_numbers = #tpu.dot_dimension_numbers<[1], [0], [0], [1], [0, 0, 1, 1], [], []>} : vector<16x16xbf16>, vector<16x32xbf16>, vector<16x32xf32> -> vector<16x32xf32>
    %c0_23 = arith.constant 0 : index
    %c0_24 = arith.constant 0 : index
    %23 = vector.load %arg11[%c0_23, %c0_24] : memref<1x32xf32, #tpu.memory_space<vmem>>, vector<1x32xf32>
    %24 = vector.broadcast %23 : vector<1x32xf32> to vector<16x32xf32>
    %25 = arith.addf %22, %24 : vector<16x32xf32>
    %26 = arith.truncf %5 : vector<16x32xf32> to vector<16x32xbf16>
    %c0_25 = arith.constant 0 : index
    %c0_26 = arith.constant 0 : index
    %27 = vector.load %arg12[%c0_25, %c0_26] : memref<32x32xbf16, #tpu.memory_space<vmem>>, vector<32x32xbf16>
    %cst_27 = arith.constant dense<0.000000e+00> : vector<16x32xf32>
    %28 = tpu.matmul %26, %27, %cst_27 {dimension_numbers = #tpu.dot_dimension_numbers<[1], [0], [0], [1], [0, 0, 1, 1], [], []>} : vector<16x32xbf16>, vector<32x32xbf16>, vector<16x32xf32> -> vector<16x32xf32>
    %29 = arith.truncf %11 : vector<16x32xf32> to vector<16x32xbf16>
    %c0_28 = arith.constant 0 : index
    %c0_29 = arith.constant 0 : index
    %30 = vector.load %arg13[%c0_28, %c0_29] : memref<32x32xbf16, #tpu.memory_space<vmem>>, vector<32x32xbf16>
    %cst_30 = arith.constant dense<0.000000e+00> : vector<16x32xf32>
    %31 = tpu.matmul %29, %30, %cst_30 {dimension_numbers = #tpu.dot_dimension_numbers<[1], [0], [0], [1], [0, 0, 1, 1], [], []>} : vector<16x32xbf16>, vector<32x32xbf16>, vector<16x32xf32> -> vector<16x32xf32>
    %32 = arith.addf %28, %31 : vector<16x32xf32>
    %33 = arith.truncf %25 : vector<16x32xf32> to vector<16x32xbf16>
    %c0_31 = arith.constant 0 : index
    %c0_32 = arith.constant 0 : index
    %34 = vector.load %arg14[%c0_31, %c0_32] : memref<32x32xbf16, #tpu.memory_space<vmem>>, vector<32x32xbf16>
    %cst_33 = arith.constant dense<0.000000e+00> : vector<16x32xf32>
    %35 = tpu.matmul %33, %34, %cst_33 {dimension_numbers = #tpu.dot_dimension_numbers<[1], [0], [0], [1], [0, 0, 1, 1], [], []>} : vector<16x32xbf16>, vector<32x32xbf16>, vector<16x32xf32> -> vector<16x32xf32>
    %36 = arith.addf %32, %35 : vector<16x32xf32>
    %c0_34 = arith.constant 0 : index
    %c0_35 = arith.constant 0 : index
    %37 = vector.load %arg15[%c0_34, %c0_35] : memref<1x32xf32, #tpu.memory_space<vmem>>, vector<1x32xf32>
    %38 = vector.broadcast %37 : vector<1x32xf32> to vector<16x32xf32>
    %39 = arith.addf %36, %38 : vector<16x32xf32>
    %cst_36 = arith.constant 0.000000e+00 : f32
    %40 = vector.broadcast %cst_36 : f32 to vector<16x32xf32>
    %41 = arith.maximumf %39, %40 : vector<16x32xf32>
    %42 = arith.truncf %41 : vector<16x32xf32> to vector<16x32xbf16>
    %c0_37 = arith.constant 0 : index
    %c0_38 = arith.constant 0 : index
    %43 = vector.load %arg16[%c0_37, %c0_38] : memref<32x16xbf16, #tpu.memory_space<vmem>>, vector<32x16xbf16>
    %cst_39 = arith.constant dense<0.000000e+00> : vector<16x16xf32>
    %44 = tpu.matmul %42, %43, %cst_39 {dimension_numbers = #tpu.dot_dimension_numbers<[1], [0], [0], [1], [0, 0, 1, 1], [], []>} : vector<16x32xbf16>, vector<32x16xbf16>, vector<16x16xf32> -> vector<16x16xf32>
    %c0_40 = arith.constant 0 : index
    %c0_41 = arith.constant 0 : index
    %45 = vector.load %arg17[%c0_40, %c0_41] : memref<1x16xf32, #tpu.memory_space<vmem>>, vector<1x16xf32>
    %46 = vector.broadcast %45 : vector<1x16xf32> to vector<16x16xf32>
    %47 = arith.addf %44, %46 : vector<16x16xf32>
    %cst_42 = arith.constant 0.000000e+00 : f32
    %48 = vector.broadcast %cst_42 : f32 to vector<16x16xf32>
    %49 = arith.maximumf %47, %48 : vector<16x16xf32>
    %50 = arith.truncf %49 : vector<16x16xf32> to vector<16x16xbf16>
    %c0_43 = arith.constant 0 : index
    %c0_44 = arith.constant 0 : index
    %51 = vector.load %arg18[%c0_43, %c0_44] : memref<16x128xbf16, #tpu.memory_space<vmem>>, vector<16x128xbf16>
    %cst_45 = arith.constant dense<0.000000e+00> : vector<16x128xf32>
    %52 = tpu.matmul %50, %51, %cst_45 {dimension_numbers = #tpu.dot_dimension_numbers<[1], [0], [0], [1], [0, 0, 1, 1], [], []>} : vector<16x16xbf16>, vector<16x128xbf16>, vector<16x128xf32> -> vector<16x128xf32>
    %c0_46 = arith.constant 0 : index
    %c0_47 = arith.constant 0 : index
    %53 = vector.load %arg19[%c0_46, %c0_47] : memref<1x128xf32, #tpu.memory_space<vmem>>, vector<1x128xf32>
    %54 = vector.broadcast %53 : vector<1x128xf32> to vector<16x128xf32>
    %55 = arith.addf %52, %54 : vector<16x128xf32>
    %56 = math.tanh %55 : vector<16x128xf32>
    %c0_48 = arith.constant 0 : index
    %c0_49 = arith.constant 0 : index
    %57 = vector.load %arg20[%c0_48, %c0_49] : memref<16x128xf32, #tpu.memory_space<vmem>>, vector<16x128xf32>
    tpu.vector_store %arg20[%c0_48, %c0_49], %56 {strides = array<i32>} : memref<16x128xf32, #tpu.memory_space<vmem>>, vector<16x128xf32>,
    return
  }
  func.func @transform_0(%arg0: i32) -> (i32, i32) {
    %c0_i32 = arith.constant 0 : i32
    %c0_i32_0 = arith.constant 0 : i32
    return %arg0, %c0_i32 : i32, i32
  }
  func.func @transform_1(%arg0: i32) -> (i32, i32) {
    %c0_i32 = arith.constant 0 : i32
    %c0_i32_0 = arith.constant 0 : i32
    return %arg0, %c0_i32 : i32, i32
  }
  func.func @transform_2(%arg0: i32) -> (i32, i32) {
    %c0_i32 = arith.constant 0 : i32
    %c0_i32_0 = arith.constant 0 : i32
    return %arg0, %c0_i32 : i32, i32
  }
  func.func @transform_3(%arg0: i32) -> (i32, i32) {
    %c0_i32 = arith.constant 0 : i32
    %c0_i32_0 = arith.constant 0 : i32
    %c0_i32_1 = arith.constant 0 : i32
    return %c0_i32, %c0_i32_0 : i32, i32
  }
  func.func @transform_4(%arg0: i32) -> (i32, i32) {
    %c0_i32 = arith.constant 0 : i32
    %c0_i32_0 = arith.constant 0 : i32
    %c0_i32_1 = arith.constant 0 : i32
    return %c0_i32, %c0_i32_0 : i32, i32
  }
  func.func @transform_5(%arg0: i32) -> (i32, i32) {
    %c0_i32 = arith.constant 0 : i32
    %c0_i32_0 = arith.constant 0 : i32
    %c0_i32_1 = arith.constant 0 : i32
    return %c0_i32, %c0_i32_0 : i32, i32
  }
  func.func @transform_6(%arg0: i32) -> (i32, i32) {
    %c0_i32 = arith.constant 0 : i32
    %c0_i32_0 = arith.constant 0 : i32
    %c0_i32_1 = arith.constant 0 : i32
    return %c0_i32, %c0_i32_0 : i32, i32
  }
  func.func @transform_7(%arg0: i32) -> (i32, i32) {
    %c0_i32 = arith.constant 0 : i32
    %c0_i32_0 = arith.constant 0 : i32
    %c0_i32_1 = arith.constant 0 : i32
    return %c0_i32, %c0_i32_0 : i32, i32
  }
  func.func @transform_8(%arg0: i32) -> (i32, i32) {
    %c0_i32 = arith.constant 0 : i32
    %c0_i32_0 = arith.constant 0 : i32
    %c0_i32_1 = arith.constant 0 : i32
    return %c0_i32, %c0_i32_0 : i32, i32
  }
  func.func @transform_9(%arg0: i32) -> (i32, i32) {
    %c0_i32 = arith.constant 0 : i32
    %c0_i32_0 = arith.constant 0 : i32
    %c0_i32_1 = arith.constant 0 : i32
    return %c0_i32, %c0_i32_0 : i32, i32
  }
  func.func @transform_10(%arg0: i32) -> (i32, i32) {
    %c0_i32 = arith.constant 0 : i32
    %c0_i32_0 = arith.constant 0 : i32
    %c0_i32_1 = arith.constant 0 : i32
    return %c0_i32, %c0_i32_0 : i32, i32
  }
  func.func @transform_11(%arg0: i32) -> (i32, i32) {
    %c0_i32 = arith.constant 0 : i32
    %c0_i32_0 = arith.constant 0 : i32
    %c0_i32_1 = arith.constant 0 : i32
    return %c0_i32, %c0_i32_0 : i32, i32
  }
  func.func @transform_12(%arg0: i32) -> (i32, i32) {
    %c0_i32 = arith.constant 0 : i32
    %c0_i32_0 = arith.constant 0 : i32
    %c0_i32_1 = arith.constant 0 : i32
    return %c0_i32, %c0_i32_0 : i32, i32
  }
  func.func @transform_13(%arg0: i32) -> (i32, i32) {
    %c0_i32 = arith.constant 0 : i32
    %c0_i32_0 = arith.constant 0 : i32
    %c0_i32_1 = arith.constant 0 : i32
    return %c0_i32, %c0_i32_0 : i32, i32
  }
  func.func @transform_14(%arg0: i32) -> (i32, i32) {
    %c0_i32 = arith.constant 0 : i32
    %c0_i32_0 = arith.constant 0 : i32
    %c0_i32_1 = arith.constant 0 : i32
    return %c0_i32, %c0_i32_0 : i32, i32
  }
  func.func @transform_15(%arg0: i32) -> (i32, i32) {
    %c0_i32 = arith.constant 0 : i32
    %c0_i32_0 = arith.constant 0 : i32
    %c0_i32_1 = arith.constant 0 : i32
    return %c0_i32, %c0_i32_0 : i32, i32
  }
  func.func @transform_16(%arg0: i32) -> (i32, i32) {
    %c0_i32 = arith.constant 0 : i32
    %c0_i32_0 = arith.constant 0 : i32
    %c0_i32_1 = arith.constant 0 : i32
    return %c0_i32, %c0_i32_0 : i32, i32
  }
  func.func @transform_17(%arg0: i32) -> (i32, i32) {
    %c0_i32 = arith.constant 0 : i32
    %c0_i32_0 = arith.constant 0 : i32
    %c0_i32_1 = arith.constant 0 : i32
    return %c0_i32, %c0_i32_0 : i32, i32
  }
  func.func @transform_18(%arg0: i32) -> (i32, i32) {
    %c0_i32 = arith.constant 0 : i32
    %c0_i32_0 = arith.constant 0 : i32
    %c0_i32_1 = arith.constant 0 : i32
    return %c0_i32, %c0_i32_0 : i32, i32
  }
  func.func @transform_19(%arg0: i32) -> (i32, i32) {
    %c0_i32 = arith.constant 0 : i32
    %c0_i32_0 = arith.constant 0 : i32
    return %arg0, %c0_i32 : i32, i32
  }
}

</mosaic_0001>

<bundles_post_ra>
// kernel: robot_control_forward.4
= control target key start
LH: loop header
LB: loop body
LE: loop exit
PB: predicated region body
PF: predicated region fallthrough
CT: control target
= control target key end

     0   :  { %s3997_s12 = smov 0   ;;  %s4856_s0 = inlined_call_operand.vmem [shape: bf16[2,442,48], index: 0, kind: input, shape index: {}]   ;;  %s4857_s1 = inlined_call_operand.vmem [shape: bf16[4,48,32], index: 1, kind: input, shape index: {}]   ;;  %s4858_s2 = inlined_call_operand.vmem [shape: f32[1,32], index: 2, kind: input, shape index: {}]   ;;  %s4859_s3 = inlined_call_operand.vmem [shape: bf16[2,420,32], index: 3, kind: output, shape index: {}]  }
   0x1 LB: > { %s3000_s13 = sadd.s32 4294967295, %s3973_s12   ;;  %p3004_p0 = scmp.ge.s32.totalorder %s3973_s12, 1  ;;  %s3973_s12 = sphi %s3997_s12, %s13_s12  }
   0x2   : > { %p137_p1 = scmp.lt.s32.totalorder %s3973_s12, 3 }
   0x4   : > { %p138_p2 = pnand %p3004_p0, %p137_p1 }
   0x6   : > { %141 = sbr.rel (%p138_p2) target bundleno = 654 (0x28e), region = 32 }
   0xb   : > { %v3898_v0 = vld [vmem:[%s4857_s1 + $0x10] sm:$0xff]   ;;  %v3975_v1 = vmov 0.0   ;;  %v3899_v2 = vld [vmem:[%s4857_s1 + $0x28] sm:$0xff]   ;;  %vm3976_vm0 = vmmov 0   ;;  %p161_p3 = scmp.lt.s32.totalorder %s3000_s13, 1  ;;  %v3901_v4 = vld [vmem:[%s4857_s1 + $0x20] sm:$0xff]  }
   0xc   : > { %3544 = vmatprep.subr.bf16.mxu1 %v3975_v1  ;;  %3430 = vmatprep.subr.bf16.mxu0 %v3975_v1  ;;  %v3900_v3 = vld [vmem:[%s4857_s1 + $0x8] sm:$0xff]   ;;  %v3902_v5 = vld [vmem:[%s4857_s1] sm:$0xff]   ;;  %v3903_v6 = vld [vmem:[%s4857_s1 + $0x18] sm:$0xff]   ;;  %vm606_vm1 = vcmask 392192   ;;  %vm372_vm2 = vsmask.f32 7424 }
   0xd   : > { %3545 = vmatpush3.bf16.msra.mxu1 %v3898_v0  ;;  %3550 = vmatprep.mubr.msk.bf16.mxu1 %vm3976_vm0, %v3975_v1  ;;  %s4881_s13 = smov (!%p161_p3, %s3000_s13), 1  ;;  %v3907_v7 = vld [vmem:[%s4857_s1 + $0x58] sm:$0xff]   ;;  %v3906_v16 = vld [vmem:[%s4857_s1 + $0x40] sm:$0xff]   ;;  %v3918_v28 = vld [vmem:[%s4857_s1 + $0x50] sm:$0xff]   ;;  %vm2110_vm3 = vcmask 1044480   ;;  %vm2890_vm5 = vcmask 257024  }
   0xe   : > { %3431 = vmatpush3.bf16.msra.mxu0 %v3899_v2  ;;  %3546 = vmatprep.subr.bf16.mxu1 %v3975_v1  ;;  %s3886_s26 = smul.u32 224, %s4881_s13  ;;  %v3917_v24 = vld [vmem:[%s4857_s1 + $0x38] sm:$0xff]   ;;  %v3928_v38 = vld [vmem:[%s4857_s1 + $0x30] sm:$0xff]   ;;  %v3929_v39 = vld [vmem:[%s4857_s1 + $0x48] sm:$0xff]   ;;  %vm1456_vm4 = vsmask.f32 5376 }
   0xf   : > { %3432 = vmatprep.subr.bf16.mxu0 %v3975_v1  ;;  %3436 = vmatprep.mubr.msk.bf16.mxu0 %vm3976_vm0, %v3975_v1  ;;  %s3887_s19 = smul.u32 212, %s4881_s13  ;;  %vm2943_vm6 = vcmask 254976  }
  0x10   : > { %s4039_s29 = scalar_lea.vmem %s4856_s0, %s3886_s26 }
  0x11   : > { %3547 = vmatpush3.bf16.msra.mxu1 %v3900_v3  ;;  %v3904_v8 = vld [vmem:[%s4039_s29] sm:$0xff]   ;;  %v3905_v9 = vld [vmem:[%s4039_s29 + $0x8] sm:$0xff]   ;;  %v3908_v13 = vld [vmem:[%s4039_s29 + $0x10] sm:$0xff]   ;;  %s4638_s22 = scalar_lea.vmem %s4859_s3, %s3887_s19 }
  0x12   : > { %3433 = vmatpush3.bf16.msra.mxu0 %v3901_v4  ;;  %3548 = vmatprep.subr.bf16.mxu1 %v3975_v1  ;;  %v374_v10 = vshrl.u32 %v3904_v8, 16  ;;  %v376_v11 = vshll.u32 %v3904_v8, 16  ;;  %v381_v12 = vshll.u32 %v3905_v9, 16  ;;  %v385_v18 = vshrl.u32 %v3905_v9, 16  ;;  %v3909_v23 = vld [vmem:[%s4039_s29 + $0x18] sm:$0xff]   ;;  %v3910_v31 = vld [vmem:[%s4039_s29 + $0x20] sm:$0xff]  }
  0x13   : > { %3434 = vmatprep.subr.bf16.mxu0 %v3975_v1  ;;  %v389_v19 = vshll.u32 %v3908_v13, 16  ;;  %v393_v26 = vshrl.u32 %v3908_v13, 16  ;;  %v397_v27 = vshll.u32 %v3909_v23, 16  ;;  %v401_v33 = vshrl.u32 %v3909_v23, 16  ;;  %v3911_v37 = vld [vmem:[%s4039_s29 + $0x28] sm:$0xff]   ;;  %v3912_v45 = vld [vmem:[%s4039_s29 + $0x30] sm:$0xff]  }
  0x14   : > { %v378_v14 = vrot.slane %v376_v11, 1  ;;  %v383_v15 = vrot.slane %v381_v12, 1  ;;  %v405_v34 = vshll.u32 %v3910_v31, 16  ;;  %v409_v41 = vshrl.u32 %v3910_v31, 16  ;;  %v3913_v51 = vld [vmem:[%s4039_s29 + $0x38] sm:$0xff]   ;;  %v3914_v57 = vld [vmem:[%s4039_s29 + $0x40] sm:$0xff]  }
  0x15   : > { %3549 = vmatpush3.bf16.msra.mxu1 %v3902_v5  ;;  %v391_v22 = vrot.slane %v389_v19, 1  ;;  %v399_v30 = vrot.slane %v397_v27, 1  ;;  %v413_v42 = vshll.u32 %v3911_v37, 16  ;;  %v417_v47 = vshrl.u32 %v3911_v37, 16  ;;  %v3915_v63 = vld [vmem:[%s4039_s29 + $0x48] sm:$0xff]   ;;  %v3919_v12 = vld [vmem:[%s4039_s29 + $0x58] sm:$0xff]  }
  0x16   : > { %3435 = vmatpush3.bf16.msra.mxu0 %v3903_v6  ;;  %3772 = vmatprep.subr.bf16.mxu1 %v3975_v1  ;;  %v379_v17 = vor.u32 %v378_v14, %v374_v10  ;;  %v387_v21 = vor.u32 %v385_v18, %v383_v15  ;;  %v407_v36 = vrot.slane %v405_v34, 1  ;;  %v421_v48 = vshll.u32 %v3912_v45, 16  ;;  %v3916_v6 = vld [vmem:[%s4039_s29 + $0x50] sm:$0xff]   ;;  %v3920_v18 = vld [vmem:[%s4039_s29 + $0x60] sm:$0xff]  }
  0x17   : > { %3658 = vmatprep.subr.bf16.mxu0 %v3975_v1  ;;  %v395_v29 = vor.u32 %v393_v26, %v391_v22  ;;  %v403_v35 = vor.u32 %v401_v33, %v399_v30  ;;  %v415_v44 = vrot.slane %v413_v42, 1  ;;  %v425_v53 = vshrl.u32 %v3912_v45, 16  ;;  %v3924_v42 = vld [vmem:[%s4039_s29 + $0x80] sm:$0xff]  }
  0x18   : > { %3551 = vmatmul.mubr.msk.bf16.vlgmr.msra.gmra.mxu1 %vm606_vm1, %v3904_v8  ;;  %v384_v20 = vsel %vm372_vm2, %v379_v17, %v383_v15  ;;  %v392_v25 = vsel %vm372_vm2, %v387_v21, %v391_v22  ;;  %v411_v43 = vor.u32 %v409_v41, %v407_v36  ;;  %v423_v50 = vrot.slane %v421_v48, 1  ;;  %v3925_v48 = vld [vmem:[%s4039_s29 + $0x88] sm:$0xff]  }
  0x19   : > { %3773 = vmatpush3.bf16.msra.mxu1 %v3907_v7  ;;  %3554 = vmatprep.mubr.msk.bf16.mxu1 %vm3976_vm0, %v3975_v1  ;;  %v400_v32 = vsel %vm372_vm2, %v395_v29, %v399_v30  ;;  %v408_v40 = vsel %vm372_vm2, %v403_v35, %v407_v36  ;;  %v419_v49 = vor.u32 %v417_v47, %v415_v44  ;;  %v429_v54 = vshll.u32 %v3913_v51, 16  ;;  %v3922_v30 = vld [vmem:[%s4039_s29 + $0x70] sm:$0xff]   ;;  %v3923_v36 = vld [vmem:[%s4039_s29 + $0x78] sm:$0xff]  }
  0x1a   : > { %3774 = vmatprep.subr.bf16.mxu1 %v3975_v1  ;;  %3437 = vmatmul.mubr.msk.bf16.vlgmr.msra.gmra.mxu0 %vm606_vm1, %v384_v20  ;;  %v416_v46 = vsel %vm372_vm2, %v411_v43, %v415_v44  ;;  %v427_v55 = vor.u32 %v425_v53, %v423_v50  ;;  %v433_v59 = vshrl.u32 %v3913_v51, 16  ;;  %v437_v60 = vshll.u32 %v3914_v57, 16 }
  0x1b   : > { %3659 = vmatpush3.bf16.msra.mxu0 %v3906_v16  ;;  %3440 = vmatprep.mubr.msk.bf16.mxu0 %vm3976_vm0, %v3975_v1  ;;  %v424_v52 = vsel %vm372_vm2, %v419_v49, %v423_v50  ;;  %v431_v56 = vrot.slane %v429_v54, 1  ;;  %v441_v2 = vshrl.u32 %v3914_v57, 16  ;;  %v445_v3 = vshll.u32 %v3915_v63, 16  ;;  %v3926_v54 = vld [vmem:[%s4039_s29 + $0x90] sm:$0xff]  }
  0x1c   : > { %3660 = vmatprep.subr.bf16.mxu0 %v3975_v1  ;;  %v439_v62 = vrot.slane %v437_v60, 1  ;;  %v449_v8 = vshrl.u32 %v3915_v63, 16  ;;  %v457_v14 = vshrl.u32 %v3916_v6, 16  ;;  %v461_v15 = vshll.u32 %v3919_v12, 16  ;;  %v3927_v60 = vld [vmem:[%s4039_s29 + $0x98] sm:$0xff]  }
  0x1d   : > { %3775 = vmatpush3.bf16.msra.mxu1 %v3918_v28  ;;  %v432_v58 = vsel %vm372_vm2, %v427_v55, %v431_v56  ;;  %v435_v61 = vor.u32 %v433_v59, %v431_v56  ;;  %v447_v5 = vrot.slane %v445_v3, 1  ;;  %v465_v20 = vshrl.u32 %v3919_v12, 16  ;;  %v3930_v3 = vld [vmem:[%s4039_s29 + $0xa0] sm:$0xff]  }
  0x1e   : > { %3776 = vmatprep.subr.bf16.mxu1 %v3975_v1  ;;  %v443_v4 = vor.u32 %v441_v2, %v439_v62  ;;  %v463_v17 = vrot.slane %v461_v15, 1  ;;  %v469_v21 = vshll.u32 %v3920_v18, 16  ;;  %v473_v26 = vshrl.u32 %v3920_v18, 16  ;;  %v3932_v15 = vld [vmem:[%s4039_s29 + $0xb0] sm:$0xff]  }
  0x1f   : > { %3661 = vmatpush3.bf16.msra.mxu0 %v3917_v24  ;;  %v440_v0 = vsel %vm372_vm2, %v435_v61, %v439_v62  ;;  %v451_v10 = vor.u32 %v449_v8, %v447_v5  ;;  %v3921_v24 = vld [vmem:[%s4039_s29 + $0x68] sm:$0xff]   ;;  %v485_v33 = vshll.u32 %v3922_v30, 16  ;;  %v497_v44 = vshrl.u32 %v3923_v36, 16 }
  0x20   : > { %3555 = vmatmul.mubr.msk.bf16.gmra.mxu1 %vm606_vm1, %v3905_v9  ;;  %3662 = vmatprep.subr.bf16.mxu0 %v3975_v1  ;;  %v448_v7 = vsel %vm372_vm2, %v443_v4, %v447_v5  ;;  %v453_v9 = vshll.u32 %v3916_v6, 16  ;;  %v467_v22 = vor.u32 %v465_v20, %v463_v17  ;;  %v477_v27 = vshll.u32 %v3921_v24, 16 }
  0x21   : > { %3558 = vmatprep.mubr.msk.bf16.mxu1 %vm3976_vm0, %v3975_v1  ;;  %3777 = vmatpush3.bf16.msra.mxu1 %v3929_v39  ;;  %v487_v35 = vrot.slane %v485_v33, 1  ;;  %v493_v39 = vshll.u32 %v3923_v36, 16  ;;  %v505_v50 = vshrl.u32 %v3924_v42, 16  ;;  %v513_v56 = vshrl.u32 %v3925_v48, 16  ;;  %v3935_v33 = vld [vmem:[%s4039_s29 + $0xc8] sm:$0xff]  }
  0x22   : > { %3441 = vmatmul.mubr.msk.bf16.gmra.mxu0 %vm606_vm1, %v392_v25  ;;  %v455_v11 = vrot.slane %v453_v9, 1  ;;  %v479_v29 = vrot.slane %v477_v27, 1  ;;  %v521_v62 = vshrl.u32 %v3926_v54, 16  ;;  %v529_v5 = vshrl.u32 %v3927_v60, 16  ;;  %v3931_v9 = vld [vmem:[%s4039_s29 + $0xa8] sm:$0xff]   ;;  %v3934_v27 = vld [vmem:[%s4039_s29 + $0xc0] sm:$0xff]  }
  0x23   : > { %3444 = vmatprep.mubr.msk.bf16.mxu0 %vm3976_vm0, %v3975_v1  ;;  %3663 = vmatpush3.bf16.msra.mxu0 %v3928_v38  ;;  %v489_v38 = vshrl.u32 %v3922_v30, 16  ;;  %v495_v41 = vrot.slane %v493_v39, 1  ;;  %v3936_v39 = vld [vmem:[%s4039_s29 + $0xd0] ss:$0 sps:$4 sm:$0x77]  }
  0x24   : > { %v459_v16 = vor.u32 %v457_v14, %v455_v11 }
  0x26   : > { %v464_v19 = vsel %vm372_vm2, %v459_v16, %v463_v17  ;;  %v545_v17 = vshrl.u32 %v3931_v9, 16 }
  0x28   : > { %3559 = vmatmul.mubr.msk.bf16.gmra.mxu1 %vm606_vm1, %v3908_v13  ;;  %v456_v13 = vsel %vm372_vm2, %v451_v10, %v455_v11  ;;  %v537_v11 = vshrl.u32 %v3930_v3, 16 }
  0x29   : > { %3562 = vmatprep.mubr.msk.bf16.mxu1 %vm3976_vm0, %v3975_v1 }
  0x2a   : > { %3445 = vmatmul.mubr.msk.bf16.gmra.mxu0 %vm606_vm1, %v400_v32  ;;  %v481_v32 = vshrl.u32 %v3921_v24, 16 }
  0x2b   : > { %3448 = vmatprep.mubr.msk.bf16.mxu0 %vm3976_vm0, %v3975_v1 }
  0x2c   : > { %v483_v34 = vor.u32 %v481_v32, %v479_v29 }
  0x30   : > { %3563 = vmatmul.mubr.msk.bf16.gmra.mxu1 %vm606_vm1, %v3909_v23  ;;  %v471_v23 = vrot.slane %v469_v21, 1  ;;  %v3933_v21 = vld [vmem:[%s4039_s29 + $0xb8] sm:$0xff]  }
  0x31   : > { %3566 = vmatprep.mubr.msk.bf16.mxu1 %vm3976_vm0, %v3975_v1 }
  0x32   : > { %3449 = vmatmul.mubr.msk.bf16.gmra.mxu0 %vm606_vm1, %v408_v40  ;;  %v472_v25 = vsel %vm372_vm2, %v467_v22, %v471_v23  ;;  %v475_v28 = vor.u32 %v473_v26, %v471_v23  ;;  %v491_v40 = vor.u32 %v489_v38, %v487_v35  ;;  %v553_v23 = vshrl.u32 %v3932_v15, 16 }
  0x33   : > { %3452 = vmatprep.mubr.msk.bf16.mxu0 %vm3976_vm0, %v3975_v1 }
  0x34   : > { %v496_v43 = vsel %vm372_vm2, %v491_v40, %v495_v41 }
  0x38   : > { %3567 = vmatmul.mubr.msk.bf16.gmra.mxu1 %vm606_vm1, %v3910_v31  ;;  %v480_v31 = vsel %vm372_vm2, %v475_v28, %v479_v29  ;;  %v561_v29 = vshrl.u32 %v3933_v21, 16 }
  0x39   : > { %3570 = vmatprep.mubr.msk.bf16.mxu1 %vm3976_vm0, %v3975_v1 }
  0x3a   : > { %3453 = vmatmul.mubr.msk.bf16.gmra.mxu0 %vm606_vm1, %v416_v46  ;;  %v499_v46 = vor.u32 %v497_v44, %v495_v41  ;;  %v581_v44 = vshll.u32 %v3936_v39, 16 }
  0x3b   : > { %3456 = vmatprep.mubr.msk.bf16.mxu0 %vm3976_vm0, %v3975_v1 }
  0x40   : > { %3571 = vmatmul.mubr.msk.bf16.gmra.mxu1 %vm606_vm1, %v3911_v37  ;;  %v488_v37 = vsel %vm372_vm2, %v483_v34, %v487_v35  ;;  %v569_v35 = vshrl.u32 %v3934_v27, 16 }
  0x41   : > { %3574 = vmatprep.mubr.msk.bf16.mxu1 %vm3976_vm0, %v3975_v1 }
  0x42   : > { %3457 = vmatmul.mubr.msk.bf16.gmra.mxu0 %vm606_vm1, %v424_v52 }
  0x43   : > { %3460 = vmatprep.mubr.msk.bf16.mxu0 %vm3976_vm0, %v3975_v1 }
  0x48   : > { %3575 = vmatmul.mubr.msk.bf16.gmra.mxu1 %vm606_vm1, %v3912_v45  ;;  %v501_v45 = vshll.u32 %v3924_v42, 16 }
  0x49   : > { %3578 = vmatprep.mubr.msk.bf16.mxu1 %vm3976_vm0, %v3975_v1 }
  0x4a   : > { %3461 = vmatmul.mubr.msk.bf16.gmra.mxu0 %vm606_vm1, %v432_v58  ;;  %v503_v47 = vrot.slane %v501_v45, 1 }
  0x4b   : > { %3464 = vmatprep.mubr.msk.bf16.mxu0 %vm3976_vm0, %v3975_v1 }
  0x4c   : > { %v504_v49 = vsel %vm372_vm2, %v499_v46, %v503_v47  ;;  %v507_v52 = vor.u32 %v505_v50, %v503_v47  ;;  %v583_v50 = vrot.slane %v581_v44, 1 }
  0x50   : > { %3579 = vmatmul.mubr.msk.bf16.gmra.mxu1 %vm606_vm1, %v3913_v51  ;;  %v509_v51 = vshll.u32 %v3925_v48, 16 }
  0x51   : > { %3582 = vmatprep.mubr.msk.bf16.mxu1 %vm3976_vm0, %v3975_v1 }
  0x52   : > { %3465 = vmatmul.mubr.msk.bf16.gmra.mxu0 %vm606_vm1, %v440_v0  ;;  %v511_v53 = vrot.slane %v509_v51, 1  ;;  %v1260_v51 = vld [vmem:[%s4039_s29 + $0x8] sm:$0xc] }
  0x53   : > { %3468 = vmatprep.mubr.msk.bf16.mxu0 %vm3976_vm0, %v3975_v1 }
  0x54   : > { %v512_v55 = vsel %vm372_vm2, %v507_v52, %v511_v53  ;;  %v515_v58 = vor.u32 %v513_v56, %v511_v53  ;;  %v1261_v52 = vld [vmem:[%s4039_s29 + $0xc] sm:$0xf] }
  0x55   : > { %v3107_v56 = vcombine.low %v1260_v51, %v1261_v52 }
  0x58   : > { %3583 = vmatmul.mubr.msk.bf16.gmra.mxu1 %vm606_vm1, %v3914_v57  ;;  %v517_v57 = vshll.u32 %v3926_v54, 16 }
  0x59   : > { %3586 = vmatprep.mubr.msk.bf16.mxu1 %vm3976_vm0, %v3975_v1 }
  0x5a   : > { %3469 = vmatmul.mubr.msk.bf16.gmra.mxu0 %vm606_vm1, %v448_v7  ;;  %v519_v59 = vrot.slane %v517_v57, 1 }
  0x5b   : > { %3472 = vmatprep.mubr.msk.bf16.mxu0 %vm3976_vm0, %v3975_v1 }
  0x5c   : > { %v520_v61 = vsel %vm372_vm2, %v515_v58, %v519_v59  ;;  %v523_v0 = vor.u32 %v521_v62, %v519_v59 }
  0x60   : > { %3587 = vmatmul.mubr.msk.bf16.gmra.mxu1 %vm606_vm1, %v3915_v63  ;;  %v525_v63 = vshll.u32 %v3927_v60, 16 }
  0x61   : > { %3590 = vmatprep.mubr.msk.bf16.mxu1 %vm3976_vm0, %v3975_v1 }
  0x62   : > { %3473 = vmatmul.mubr.msk.bf16.gmra.mxu0 %vm606_vm1, %v456_v13  ;;  %v527_v2 = vrot.slane %v525_v63, 1 }
  0x63   : > { %3476 = vmatprep.mubr.msk.bf16.mxu0 %vm3976_vm0, %v3975_v1 }
  0x64   : > { %v528_v4 = vsel %vm372_vm2, %v523_v0, %v527_v2  ;;  %v531_v7 = vor.u32 %v529_v5, %v527_v2  ;;  %v3937_v0 = vld [vmem:[%s4039_s29 + $0xd0] ss:$0 sps:$4 sm:$0x33]   ;;  %v585_v2 = vshrl.u32 %v3936_v39, 16  ;;  %v1458_v5 = vshrl.u32 %v3107_v56, 16 }
  0x68   : > { %3591 = vmatmul.mubr.msk.bf16.gmra.mxu1 %vm606_vm1, %v3916_v6  ;;  %v533_v6 = vshll.u32 %v3930_v3, 16 }
  0x69   : > { %3594 = vmatprep.mubr.msk.bf16.mxu1 %vm3976_vm0, %v3975_v1 }
  0x6a   : > { %3477 = vmatmul.mubr.msk.bf16.gmra.mxu0 %vm606_vm1, %v464_v19  ;;  %v535_v8 = vrot.slane %v533_v6, 1  ;;  %v1461_v6 = vshll.u32 %v3107_v56, 16 }
  0x6b   : > { %3480 = vmatprep.mubr.msk.bf16.mxu0 %vm3976_vm0, %v3975_v1 }
  0x6c   : > { %v536_v10 = vsel %vm372_vm2, %v531_v7, %v535_v8  ;;  %v539_v13 = vor.u32 %v537_v11, %v535_v8 }
  0x70   : > { %3595 = vmatmul.mubr.msk.bf16.gmra.mxu1 %vm606_vm1, %v3919_v12  ;;  %v541_v12 = vshll.u32 %v3931_v9, 16 }
  0x71   : > { %3598 = vmatprep.mubr.msk.bf16.mxu1 %vm3976_vm0, %v3975_v1 }
  0x72   : > { %3481 = vmatmul.mubr.msk.bf16.gmra.mxu0 %vm606_vm1, %v472_v25  ;;  %v543_v14 = vrot.slane %v541_v12, 1 }
  0x73   : > { %3484 = vmatprep.mubr.msk.bf16.mxu0 %vm3976_vm0, %v3975_v1 }
  0x74   : > { %v544_v16 = vsel %vm372_vm2, %v539_v13, %v543_v14  ;;  %v547_v19 = vor.u32 %v545_v17, %v543_v14  ;;  %v587_v13 = vor.u32 %v585_v2, %v583_v50  ;;  %v1460_v17 = vrot.slane %v1458_v5, 2 }
  0x78   : > { %3599 = vmatmul.mubr.msk.bf16.gmra.mxu1 %vm606_vm1, %v3920_v18  ;;  %v549_v18 = vshll.u32 %v3932_v15, 16 }
  0x79   : > { %3602 = vmatprep.mubr.msk.bf16.mxu1 %vm3976_vm0, %v3975_v1 }
  0x7a   : > { %3485 = vmatmul.mubr.msk.bf16.gmra.mxu0 %vm606_vm1, %v480_v31  ;;  %v551_v20 = vrot.slane %v549_v18, 1  ;;  %v1463_v18 = vrot.slane %v1461_v6, 3 }
  0x7b   : > { %3488 = vmatprep.mubr.msk.bf16.mxu0 %vm3976_vm0, %v3975_v1 }
  0x7c   : > { %v552_v22 = vsel %vm372_vm2, %v547_v19, %v551_v20  ;;  %v555_v25 = vor.u32 %v553_v23, %v551_v20  ;;  %v3941_v23 = vld [vmem:[%s4039_s29 + $0x18] sm:$0xff]  }
  0x80   : > { %3603 = vmatmul.mubr.msk.bf16.gmra.mxu1 %vm606_vm1, %v3921_v24  ;;  %v557_v24 = vshll.u32 %v3933_v21, 16 }
  0x81   : > { %3606 = vmatprep.mubr.msk.bf16.mxu1 %vm3976_vm0, %v3975_v1 }
  0x82   : > { %3489 = vmatmul.mubr.msk.bf16.gmra.mxu0 %vm606_vm1, %v488_v37  ;;  %v559_v26 = vrot.slane %v557_v24, 1 }
  0x83   : > { %3492 = vmatprep.mubr.msk.bf16.mxu0 %vm3976_vm0, %v3975_v1 }
  0x84   : > { %v560_v28 = vsel %vm372_vm2, %v555_v25, %v559_v26  ;;  %v563_v31 = vor.u32 %v561_v29, %v559_v26 }
  0x88   : > { %3607 = vmatmul.mubr.msk.bf16.gmra.mxu1 %vm606_vm1, %v3922_v30  ;;  %v565_v30 = vshll.u32 %v3934_v27, 16 }
  0x89   : > { %3610 = vmatprep.mubr.msk.bf16.mxu1 %vm3976_vm0, %v3975_v1 }
  0x8a   : > { %3493 = vmatmul.mubr.msk.bf16.gmra.mxu0 %vm606_vm1, %v496_v43  ;;  %v567_v32 = vrot.slane %v565_v30, 1  ;;  %v577_v43 = vshrl.u32 %v3935_v33, 16 }
  0x8b   : > { %3496 = vmatprep.mubr.msk.bf16.mxu0 %vm3976_vm0, %v3975_v1 }
  0x8c   : > { %v568_v34 = vsel %vm372_vm2, %v563_v31, %v567_v32  ;;  %v571_v37 = vor.u32 %v569_v35, %v567_v32  ;;  %v1475_v32 = vshrl.u32 %v3941_v23, 16 }
  0x90   : > { %3611 = vmatmul.mubr.msk.bf16.gmra.mxu1 %vm606_vm1, %v3923_v36  ;;  %v573_v36 = vshll.u32 %v3935_v33, 16 }
  0x91   : > { %3614 = vmatprep.mubr.msk.bf16.mxu1 %vm3976_vm0, %v3975_v1 }
  0x92   : > { %3497 = vmatmul.mubr.msk.bf16.gmra.mxu0 %vm606_vm1, %v504_v49  ;;  %v575_v38 = vrot.slane %v573_v36, 1 }
  0x93   : > { %3500 = vmatprep.mubr.msk.bf16.mxu0 %vm3976_vm0, %v3975_v1 }
  0x94   : > { %v579_v49 = vor.u32 %v577_v43, %v575_v38  ;;  %v3942_v43 = vld [vmem:[%s4039_s29 + $0x20] sm:$0xff]  }
  0x96   : > { %v584_v59 = vsel %vm372_vm2, %v579_v49, %v583_v50 }
  0x98   : > { %3615 = vmatmul.mubr.msk.bf16.gmra.mxu1 %vm606_vm1, %v3924_v42  ;;  %v576_v42 = vsel %vm372_vm2, %v571_v37, %v575_v38  ;;  %v2114_v37 = vrot.slane %v3941_v23, 3 }
  0x99   : > { %3618 = vmatprep.mubr.msk.bf16.mxu1 %vm3976_vm0, %v3975_v1 }
  0x9a   : > { %3501 = vmatmul.mubr.msk.bf16.gmra.mxu0 %vm606_vm1, %v512_v55 }
  0x9b   : > { %3504 = vmatprep.mubr.msk.bf16.mxu0 %vm3976_vm0, %v3975_v1 }
  0xa0   : > { %3619 = vmatmul.mubr.msk.bf16.gmra.mxu1 %vm606_vm1, %v3925_v48 }
  0xa1   : > { %3622 = vmatprep.mubr.msk.bf16.mxu1 %vm3976_vm0, %v3975_v1 }
  0xa2   : > { %3505 = vmatmul.mubr.msk.bf16.gmra.mxu0 %vm606_vm1, %v520_v61  ;;  %v2099_v61 = vld [vmem:[%s4039_s29 + $0x8] sm:$0x8] }
  0xa3   : > { %3508 = vmatprep.mubr.msk.bf16.mxu0 %vm3976_vm0, %v3975_v1 }
  0xa8   : > { %3623 = vmatmul.mubr.msk.bf16.gmra.mxu1 %vm606_vm1, %v3926_v54 }
  0xa9   : > { %3626 = vmatprep.mubr.msk.bf16.mxu1 %vm3976_vm0, %v3975_v1 }
  0xaa   : > { %3509 = vmatmul.mubr.msk.bf16.gmra.mxu0 %vm606_vm1, %v528_v4  ;;  %v3170_v4 = vcombine.low %v2099_v61, %v1261_v52  ;;  %v1484_v52 = vshrl.u32 %v3942_v43, 16 }
  0xab   : > { %3512 = vmatprep.mubr.msk.bf16.mxu0 %vm3976_vm0, %v3975_v1 }
  0xb0   : > { %3627 = vmatmul.mubr.msk.bf16.gmra.mxu1 %vm606_vm1, %v3927_v60  ;;  %v4278_v60 = vld [vmem:[%s4039_s29 + $0x10] sm:$0xff]  }
  0xb1   : > { %3630 = vmatprep.mubr.msk.bf16.mxu1 %vm3976_vm0, %v3975_v1 }
  0xb2   : > { %3513 = vmatmul.mubr.msk.bf16.gmra.mxu0 %vm606_vm1, %v536_v10  ;;  %v1469_v10 = vshll.u32 %v4278_v60, 16 }
  0xb3   : > { %3516 = vmatprep.mubr.msk.bf16.mxu0 %vm3976_vm0, %v3975_v1 }
  0xb8   : > { %3631 = vmatmul.mubr.msk.bf16.gmra.mxu1 %vm606_vm1, %v3930_v3 }
  0xb9   : > { %3634 = vmatprep.mubr.msk.bf16.mxu1 %vm3976_vm0, %v3975_v1 }
  0xba   : > { %3517 = vmatmul.mubr.msk.bf16.gmra.mxu0 %vm606_vm1, %v544_v16  ;;  %v2112_v16 = vrot.slane %v4278_v60, 3 }
  0xbb   : > { %3520 = vmatprep.mubr.msk.bf16.mxu0 %vm3976_vm0, %v3975_v1 }
  0xc0   : > { %3635 = vmatmul.mubr.msk.bf16.gmra.mxu1 %vm606_vm1, %v3931_v9  ;;  %v1466_v9 = vshrl.u32 %v4278_v60, 16 }
  0xc1   : > { %3638 = vmatprep.mubr.msk.bf16.mxu1 %vm3976_vm0, %v3975_v1 }
  0xc2   : > { %3521 = vmatmul.mubr.msk.bf16.gmra.mxu0 %vm606_vm1, %v552_v22  ;;  %v1471_v22 = vrot.slane %v1469_v10, 3 }
  0xc3   : > { %3524 = vmatprep.mubr.msk.bf16.mxu0 %vm3976_vm0, %v3975_v1 }
  0xc8   : > { %3639 = vmatmul.mubr.msk.bf16.gmra.mxu1 %vm606_vm1, %v3932_v15  ;;  %v2111_v15 = vrot.slane %v3170_v4, 3 }
  0xc9   : > { %3642 = vmatprep.mubr.msk.bf16.mxu1 %vm3976_vm0, %v3975_v1 }
  0xca   : > { %3525 = vmatmul.mubr.msk.bf16.gmra.mxu0 %vm606_vm1, %v560_v28  ;;  %v1464_v28 = vor.u32 %v1463_v18, %v1460_v17 }
  0xcb   : > { %3528 = vmatprep.mubr.msk.bf16.mxu0 %vm3976_vm0, %v3975_v1 }
  0xd0   : > { %3643 = vmatmul.mubr.msk.bf16.gmra.mxu1 %vm606_vm1, %v3933_v21  ;;  %v1468_v21 = vrot.slane %v1466_v9, 2 }
  0xd1   : > { %3646 = vmatprep.mubr.msk.bf16.mxu1 %vm3976_vm0, %v3975_v1 }
  0xd2   : > { %3529 = vmatmul.mubr.msk.bf16.gmra.mxu0 %vm606_vm1, %v568_v34  ;;  %v1472_v31 = vor.u32 %v1471_v22, %v1468_v21  ;;  %v3944_v22 = vld [vmem:[%s4039_s29 + $0x30] sm:$0xff]  }
  0xd3   : > { %3532 = vmatprep.mubr.msk.bf16.mxu0 %vm3976_vm0, %v3975_v1 }
  0xd8   : > { %v1046_v40 = vpop.f32.mrf.mxu1  ;;  %3647 = vmatmul.mubr.msk.bf16.gmra.mxu1 %vm606_vm1, %v3934_v27  ;;  %v2113_v27 = vsel %vm2110_vm3, %v2111_v15, %v2112_v16 }
  0xd9   : > { %3650 = vmatprep.mubr.msk.bf16.mxu1 %vm3976_vm0, %v3975_v1 }
  0xda   : > { %v3552_v41 = vpop.f32.mrf.mxu1  ;;  %v722_v46 = vpop.f32.mrf.mxu0  ;;  %3533 = vmatmul.mubr.msk.bf16.gmra.mxu0 %vm606_vm1, %v576_v42 }
  0xdb   : > { %v4265_v47 = vadd.f32 %v1046_v40, %v722_v46  ;;  %3536 = vmatprep.mubr.msk.bf16.mxu0 %vm3976_vm0, %v3975_v1  ;;  %v1473_v40 = vsel %vm1456_vm4, %v1464_v28, %v1472_v31  ;;  %v1477_v41 = vrot.slane %v1475_v32, 2  ;;  %v1505_v32 = vshll.u32 %v3944_v22, 16 }
  0xdc   : > { %v1049_v45 = vpop.f32.mrf.mxu1  ;;  %v3438_v53 = vpop.f32.mrf.mxu0 }
  0xdd   : > { %v1487_v53 = vshll.u32 %v3942_v43, 16 }
  0xde   : > { %v3553_v48 = vpop.f32.mrf.mxu1  ;;  %v725_v55 = vpop.f32.mrf.mxu0 }
  0xdf   : > { %v4274_v57 = vadd.f32 %v1049_v45, %v725_v55  ;;  %v2115_v48 = vsel %vm2110_vm3, %v2112_v16, %v2114_v37 }
  0xe0   : > { %v1054_v54 = vpop.f32.mrf.mxu1  ;;  %3651 = vmatmul.mubr.msk.bf16.gmra.mxu1 %vm606_vm1, %v3935_v33  ;;  %v3439_v62 = vpop.f32.mrf.mxu0  ;;  %v1478_v33 = vshll.u32 %v3941_v23, 16 }
  0xe1   : > { %3654 = vmatprep.mubr.msk.bf16.mxu1 %vm3976_vm0, %v3975_v1  ;;  %v1486_v62 = vrot.slane %v1484_v52, 2 }
  0xe2   : > { %v3556_v58 = vpop.f32.mrf.mxu1  ;;  %v730_v3 = vpop.f32.mrf.mxu0  ;;  %3537 = vmatmul.mubr.msk.bf16.gmra.mxu0 %vm606_vm1, %v584_v59  ;;  %v1480_v42 = vrot.slane %v1478_v33, 3 }
  0xe3   : > { %v4283_v7 = vadd.f32 %v1054_v54, %v730_v3  ;;  %3540 = vmatprep.mubr.msk.bf16.mxu0 %vm3976_vm0, %v3975_v1  ;;  %v2116_v58 = vrot.slane %v3942_v43, 3  ;;  %v3945_v43 = vld [vmem:[%s4039_s29 + $0x38] sm:$0xff]  }
  0xe4   : > { %v1057_v63 = vpop.f32.mrf.mxu1  ;;  %v3442_v11 = vpop.f32.mrf.mxu0  ;;  %v1481_v51 = vor.u32 %v1480_v42, %v1477_v41  ;;  %v1507_v42 = vrot.slane %v1505_v32, 3 }
  0xe5   : > { %v2117_v5 = vsel %vm2110_vm3, %v2114_v37, %v2116_v58 }
  0xe6   : > { %v3557_v8 = vpop.f32.mrf.mxu1  ;;  %v733_v14 = vpop.f32.mrf.mxu0  ;;  %v1482_v61 = vsel %vm1456_vm4, %v1472_v31, %v1481_v51  ;;  %v1502_v31 = vshrl.u32 %v3944_v22, 16 }
  0xe7   : > { %v4293_v19 = vadd.f32 %v1057_v63, %v733_v14  ;;  %v1489_v63 = vrot.slane %v1487_v53, 3  ;;  %v1511_v53 = vshrl.u32 %v3945_v43, 16 }
  0xe8   : > { %v1062_v12 = vpop.f32.mrf.mxu1  ;;  %3655 = vmatmul.mubr.msk.bf16.gmra.mxu1 %vm606_vm1, %v3937_v0  ;;  %v3443_v24 = vpop.f32.mrf.mxu0  ;;  %v3943_v0 = vld [vmem:[%s4039_s29 + $0x28] sm:$0xff]   ;;  %v1504_v41 = vrot.slane %v1502_v31, 2 }
  0xe9   : > { %3778 = vmatprep.mubr.msk.bf16.mxu1 %vm3976_vm0, %v3975_v1  ;;  %v1490_v9 = vor.u32 %v1489_v63, %v1486_v62  ;;  %v1493_v10 = vshrl.u32 %v3943_v0, 16  ;;  %v1496_v11 = vshll.u32 %v3943_v0, 16  ;;  %v2118_v15 = vrot.slane %v3943_v0, 3 }
  0xea   : > { %v3560_v20 = vpop.f32.mrf.mxu1  ;;  %v738_v26 = vpop.f32.mrf.mxu0  ;;  %3541 = vmatmul.mubr.msk.bf16.gmra.mxu0 %vm606_vm1, %v587_v13  ;;  %v1508_v52 = vor.u32 %v1507_v42, %v1504_v41  ;;  %v1513_v0 = vrot.slane %v1511_v53, 2 }
  0xeb   : > { %v4298_v29 = vadd.f32 %v1062_v12, %v738_v26  ;;  %3664 = vmatprep.mubr.msk.bf16.mxu0 %vm3976_vm0, %v3975_v1  ;;  %v1491_v18 = vsel %vm1456_vm4, %v1481_v51, %v1490_v9  ;;  %v1495_v20 = vrot.slane %v1493_v10, 2  ;;  %v1498_v21 = vrot.slane %v1496_v11, 3 }
  0xec   : > { %v1065_v25 = vpop.f32.mrf.mxu1  ;;  %v3446_v34 = vpop.f32.mrf.mxu0  ;;  %v2119_v26 = vsel %vm2110_vm3, %v2116_v58, %v2118_v15 }
  0xee   : > { %v3561_v30 = vpop.f32.mrf.mxu1  ;;  %v741_v36 = vpop.f32.mrf.mxu0 }
  0xef   : > { %v4305_v38 = vadd.f32 %v1065_v25, %v741_v36  ;;  %v1499_v30 = vor.u32 %v1498_v21, %v1495_v20  ;;  %v2120_v36 = vrot.slane %v3944_v22, 3 }
  0xf0   : > { %v1070_v35 = vpop.f32.mrf.mxu1  ;;  %3779 = vmatmul.mubr.msk.bf16.vlgmr.msra.gmra.mxu1 %vm606_vm1, %v2113_v27  ;;  %v3447_v44 = vpop.f32.mrf.mxu0 }
  0xf1   : > { %3782 = vmatprep.mubr.msk.bf16.mxu1 %vm3976_vm0, %v3975_v1  ;;  %v1509_v63 = vsel %vm1456_vm4, %v1499_v30, %v1508_v52 }
  0xf2   : > { %v3564_v39 = vpop.f32.mrf.mxu1  ;;  %v746_v46 = vpop.f32.mrf.mxu0  ;;  %3665 = vmatmul.mubr.msk.bf16.vlgmr.msra.gmra.mxu0 %vm606_vm1, %v1473_v40  ;;  %v1500_v40 = vsel %vm1456_vm4, %v1490_v9, %v1499_v30 }
  0xf3   : > { %v4311_v49 = vadd.f32 %v1070_v35, %v746_v46  ;;  %3668 = vmatprep.mubr.msk.bf16.mxu0 %vm3976_vm0, %v3975_v1 }
  0xf4   : > { %v1073_v45 = vpop.f32.mrf.mxu1  ;;  %v3450_v54 = vpop.f32.mrf.mxu0 }
  0xf5   : > { %v1514_v54 = vshll.u32 %v3945_v43, 16 }
  0xf6   : > { %v3565_v50 = vpop.f32.mrf.mxu1  ;;  %v749_v56 = vpop.f32.mrf.mxu0 }
  0xf7   : > { %v4318_v59 = vadd.f32 %v1073_v45, %v749_v56 }
  0xf8   : > { %v1078_v55 = vpop.f32.mrf.mxu1  ;;  %3783 = vmatmul.mubr.msk.bf16.gmra.mxu1 %vm606_vm1, %v2115_v48  ;;  %v3451_v2 = vpop.f32.mrf.mxu0  ;;  %v2121_v48 = vsel %vm2110_vm3, %v2118_v15, %v2120_v36 }
  0xf9   : > { %3786 = vmatprep.mubr.msk.bf16.mxu1 %vm3976_vm0, %v3975_v1  ;;  %v1516_v2 = vrot.slane %v1514_v54, 3 }
  0xfa   : > { %v3568_v60 = vpop.f32.mrf.mxu1  ;;  %v754_v4 = vpop.f32.mrf.mxu0  ;;  %3669 = vmatmul.mubr.msk.bf16.gmra.mxu0 %vm606_vm1, %v1482_v61 }
  0xfb   : > { %v4324_v6 = vadd.f32 %v1078_v55, %v754_v4  ;;  %3672 = vmatprep.mubr.msk.bf16.mxu0 %vm3976_vm0, %v3975_v1  ;;  %v2122_v60 = vrot.slane %v3945_v43, 3 }
  0xfc   : > { %v1081_v3 = vpop.f32.mrf.mxu1  ;;  %v3454_v12 = vpop.f32.mrf.mxu0 }
  0xfd   : > { %v2123_v9 = vsel %vm2110_vm3, %v2120_v36, %v2122_v60  ;;  %v1517_v12 = vor.u32 %v1516_v2, %v1513_v0 }
  0xfe   : > { %v3569_v8 = vpop.f32.mrf.mxu1  ;;  %v757_v14 = vpop.f32.mrf.mxu0 }
  0xff   : > { %v4331_v16 = vadd.f32 %v1081_v3, %v757_v14  ;;  %v3946_v3 = vld [vmem:[%s4039_s29 + $0x40] sm:$0xff]  }
 0x100   : > { %v1086_v13 = vpop.f32.mrf.mxu1  ;;  %3787 = vmatmul.mubr.msk.bf16.gmra.mxu1 %vm606_vm1, %v2117_v5  ;;  %v3455_v23 = vpop.f32.mrf.mxu0  ;;  %v1523_v14 = vshll.u32 %v3946_v3, 16  ;;  %v2124_v20 = vrot.slane %v3946_v3, 3 }
 0x101   : > { %3790 = vmatprep.mubr.msk.bf16.mxu1 %vm3976_vm0, %v3975_v1  ;;  %v1518_v23 = vsel %vm1456_vm4, %v1508_v52, %v1517_v12  ;;  %v3948_v52 = vld [vmem:[%s4039_s29 + $0x50] sm:$0xff]  }
 0x102   : > { %v3572_v17 = vpop.f32.mrf.mxu1  ;;  %v762_v25 = vpop.f32.mrf.mxu0  ;;  %3673 = vmatmul.mubr.msk.bf16.gmra.mxu0 %vm606_vm1, %v1491_v18  ;;  %v2125_v32 = vsel %vm2110_vm3, %v2122_v60, %v2124_v20  ;;  %v1541_v0 = vshll.u32 %v3948_v52, 16 }
 0x103   : > { %v4337_v27 = vadd.f32 %v1086_v13, %v762_v25  ;;  %3676 = vmatprep.mubr.msk.bf16.mxu0 %vm3976_vm0, %v3975_v1  ;;  %v1520_v13 = vshrl.u32 %v3946_v3, 16  ;;  %v1525_v25 = vrot.slane %v1523_v14, 3  ;;  %v3949_v14 = vld [vmem:[%s4039_s29 + $0x58] sm:$0xff]  }
 0x104   : > { %v1089_v24 = vpop.f32.mrf.mxu1  ;;  %v3458_v33 = vpop.f32.mrf.mxu0 }
 0x106   : > { %v3573_v28 = vpop.f32.mrf.mxu1  ;;  %v765_v35 = vpop.f32.mrf.mxu0 }
 0x107   : > { %v4344_v37 = vadd.f32 %v1089_v24, %v765_v35  ;;  %v1522_v24 = vrot.slane %v1520_v13, 2  ;;  %v1543_v13 = vrot.slane %v1541_v0, 3 }
 0x108   : > { %v1094_v34 = vpop.f32.mrf.mxu1  ;;  %3791 = vmatmul.mubr.msk.bf16.gmra.mxu1 %vm606_vm1, %v2119_v26  ;;  %v3459_v44 = vpop.f32.mrf.mxu0  ;;  %v3947_v26 = vld [vmem:[%s4039_s29 + $0x48] sm:$0xff]  }
 0x109   : > { %3794 = vmatprep.mubr.msk.bf16.mxu1 %vm3976_vm0, %v3975_v1  ;;  %v1526_v35 = vor.u32 %v1525_v25, %v1522_v24  ;;  %v1529_v36 = vshrl.u32 %v3947_v26, 16  ;;  %v2126_v43 = vrot.slane %v3947_v26, 3  ;;  %v1547_v25 = vshrl.u32 %v3949_v14, 16 }
 0x10a   : > { %v3576_v39 = vpop.f32.mrf.mxu1  ;;  %v770_v46 = vpop.f32.mrf.mxu0  ;;  %3677 = vmatmul.mubr.msk.bf16.gmra.mxu0 %vm606_vm1, %v1500_v40 }
 0x10b   : > { %v4350_v50 = vadd.f32 %v1094_v34, %v770_v46  ;;  %3680 = vmatprep.mubr.msk.bf16.mxu0 %vm3976_vm0, %v3975_v1  ;;  %v1532_v39 = vshll.u32 %v3947_v26, 16  ;;  %v1527_v46 = vsel %vm1456_vm4, %v1517_v12, %v1526_v35  ;;  %v1550_v26 = vshll.u32 %v3949_v14, 16 }
 0x10c   : > { %v1097_v45 = vpop.f32.mrf.mxu1  ;;  %v3462_v55 = vpop.f32.mrf.mxu0 }
 0x10e   : > { %v3577_v51 = vpop.f32.mrf.mxu1  ;;  %v773_v58 = vpop.f32.mrf.mxu0 }
 0x10f   : > { %v4357_v61 = vadd.f32 %v1097_v45, %v773_v58  ;;  %v1534_v51 = vrot.slane %v1532_v39, 3  ;;  %v1549_v39 = vrot.slane %v1547_v25, 2 }
 0x110   : > { %v1102_v56 = vpop.f32.mrf.mxu1  ;;  %3795 = vmatmul.mubr.msk.bf16.gmra.mxu1 %vm606_vm1, %v2121_v48  ;;  %v3463_v4 = vpop.f32.mrf.mxu0  ;;  %v1531_v48 = vrot.slane %v1529_v36, 2 }
 0x111   : > { %3798 = vmatprep.mubr.msk.bf16.mxu1 %vm3976_vm0, %v3975_v1 }
 0x112   : > { %v3580_v62 = vpop.f32.mrf.mxu1  ;;  %v778_v8 = vpop.f32.mrf.mxu0  ;;  %3681 = vmatmul.mubr.msk.bf16.gmra.mxu0 %vm606_vm1, %v1509_v63  ;;  %v1538_v63 = vshrl.u32 %v3948_v52, 16 }
 0x113   : > { %v4363_v10 = vadd.f32 %v1102_v56, %v778_v8  ;;  %3684 = vmatprep.mubr.msk.bf16.mxu0 %vm3976_vm0, %v3975_v1  ;;  %v2127_v56 = vsel %vm2110_vm3, %v2124_v20, %v2126_v43  ;;  %v1535_v62 = vor.u32 %v1534_v51, %v1531_v48 }
 0x114   : > { %v1105_v5 = vpop.f32.mrf.mxu1  ;;  %v3466_v15 = vpop.f32.mrf.mxu0  ;;  %v1540_v12 = vrot.slane %v1538_v63, 2 }
 0x116   : > { %v3581_v11 = vpop.f32.mrf.mxu1  ;;  %v781_v18 = vpop.f32.mrf.mxu0  ;;  %v1544_v24 = vor.u32 %v1543_v13, %v1540_v12 }
 0x117   : > { %v4370_v21 = vadd.f32 %v1105_v5, %v781_v18  ;;  %v2128_v5 = vrot.slane %v3948_v52, 3  ;;  %v1536_v11 = vsel %vm1456_vm4, %v1526_v35, %v1535_v62 }
 0x118   : > { %v1110_v17 = vpop.f32.mrf.mxu1  ;;  %3799 = vmatmul.mubr.msk.bf16.gmra.mxu1 %vm606_vm1, %v2123_v9  ;;  %v3467_v28 = vpop.f32.mrf.mxu0  ;;  %v1545_v36 = vsel %vm1456_vm4, %v1535_v62, %v1544_v24 }
 0x119   : > { %3802 = vmatprep.mubr.msk.bf16.mxu1 %vm3976_vm0, %v3975_v1  ;;  %v2129_v20 = vsel %vm2110_vm3, %v2126_v43, %v2128_v5 }
 0x11a   : > { %v3584_v22 = vpop.f32.mrf.mxu1  ;;  %v786_v31 = vpop.f32.mrf.mxu0  ;;  %3685 = vmatmul.mubr.msk.bf16.gmra.mxu0 %vm606_vm1, %v1518_v23 }
 0x11b   : > { %v4376_v33 = vadd.f32 %v1110_v17, %v786_v31  ;;  %3688 = vmatprep.mubr.msk.bf16.mxu0 %vm3976_vm0, %v3975_v1 }
 0x11c   : > { %v1113_v30 = vpop.f32.mrf.mxu1  ;;  %v3470_v40 = vpop.f32.mrf.mxu0 }
 0x11d   : > { %v1552_v40 = vrot.slane %v1550_v26, 3 }
 0x11e   : > { %v3585_v34 = vpop.f32.mrf.mxu1  ;;  %v789_v42 = vpop.f32.mrf.mxu0 }
 0x11f   : > { %v4383_v44 = vadd.f32 %v1113_v30, %v789_v42  ;;  %v1553_v52 = vor.u32 %v1552_v40, %v1549_v39 }
 0x120   : > { %v1118_v41 = vpop.f32.mrf.mxu1  ;;  %3803 = vmatmul.mubr.msk.bf16.gmra.mxu1 %vm606_vm1, %v2125_v32  ;;  %v3471_v53 = vpop.f32.mrf.mxu0  ;;  %v2130_v32 = vrot.slane %v3949_v14, 3 }
 0x121   : > { %3806 = vmatprep.mubr.msk.bf16.mxu1 %vm3976_vm0, %v3975_v1 }
 0x122   : > { %v3588_v45 = vpop.f32.mrf.mxu1  ;;  %v794_v55 = vpop.f32.mrf.mxu0  ;;  %3689 = vmatmul.mubr.msk.bf16.gmra.mxu0 %vm606_vm1, %v1527_v46  ;;  %v2131_v46 = vsel %vm2110_vm3, %v2128_v5, %v2130_v32  ;;  %v3951_v5 = vld [vmem:[%s4039_s29 + $0x68] sm:$0xff]  }
 0x123   : > { %v4389_v58 = vadd.f32 %v1118_v41, %v794_v55  ;;  %3692 = vmatprep.mubr.msk.bf16.mxu0 %vm3976_vm0, %v3975_v1  ;;  %v3950_v41 = vld [vmem:[%s4039_s29 + $0x60] sm:$0xff]   ;;  %v2134_v26 = vrot.slane %v3951_v5, 3 }
 0x124   : > { %v1121_v54 = vpop.f32.mrf.mxu1  ;;  %v3474_v2 = vpop.f32.mrf.mxu0  ;;  %v1556_v53 = vshrl.u32 %v3950_v41, 16  ;;  %v2132_v62 = vrot.slane %v3950_v41, 3 }
 0x125   : > { %v1554_v2 = vsel %vm1456_vm4, %v1544_v24, %v1553_v52 }
 0x126   : > { %v3589_v60 = vpop.f32.mrf.mxu1  ;;  %v797_v4 = vpop.f32.mrf.mxu0  ;;  %v2133_v13 = vsel %vm2110_vm3, %v2130_v32, %v2132_v62 }
 0x127   : > { %v4396_v8 = vadd.f32 %v1121_v54, %v797_v4  ;;  %v1559_v54 = vshll.u32 %v3950_v41, 16 }
 0x128   : > { %v1126_v3 = vpop.f32.mrf.mxu1  ;;  %3807 = vmatmul.mubr.msk.bf16.gmra.mxu1 %vm606_vm1, %v2127_v56  ;;  %v3475_v15 = vpop.f32.mrf.mxu0 }
 0x129   : > { %3810 = vmatprep.mubr.msk.bf16.mxu1 %vm3976_vm0, %v3975_v1  ;;  %v1561_v4 = vrot.slane %v1559_v54, 3 }
 0x12a   : > { %v3592_v9 = vpop.f32.mrf.mxu1  ;;  %v802_v18 = vpop.f32.mrf.mxu0  ;;  %3693 = vmatmul.mubr.msk.bf16.gmra.mxu0 %vm606_vm1, %v1536_v11 }
 0x12b   : > { %v4402_v22 = vadd.f32 %v1126_v3, %v802_v18  ;;  %3696 = vmatprep.mubr.msk.bf16.mxu0 %vm3976_vm0, %v3975_v1  ;;  %v1558_v3 = vrot.slane %v1556_v53, 2  ;;  %v1565_v18 = vshrl.u32 %v3951_v5, 16 }
 0x12c   : > { %v1129_v17 = vpop.f32.mrf.mxu1  ;;  %v3478_v28 = vpop.f32.mrf.mxu0 }
 0x12d   : > { %v1567_v32 = vrot.slane %v1565_v18, 2 }
 0x12e   : > { %v3593_v23 = vpop.f32.mrf.mxu1  ;;  %v805_v31 = vpop.f32.mrf.mxu0 }
 0x12f   : > { %v4409_v34 = vadd.f32 %v1129_v17, %v805_v31  ;;  %v1562_v17 = vor.u32 %v1561_v4, %v1558_v3  ;;  %v3953_v4 = vld [vmem:[%s4039_s29 + $0x78] sm:$0xff]  }
 0x130   : > { %v1134_v30 = vpop.f32.mrf.mxu1  ;;  %3811 = vmatmul.mubr.msk.bf16.gmra.mxu1 %vm606_vm1, %v2129_v20  ;;  %v3479_v42 = vpop.f32.mrf.mxu0  ;;  %v1568_v20 = vshll.u32 %v3951_v5, 16 }
 0x131   : > { %3814 = vmatprep.mubr.msk.bf16.mxu1 %vm3976_vm0, %v3975_v1  ;;  %v1563_v31 = vsel %vm1456_vm4, %v1553_v52, %v1562_v17  ;;  %v2135_v42 = vsel %vm2110_vm3, %v2132_v62, %v2134_v26 }
 0x132   : > { %v3596_v35 = vpop.f32.mrf.mxu1  ;;  %v810_v45 = vpop.f32.mrf.mxu0  ;;  %3697 = vmatmul.mubr.msk.bf16.gmra.mxu0 %vm606_vm1, %v1545_v36  ;;  %v3952_v36 = vld [vmem:[%s4039_s29 + $0x70] sm:$0xff]  }
 0x133   : > { %v4415_v48 = vadd.f32 %v1134_v30, %v810_v45  ;;  %3700 = vmatprep.mubr.msk.bf16.mxu0 %vm3976_vm0, %v3975_v1  ;;  %v1570_v35 = vrot.slane %v1568_v20, 3  ;;  %v1577_v52 = vshll.u32 %v3952_v36, 16  ;;  %v1583_v20 = vshrl.u32 %v3953_v4, 16 }
 0x134   : > { %v1137_v43 = vpop.f32.mrf.mxu1  ;;  %v3482_v55 = vpop.f32.mrf.mxu0 }
 0x135   : > { %v1579_v3 = vrot.slane %v1577_v52, 3 }
 0x136   : > { %v3597_v51 = vpop.f32.mrf.mxu1  ;;  %v813_v60 = vpop.f32.mrf.mxu0 }
 0x137   : > { %v4422_v63 = vadd.f32 %v1137_v43, %v813_v60  ;;  %v1574_v51 = vshrl.u32 %v3952_v36, 16 }
 0x138   : > { %v1142_v56 = vpop.f32.mrf.mxu1  ;;  %3815 = vmatmul.mubr.msk.bf16.gmra.mxu1 %vm606_vm1, %v2131_v46  ;;  %v3483_v9 = vpop.f32.mrf.mxu0  ;;  %v1571_v46 = vor.u32 %v1570_v35, %v1567_v32  ;;  %v1585_v35 = vrot.slane %v1583_v20, 2 }
 0x139   : > { %3818 = vmatprep.mubr.msk.bf16.mxu1 %vm3976_vm0, %v3975_v1 }
 0x13a   : > { %v3600_v0 = vpop.f32.mrf.mxu1  ;;  %v818_v12 = vpop.f32.mrf.mxu0  ;;  %3701 = vmatmul.mubr.msk.bf16.gmra.mxu0 %vm606_vm1, %v1554_v2  ;;  %v1576_v2 = vrot.slane %v1574_v51, 2 }
 0x13b   : > { %v4428_v14 = vadd.f32 %v1142_v56, %v818_v12  ;;  %3704 = vmatprep.mubr.msk.bf16.mxu0 %vm3976_vm0, %v3975_v1  ;;  %v2136_v56 = vrot.slane %v3952_v36, 3  ;;  %v1572_v0 = vsel %vm1456_vm4, %v1562_v17, %v1571_v46  ;;  %v1586_v17 = vshll.u32 %v3953_v4, 16 }
 0x13c   : > { %v1145_v11 = vpop.f32.mrf.mxu1  ;;  %v3486_v23 = vpop.f32.mrf.mxu0  ;;  %v1580_v18 = vor.u32 %v1579_v3, %v1576_v2 }
 0x13d   : > { %v2137_v12 = vsel %vm2110_vm3, %v2134_v26, %v2136_v56  ;;  %v1588_v36 = vrot.slane %v1586_v17, 3 }
 0x13e   : > { %v3601_v15 = vpop.f32.mrf.mxu1  ;;  %v821_v25 = vpop.f32.mrf.mxu0  ;;  %v1581_v32 = vsel %vm1456_vm4, %v1571_v46, %v1580_v18 }
 0x13f   : > { %v4435_v28 = vadd.f32 %v1145_v11, %v821_v25 }
 0x140   : > { %v1150_v24 = vpop.f32.mrf.mxu1  ;;  %3819 = vmatmul.mubr.msk.bf16.gmra.mxu1 %vm606_vm1, %v2133_v13  ;;  %v3487_v39 = vpop.f32.mrf.mxu0 }
 0x141   : > { %3822 = vmatprep.mubr.msk.bf16.mxu1 %vm3976_vm0, %v3975_v1  ;;  %v3954_v39 = vld [vmem:[%s4039_s29 + $0x80] sm:$0xff]  }
 0x142   : > { %v3604_v30 = vpop.f32.mrf.mxu1  ;;  %v826_v41 = vpop.f32.mrf.mxu0  ;;  %3705 = vmatmul.mubr.msk.bf16.gmra.mxu0 %vm606_vm1, %v1563_v31  ;;  %v1595_v46 = vshll.u32 %v3954_v39, 16  ;;  %v2140_v2 = vrot.slane %v3954_v39, 3 }
 0x143   : > { %v4441_v43 = vadd.f32 %v1150_v24, %v826_v41  ;;  %3708 = vmatprep.mubr.msk.bf16.mxu0 %vm3976_vm0, %v3975_v1  ;;  %v2138_v30 = vrot.slane %v3953_v4, 3 }
 0x144   : > { %v1153_v40 = vpop.f32.mrf.mxu1  ;;  %v3490_v53 = vpop.f32.mrf.mxu0 }
 0x145   : > { %v1589_v53 = vor.u32 %v1588_v36, %v1585_v35  ;;  %v2141_v17 = vsel %vm2110_vm3, %v2138_v30, %v2140_v2 }
 0x146   : > { %v3605_v45 = vpop.f32.mrf.mxu1  ;;  %v829_v55 = vpop.f32.mrf.mxu0 }
 0x147   : > { %v4448_v60 = vadd.f32 %v1153_v40, %v829_v55  ;;  %v2139_v45 = vsel %vm2110_vm3, %v2136_v56, %v2138_v30  ;;  %v1590_v4 = vsel %vm1456_vm4, %v1580_v18, %v1589_v53 }
 0x148   : > { %v1158_v54 = vpop.f32.mrf.mxu1  ;;  %3823 = vmatmul.mubr.msk.bf16.gmra.mxu1 %vm606_vm1, %v2135_v42  ;;  %v3491_v5 = vpop.f32.mrf.mxu0 }
 0x149   : > { %3826 = vmatprep.mubr.msk.bf16.mxu1 %vm3976_vm0, %v3975_v1 }
 0x14a   : > { %v3608_v62 = vpop.f32.mrf.mxu1  ;;  %v834_v11 = vpop.f32.mrf.mxu0  ;;  %3709 = vmatmul.mubr.msk.bf16.gmra.mxu0 %vm606_vm1, %v1572_v0 }
 0x14b   : > { %v4454_v13 = vadd.f32 %v1158_v54, %v834_v11  ;;  %3712 = vmatprep.mubr.msk.bf16.mxu0 %vm3976_vm0, %v3975_v1  ;;  %v1592_v54 = vshrl.u32 %v3954_v39, 16  ;;  %v3955_v11 = vld [vmem:[%s4039_s29 + $0x88] sm:$0xff]  }
 0x14c   : > { %v1161_v9 = vpop.f32.mrf.mxu1  ;;  %v3494_v23 = vpop.f32.mrf.mxu0  ;;  %v1604_v18 = vshll.u32 %v3955_v11, 16  ;;  %v2142_v39 = vrot.slane %v3955_v11, 3 }
 0x14d   : > { %v1594_v5 = vrot.slane %v1592_v54, 2 }
 0x14e   : > { %v3609_v15 = vpop.f32.mrf.mxu1  ;;  %v837_v25 = vpop.f32.mrf.mxu0 }
 0x14f   : > { %v4461_v26 = vadd.f32 %v1161_v9, %v837_v25  ;;  %v1597_v9 = vrot.slane %v1595_v46, 3 }
 0x150   : > { %v1166_v24 = vpop.f32.mrf.mxu1  ;;  %3827 = vmatmul.mubr.msk.bf16.gmra.mxu1 %vm606_vm1, %v2137_v12  ;;  %v3495_v40 = vpop.f32.mrf.mxu0 }
 0x151   : > { %3830 = vmatprep.mubr.msk.bf16.mxu1 %vm3976_vm0, %v3975_v1  ;;  %v1598_v25 = vor.u32 %v1597_v9, %v1594_v5 }
 0x152   : > { %v3612_v31 = vpop.f32.mrf.mxu1  ;;  %v842_v42 = vpop.f32.mrf.mxu0  ;;  %3713 = vmatmul.mubr.msk.bf16.gmra.mxu0 %vm606_vm1, %v1581_v32 }
 0x153   : > { %v4467_v51 = vadd.f32 %v1166_v24, %v842_v42  ;;  %3716 = vmatprep.mubr.msk.bf16.mxu0 %vm3976_vm0, %v3975_v1  ;;  %v1601_v31 = vshrl.u32 %v3955_v11, 16 }
 0x154   : > { %v1169_v41 = vpop.f32.mrf.mxu1  ;;  %v3498_v55 = vpop.f32.mrf.mxu0 }
 0x155   : > { %v1603_v42 = vrot.slane %v1601_v31, 2 }
 0x156   : > { %v3613_v52 = vpop.f32.mrf.mxu1  ;;  %v845_v0 = vpop.f32.mrf.mxu0 }
 0x157   : > { %v4474_v56 = vadd.f32 %v1169_v41, %v845_v0  ;;  %v1599_v41 = vsel %vm1456_vm4, %v1589_v53, %v1598_v25  ;;  %v3956_v52 = vld [vmem:[%s4039_s29 + $0x90] sm:$0xff]  }
 0x158   : > { %v1174_v62 = vpop.f32.mrf.mxu1  ;;  %3831 = vmatmul.mubr.msk.bf16.gmra.mxu1 %vm606_vm1, %v2139_v45  ;;  %v3499_v12 = vpop.f32.mrf.mxu0  ;;  %v1606_v45 = vrot.slane %v1604_v18, 3  ;;  %v1610_v5 = vshrl.u32 %v3956_v52, 16  ;;  %v1613_v53 = vshll.u32 %v3956_v52, 16  ;;  %v3957_v18 = vld [vmem:[%s4039_s29 + $0x98] sm:$0xff]  }
 0x159   : > { %3834 = vmatprep.mubr.msk.bf16.mxu1 %vm3976_vm0, %v3975_v1 }
 0x15a   : > { %v3616_v3 = vpop.f32.mrf.mxu1  ;;  %v850_v20 = vpop.f32.mrf.mxu0  ;;  %3717 = vmatmul.mubr.msk.bf16.gmra.mxu0 %vm606_vm1, %v1590_v4  ;;  %v1607_v4 = vor.u32 %v1606_v45, %v1603_v42  ;;  %v1615_v31 = vrot.slane %v1613_v53, 3 }
 0x15b   : > { %v4480_v23 = vadd.f32 %v1174_v62, %v850_v20  ;;  %3720 = vmatprep.mubr.msk.bf16.mxu0 %vm3976_vm0, %v3975_v1  ;;  %v2143_v62 = vsel %vm2110_vm3, %v2140_v2, %v2142_v39 }
 0x15c   : > { %v1177_v15 = vpop.f32.mrf.mxu1  ;;  %v3502_v32 = vpop.f32.mrf.mxu0 }
 0x15e   : > { %v3617_v24 = vpop.f32.mrf.mxu1  ;;  %v853_v36 = vpop.f32.mrf.mxu0 }
 0x15f   : > { %v4487_v30 = vadd.f32 %v1177_v15, %v853_v36  ;;  %v2144_v15 = vrot.slane %v3956_v52, 3  ;;  %v1612_v24 = vrot.slane %v1610_v5, 2  ;;  %v1619_v52 = vshrl.u32 %v3957_v18, 16 }
 0x160   : > { %v1182_v35 = vpop.f32.mrf.mxu1  ;;  %3835 = vmatmul.mubr.msk.bf16.gmra.mxu1 %vm606_vm1, %v2141_v17  ;;  %v3503_v54 = vpop.f32.mrf.mxu0  ;;  %v1608_v17 = vsel %vm1456_vm4, %v1598_v25, %v1607_v4  ;;  %v1622_v25 = vshll.u32 %v3957_v18, 16 }
 0x161   : > { %3838 = vmatprep.mubr.msk.bf16.mxu1 %vm3976_vm0, %v3975_v1  ;;  %v1616_v45 = vor.u32 %v1615_v31, %v1612_v24  ;;  %v1621_v53 = vrot.slane %v1619_v52, 2 }
 0x162   : > { %v3620_v40 = vpop.f32.mrf.mxu1  ;;  %v858_v55 = vpop.f32.mrf.mxu0  ;;  %3721 = vmatmul.mubr.msk.bf16.gmra.mxu0 %vm606_vm1, %v1599_v41 }
 0x163   : > { %v4493_v0 = vadd.f32 %v1182_v35, %v858_v55  ;;  %3724 = vmatprep.mubr.msk.bf16.mxu0 %vm3976_vm0, %v3975_v1  ;;  %v2145_v40 = vsel %vm2110_vm3, %v2142_v39, %v2144_v15  ;;  %v1617_v5 = vsel %vm1456_vm4, %v1607_v4, %v1616_v45 }
 0x164   : > { %v1185_v46 = vpop.f32.mrf.mxu1  ;;  %v3506_v9 = vpop.f32.mrf.mxu0 }
 0x165   : > { %v1624_v9 = vrot.slane %v1622_v25, 3 }
 0x166   : > { %v3621_v3 = vpop.f32.mrf.mxu1  ;;  %v861_v12 = vpop.f32.mrf.mxu0 }
 0x167   : > { %v4500_v2 = vadd.f32 %v1185_v46, %v861_v12 }
 0x168   : > { %v1190_v11 = vpop.f32.mrf.mxu1  ;;  %3839 = vmatmul.mubr.msk.bf16.gmra.mxu1 %vm606_vm1, %v2143_v62  ;;  %v3507_v32 = vpop.f32.mrf.mxu0  ;;  %v2146_v62 = vrot.slane %v3957_v18, 3  ;;  %v1625_v18 = vor.u32 %v1624_v9, %v1621_v53 }
 0x169   : > { %3842 = vmatprep.mubr.msk.bf16.mxu1 %vm3976_vm0, %v3975_v1 }
 0x16a   : > { %v3624_v20 = vpop.f32.mrf.mxu1  ;;  %v866_v36 = vpop.f32.mrf.mxu0  ;;  %3725 = vmatmul.mubr.msk.bf16.gmra.mxu0 %vm606_vm1, %v1608_v17  ;;  %v2147_v24 = vsel %vm2110_vm3, %v2144_v15, %v2146_v62 }
 0x16b   : > { %v4506_v41 = vadd.f32 %v1190_v11, %v866_v36  ;;  %3728 = vmatprep.mubr.msk.bf16.mxu0 %vm3976_vm0, %v3975_v1  ;;  %v3958_v11 = vld [vmem:[%s4039_s29 + $0xa0] sm:$0xff]  }
 0x16c   : > { %v1193_v35 = vpop.f32.mrf.mxu1  ;;  %v3510_v54 = vpop.f32.mrf.mxu0  ;;  %v1631_v4 = vshll.u32 %v3958_v11, 16  ;;  %v2148_v52 = vrot.slane %v3958_v11, 3 }
 0x16d   : > { %v1626_v54 = vsel %vm1456_vm4, %v1616_v45, %v1625_v18 }
 0x16e   : > { %v3625_v42 = vpop.f32.mrf.mxu1  ;;  %v869_v55 = vpop.f32.mrf.mxu0 }
 0x16f   : > { %v4513_v39 = vadd.f32 %v1193_v35, %v869_v55  ;;  %v1628_v35 = vshrl.u32 %v3958_v11, 16  ;;  %v1633_v55 = vrot.slane %v1631_v4, 3 }
 0x170   : > { %v1198_v46 = vpop.f32.mrf.mxu1  ;;  %3843 = vmatmul.mubr.msk.bf16.gmra.mxu1 %vm606_vm1, %v2145_v40  ;;  %v3511_v12 = vpop.f32.mrf.mxu0 }
 0x171   : > { %3846 = vmatprep.mubr.msk.bf16.mxu1 %vm3976_vm0, %v3975_v1  ;;  %v2149_v12 = vsel %vm2110_vm3, %v2146_v62, %v2148_v52 }
 0x172   : > { %v3628_v3 = vpop.f32.mrf.mxu1  ;;  %v874_v17 = vpop.f32.mrf.mxu0  ;;  %3729 = vmatmul.mubr.msk.bf16.gmra.mxu0 %vm606_vm1, %v1617_v5 }
 0x173   : > { %v4519_v31 = vadd.f32 %v1198_v46, %v874_v17  ;;  %3732 = vmatprep.mubr.msk.bf16.mxu0 %vm3976_vm0, %v3975_v1  ;;  %v1630_v46 = vrot.slane %v1628_v35, 2  ;;  %v3959_v3 = vld [vmem:[%s4039_s29 + $0xa8] sm:$0xff]  }
 0x174   : > { %v1201_v20 = vpop.f32.mrf.mxu1  ;;  %v3514_v36 = vpop.f32.mrf.mxu0  ;;  %v1640_v45 = vshll.u32 %v3959_v3, 16 }
 0x175   : > { %v1634_v11 = vor.u32 %v1633_v55, %v1630_v46  ;;  %v2150_v36 = vrot.slane %v3959_v3, 3 }
 0x176   : > { %v3629_v32 = vpop.f32.mrf.mxu1  ;;  %v877_v42 = vpop.f32.mrf.mxu0 }
 0x177   : > { %v4526_v15 = vadd.f32 %v1201_v20, %v877_v42  ;;  %v1637_v20 = vshrl.u32 %v3959_v3, 16  ;;  %v1635_v42 = vsel %vm1456_vm4, %v1625_v18, %v1634_v11 }
 0x178   : > { %v1206_v40 = vpop.f32.mrf.mxu1  ;;  %3847 = vmatmul.mubr.msk.bf16.gmra.mxu1 %vm606_vm1, %v2147_v24  ;;  %v3515_v5 = vpop.f32.mrf.mxu0 }
 0x179   : > { %3850 = vmatprep.mubr.msk.bf16.mxu1 %vm3976_vm0, %v3975_v1  ;;  %v3960_v5 = vld [vmem:[%s4039_s29 + $0xb0] sm:$0xff]  }
 0x17a   : > { %v3632_v25 = vpop.f32.mrf.mxu1  ;;  %v882_v9 = vpop.f32.mrf.mxu0  ;;  %3733 = vmatmul.mubr.msk.bf16.gmra.mxu0 %vm606_vm1, %v1626_v54  ;;  %v1642_v54 = vrot.slane %v1640_v45, 3  ;;  %v1649_v18 = vshll.u32 %v3960_v5, 16 }
 0x17b   : > { %v4532_v17 = vadd.f32 %v1206_v40, %v882_v9  ;;  %3736 = vmatprep.mubr.msk.bf16.mxu0 %vm3976_vm0, %v3975_v1  ;;  %v1639_v25 = vrot.slane %v1637_v20, 2 }
 0x17c   : > { %v1209_v53 = vpop.f32.mrf.mxu1  ;;  %v3518_v32 = vpop.f32.mrf.mxu0 }
 0x17d   : > { %v1643_v3 = vor.u32 %v1642_v54, %v1639_v25 }
 0x17e   : > { %v3633_v24 = vpop.f32.mrf.mxu1  ;;  %v885_v4 = vpop.f32.mrf.mxu0 }
 0x17f   : > { %v4539_v62 = vadd.f32 %v1209_v53, %v885_v4  ;;  %v1646_v53 = vshrl.u32 %v3960_v5, 16 }
 0x180   : > { %v1214_v35 = vpop.f32.mrf.mxu1  ;;  %3851 = vmatmul.mubr.msk.bf16.gmra.mxu1 %vm606_vm1, %v2149_v12  ;;  %v3519_v46 = vpop.f32.mrf.mxu0  ;;  %v2151_v12 = vsel %vm2110_vm3, %v2148_v52, %v2150_v36 }
 0x181   : > { %3854 = vmatprep.mubr.msk.bf16.mxu1 %vm3976_vm0, %v3975_v1  ;;  %4860 = vst [vmem:[#allocation2_spill] sm:$0xff] %v4539_v62  ;;  %v1648_v46 = vrot.slane %v1646_v53, 2 }
 0x182   : > { %v3636_v40 = vpop.f32.mrf.mxu1  ;;  %v890_v9 = vpop.f32.mrf.mxu0  ;;  %3737 = vmatmul.mubr.msk.bf16.gmra.mxu0 %vm606_vm1, %v1635_v42  ;;  %v1644_v42 = vsel %vm1456_vm4, %v1634_v11, %v1643_v3 }
 0x183   : > { %v4545_v24 = vadd.f32 %v1214_v35, %v890_v9  ;;  %3740 = vmatprep.mubr.msk.bf16.mxu0 %vm3976_vm0, %v3975_v1  ;;  %v2152_v40 = vrot.slane %v3960_v5, 3  ;;  %v1651_v9 = vrot.slane %v1649_v18, 3 }
 0x184   : > { %v1217_v55 = vpop.f32.mrf.mxu1  ;;  %v3522_v20 = vpop.f32.mrf.mxu0 }
 0x185   : > { %4861 = vst [vmem:[#allocation3_spill] sm:$0xff] %v4545_v24  ;;  %v1652_v5 = vor.u32 %v1651_v9, %v1648_v46 }
 0x186   : > { %v3637_v32 = vpop.f32.mrf.mxu1  ;;  %v893_v4 = vpop.f32.mrf.mxu0 }
 0x187   : > { %v4552_v52 = vadd.f32 %v1217_v55, %v893_v4  ;;  %v3961_v32 = vld [vmem:[%s4039_s29 + $0xb8] sm:$0xff]  }
 0x188   : > { %v1222_v45 = vpop.f32.mrf.mxu1  ;;  %3855 = vmatmul.mubr.msk.bf16.gmra.mxu1 %vm606_vm1, %v2151_v12  ;;  %v3523_v25 = vpop.f32.mrf.mxu0  ;;  %v2153_v12 = vsel %vm2110_vm3, %v2150_v36, %v2152_v40  ;;  %v1655_v55 = vshrl.u32 %v3961_v32, 16  ;;  %v1658_v11 = vshll.u32 %v3961_v32, 16 }
 0x189   : > { %3858 = vmatprep.mubr.msk.bf16.mxu1 %vm3976_vm0, %v3975_v1  ;;  %4862 = vst [vmem:[#allocation4_spill] sm:$0xff] %v4552_v52  ;;  %v3962_v25 = vld [vmem:[%s4039_s29 + $0xc0] sm:$0xff]  }
 0x18a   : > { %v3640_v35 = vpop.f32.mrf.mxu1  ;;  %v898_v24 = vpop.f32.mrf.mxu0  ;;  %3741 = vmatmul.mubr.msk.bf16.gmra.mxu0 %vm606_vm1, %v1644_v42  ;;  %v1660_v42 = vrot.slane %v1658_v11, 3 }
 0x18b   : > { %v4558_v20 = vadd.f32 %v1222_v45, %v898_v24  ;;  %3744 = vmatprep.mubr.msk.bf16.mxu0 %vm3976_vm0, %v3975_v1  ;;  %v2154_v35 = vrot.slane %v3961_v32, 3  ;;  %v1657_v45 = vrot.slane %v1655_v55, 2 }
 0x18c   : > { %v1225_v54 = vpop.f32.mrf.mxu1  ;;  %v3526_v53 = vpop.f32.mrf.mxu0 }
 0x18d   : > { %4863 = vst [vmem:[#allocation5_spill] sm:$0xff] %v4558_v20  ;;  %v1661_v32 = vor.u32 %v1660_v42, %v1657_v45 }
 0x18e   : > { %v3641_v62 = vpop.f32.mrf.mxu1  ;;  %v901_v4 = vpop.f32.mrf.mxu0 }
 0x18f   : > { %v4565_v36 = vadd.f32 %v1225_v54, %v901_v4  ;;  %v1653_v62 = vsel %vm1456_vm4, %v1643_v3, %v1652_v5  ;;  %v1664_v54 = vshrl.u32 %v3962_v25, 16  ;;  %v1667_v3 = vshll.u32 %v3962_v25, 16 }
 0x190   : > { %v1230_v18 = vpop.f32.mrf.mxu1  ;;  %3859 = vmatmul.mubr.msk.bf16.gmra.mxu1 %vm606_vm1, %v2153_v12  ;;  %v3527_v46 = vpop.f32.mrf.mxu0  ;;  %v2155_v12 = vsel %vm2110_vm3, %v2152_v40, %v2154_v35 }
 0x191   : > { %3862 = vmatprep.mubr.msk.bf16.mxu1 %vm3976_vm0, %v3975_v1  ;;  %4864 = vst [vmem:[#allocation6_spill] sm:$0xff] %v4565_v36  ;;  %v3963_v46 = vld [vmem:[%s4039_s29 + $0xc8] sm:$0xff]  }
 0x192   : > { %v3644_v24 = vpop.f32.mrf.mxu1  ;;  %v906_v20 = vpop.f32.mrf.mxu0  ;;  %3745 = vmatmul.mubr.msk.bf16.gmra.mxu0 %vm606_vm1, %v1653_v62  ;;  %v1669_v62 = vrot.slane %v1667_v3, 3 }
 0x193   : > { %v4571_v53 = vadd.f32 %v1230_v18, %v906_v20  ;;  %3748 = vmatprep.mubr.msk.bf16.mxu0 %vm3976_vm0, %v3975_v1  ;;  %v2156_v24 = vrot.slane %v3962_v25, 3  ;;  %v1666_v18 = vrot.slane %v1664_v54, 2 }
 0x194   : > { %v1233_v9 = vpop.f32.mrf.mxu1  ;;  %v3530_v55 = vpop.f32.mrf.mxu0 }
 0x195   : > { %4865 = vst [vmem:[#allocation7_spill] sm:$0xff] %v4571_v53  ;;  %v1670_v25 = vor.u32 %v1669_v62, %v1666_v18 }
 0x196   : > { %v3645_v52 = vpop.f32.mrf.mxu1  ;;  %v909_v4 = vpop.f32.mrf.mxu0 }
 0x197   : > { %v4578_v40 = vadd.f32 %v1233_v9, %v909_v4  ;;  %v1662_v52 = vsel %vm1456_vm4, %v1652_v5, %v1661_v32  ;;  %v1673_v9 = vshrl.u32 %v3963_v46, 16  ;;  %v1676_v5 = vshll.u32 %v3963_v46, 16 }
 0x198   : > { %v1238_v11 = vpop.f32.mrf.mxu1  ;;  %3863 = vmatmul.mubr.msk.bf16.gmra.mxu1 %vm606_vm1, %v2155_v12  ;;  %v3531_v45 = vpop.f32.mrf.mxu0  ;;  %v2157_v12 = vsel %vm2110_vm3, %v2154_v35, %v2156_v24 }
 0x199   : > { %3866 = vmatprep.mubr.msk.bf16.mxu1 %vm3976_vm0, %v3975_v1  ;;  %4866 = vst [vmem:[#allocation8_spill] sm:$0xff] %v4578_v40  ;;  %v3964_v45 = vld [vmem:[%s4039_s29 + $0xd0] sm:$0xff]  }
 0x19a   : > { %v3648_v20 = vpop.f32.mrf.mxu1  ;;  %v914_v53 = vpop.f32.mrf.mxu0  ;;  %3749 = vmatmul.mubr.msk.bf16.gmra.mxu0 %vm606_vm1, %v1662_v52  ;;  %v1678_v52 = vrot.slane %v1676_v5, 3 }
 0x19b   : > { %v4584_v55 = vadd.f32 %v1238_v11, %v914_v53  ;;  %3752 = vmatprep.mubr.msk.bf16.mxu0 %vm3976_vm0, %v3975_v1  ;;  %v2158_v20 = vrot.slane %v3963_v46, 3  ;;  %v1675_v11 = vrot.slane %v1673_v9, 2 }
 0x19c   : > { %v1241_v42 = vpop.f32.mrf.mxu1  ;;  %v3534_v54 = vpop.f32.mrf.mxu0 }
 0x19d   : > { %4867 = vst [vmem:[#allocation9_spill] sm:$0xff] %v4584_v55  ;;  %v1679_v46 = vor.u32 %v1678_v52, %v1675_v11 }
 0x19e   : > { %v3649_v36 = vpop.f32.mrf.mxu1  ;;  %v917_v4 = vpop.f32.mrf.mxu0 }
 0x19f   : > { %v4591_v35 = vadd.f32 %v1241_v42, %v917_v4  ;;  %v1671_v36 = vsel %vm1456_vm4, %v1661_v32, %v1670_v25  ;;  %v1682_v42 = vshrl.u32 %v3964_v45, 16  ;;  %v1685_v32 = vshll.u32 %v3964_v45, 16 }
 0x1a0   : > { %v1246_v3 = vpop.f32.mrf.mxu1  ;;  %3867 = vmatmul.mubr.msk.bf16.gmra.mxu1 %vm606_vm1, %v2157_v12  ;;  %v3535_v18 = vpop.f32.mrf.mxu0  ;;  %v2159_v12 = vsel %vm2110_vm3, %v2156_v24, %v2158_v20 }
 0x1a1   : > { %3870 = vmatprep.mubr.msk.bf16.mxu1 %vm3976_vm0, %v3975_v1  ;;  %4868 = vst [vmem:[#allocation10_spill] sm:$0xff] %v4591_v35  ;;  %v3965_v18 = vld [vmem:[%s4039_s29 + $0xd8] sm:$0x1f]  }
 0x1a2   : > { %v3652_v53 = vpop.f32.mrf.mxu1  ;;  %v922_v55 = vpop.f32.mrf.mxu0  ;;  %3753 = vmatmul.mubr.msk.bf16.gmra.mxu0 %vm606_vm1, %v1671_v36  ;;  %v1687_v36 = vrot.slane %v1685_v32, 3 }
 0x1a3   : > { %v4597_v54 = vadd.f32 %v1246_v3, %v922_v55  ;;  %3756 = vmatprep.mubr.msk.bf16.mxu0 %vm3976_vm0, %v3975_v1  ;;  %v2160_v53 = vrot.slane %v3964_v45, 3  ;;  %v1684_v3 = vrot.slane %v1682_v42, 2 }
 0x1a4   : > { %v1249_v62 = vpop.f32.mrf.mxu1  ;;  %v3538_v9 = vpop.f32.mrf.mxu0 }
 0x1a5   : > { %4869 = vst [vmem:[#allocation11_spill] sm:$0xff] %v4597_v54  ;;  %v1688_v45 = vor.u32 %v1687_v36, %v1684_v3 }
 0x1a6   : > { %v3653_v40 = vpop.f32.mrf.mxu1  ;;  %v925_v4 = vpop.f32.mrf.mxu0 }
 0x1a7   : > { %v4604_v24 = vadd.f32 %v1249_v62, %v925_v4  ;;  %v1680_v40 = vsel %vm1456_vm4, %v1670_v25, %v1679_v46  ;;  %v1691_v62 = vshrl.u32 %v3965_v18, 16  ;;  %v1694_v4 = vshll.u32 %v3965_v18, 16 }
 0x1a8   : > { %v1254_v5 = vpop.f32.mrf.mxu1  ;;  %3871 = vmatmul.mubr.msk.bf16.gmra.mxu1 %vm606_vm1, %v2159_v12  ;;  %v3539_v11 = vpop.f32.mrf.mxu0  ;;  %v2161_v12 = vsel %vm2110_vm3, %v2158_v20, %v2160_v53  ;;  %v1689_v20 = vsel %vm1456_vm4, %v1679_v46, %v1688_v45  ;;  %v4626_v46 = vld [vmem:[%s4858_s2] ss:$0 sm:$0xff] }
 0x1a9   : > { %3874 = vmatprep.mubr.msk.bf16.mxu1 %vm3976_vm0, %v3975_v1 }
 0x1aa   : > { %v3656_v55 = vpop.f32.mrf.mxu1  ;;  %v930_v54 = vpop.f32.mrf.mxu0  ;;  %3757 = vmatmul.mubr.msk.bf16.gmra.mxu0 %vm606_vm1, %v1680_v40 }
 0x1ab   : > { %v4610_v9 = vadd.f32 %v1254_v5, %v930_v54  ;;  %3760 = vmatprep.mubr.msk.bf16.mxu0 %vm3976_vm0, %v3975_v1  ;;  %v2162_v55 = vrot.slane %v3965_v18, 3  ;;  %v1693_v54 = vrot.slane %v1691_v62, 2 }
 0x1ac   : > { %v1257_v52 = vpop.f32.mrf.mxu1  ;;  %v3542_v25 = vpop.f32.mrf.mxu0 }
 0x1ad   : > { %v2163_v36 = vsel %vm2110_vm3, %v2160_v53, %v2162_v55 }
 0x1ae   : > { %v3657_v35 = vpop.f32.mrf.mxu1  ;;  %v933_v32 = vpop.f32.mrf.mxu0 }
 0x1af   : > { %v1696_v35 = vrot.slane %v1694_v4, 3 }
 0x1b0   : > { %v2297_v42 = vpop.f32.mrf.mxu1  ;;  %3875 = vmatmul.mubr.msk.bf16.gmra.mxu1 %vm606_vm1, %v2161_v12  ;;  %v3543_v5 = vpop.f32.mrf.mxu0 }
 0x1b1   : > { %3878 = vmatprep.mubr.msk.bf16.mxu1 %vm3976_vm0, %v3975_v1  ;;  %v1697_v18 = vor.u32 %v1696_v35, %v1693_v54 }
 0x1b2   : > { %v3780_v40 = vpop.f32.mrf.mxu1  ;;  %v1832_v3 = vpop.f32.mrf.mxu0  ;;  %3761 = vmatmul.mubr.msk.bf16.gmra.mxu0 %vm606_vm1, %v1689_v20 }
 0x1b3   : > { %v2046_v52 = vadd.f32 %v1832_v3, %v4265_v47  ;;  %3764 = vmatprep.mubr.msk.bf16.mxu0 %vm3976_vm0, %v3975_v1  ;;  %v1698_v20 = vsel %vm1456_vm4, %v1688_v45, %v1697_v18 }
 0x1b4   : > { %v2300_v11 = vpop.f32.mrf.mxu1  ;;  %v3666_v62 = vpop.f32.mrf.mxu0 }
 0x1b5   : > { %v2511_v4 = vadd.f32 %v2297_v42, %v2046_v52 }
 0x1b6   : > { %v3781_v12 = vpop.f32.mrf.mxu1  ;;  %v1835_v32 = vpop.f32.mrf.mxu0 }
 0x1b7   : > { %v2571_v47 = vadd.f32 %v4626_v46, %v2511_v4  ;;  %v2047_v53 = vadd.f32 %v1835_v32, %v4274_v57 }
 0x1b8   : > { %v2305_v25 = vpop.f32.mrf.mxu1  ;;  %3879 = vmatmul.mubr.msk.bf16.gmra.mxu1 %vm606_vm1, %v2163_v36  ;;  %v3667_v54 = vpop.f32.mrf.mxu0 }
 0x1b9   : > { %3882 = vmatprep.mubr.msk.bf16.mxu1 %vm3976_vm0, %v3975_v1  ;;  %v2624_v35 = vmax.f32 %v2571_v47, 0.0  ;;  %v2512_v5 = vadd.f32 %v2300_v11, %v2047_v53 }
 0x1ba   : > { %v3784_v40 = vpop.f32.mrf.mxu1  ;;  %v1840_v42 = vpop.f32.mrf.mxu0  ;;  %3765 = vmatmul.mubr.msk.bf16.gmra.mxu0 %vm606_vm1, %v1698_v20 }
 0x1bb   : > { %v3257_v36 = vpack.c.bf16 %v2624_v35, %v2624_v35  ;;  %v2572_v57 = vadd.f32 %v4626_v46, %v2512_v5  ;;  %v2048_v45 = vadd.f32 %v1840_v42, %v4283_v7  ;;  %3768 = vmatprep.mubr.msk.bf16.mxu0 %vm3976_vm0, %v3975_v1 }
 0x1bc   : > { %v2308_v3 = vpop.f32.mrf.mxu1  ;;  %v3670_v11 = vpop.f32.mrf.mxu0 }
 0x1bd   : > { %2891 = vst.msk [vmem:[%s4638_s22] sm:$0xf] %vm2890_vm5, %v3257_v36  ;;  %v2625_v12 = vmax.f32 %v2572_v57, 0.0  ;;  %v2513_v62 = vadd.f32 %v2305_v25, %v2048_v45 }
 0x1be   : > { %v3785_v52 = vpop.f32.mrf.mxu1  ;;  %v1843_v32 = vpop.f32.mrf.mxu0 }
 0x1bf   : > { %v3258_v47 = vpack.c.bf16 %v2625_v12, %v2625_v12  ;;  %v2573_v53 = vadd.f32 %v4626_v46, %v2513_v62  ;;  %v2049_v40 = vadd.f32 %v1843_v32, %v4293_v19 }
 0x1c0   : > { %v2313_v4 = vpop.f32.mrf.mxu1  ;;  %3883 = vmatmul.mubr.msk.bf16.gmra.mxu1 %vm606_vm1, %v2162_v55  ;;  %v3671_v20 = vpop.f32.mrf.mxu0 }
 0x1c1   : > { %2892 = vst.msk [vmem:[%s4638_s22 + $0x4] sm:$0xf] %vm2890_vm5, %v3258_v47  ;;  %v2626_v1 = vmax.f32 %v2573_v53, 0.0  ;;  %v2514_v54 = vadd.f32 %v2308_v3, %v2049_v40 }
 0x1c2   : > { %v3788_v7 = vpop.f32.mrf.mxu1  ;;  %v1848_v5 = vpop.f32.mrf.mxu0  ;;  %3769 = vmatmul.mubr.msk.bf16.gmra.mxu0 %vm606_vm1, %v1697_v18 }
 0x1c3   : > { %v3259_v25 = vpack.c.bf16 %v2626_v1, %v2626_v1  ;;  %v2574_v55 = vadd.f32 %v4626_v46, %v2514_v54  ;;  %v2050_v42 = vadd.f32 %v1848_v5, %v4298_v29 }
 0x1c4   : > { %v2316_v35 = vpop.f32.mrf.mxu1  ;;  %v3674_v57 = vpop.f32.mrf.mxu0 }
 0x1c5   : > { %2893 = vst.msk [vmem:[%s4638_s22 + $0x8] sm:$0xf] %vm2890_vm5, %v3259_v25  ;;  %v2627_v19 = vmax.f32 %v2574_v55, 0.0  ;;  %v2515_v45 = vadd.f32 %v2313_v4, %v2050_v42 }
 0x1c6   : > { %v3789_v36 = vpop.f32.mrf.mxu1  ;;  %v1851_v11 = vpop.f32.mrf.mxu0 }
 0x1c7   : > { %v3260_v3 = vpack.c.bf16 %v2627_v19, %v2627_v19  ;;  %v2575_v12 = vadd.f32 %v4626_v46, %v2515_v45  ;;  %v2051_v18 = vadd.f32 %v1851_v11, %v4305_v38 }
 0x1c8   : > { %v2321_v52 = vpop.f32.mrf.mxu1  ;;  %v3675_v32 = vpop.f32.mrf.mxu0 }
 0x1c9   : > { %2894 = vst.msk [vmem:[%s4638_s22 + $0xc] sm:$0xf] %vm2890_vm5, %v3260_v3  ;;  %v2628_v47 = vmax.f32 %v2575_v12, 0.0  ;;  %v2516_v29 = vadd.f32 %v2316_v35, %v2051_v18 }
 0x1ca   : > { %v3792_v62 = vpop.f32.mrf.mxu1  ;;  %v1856_v40 = vpop.f32.mrf.mxu0 }
 0x1cb   : > { %v3261_v7 = vpack.c.bf16 %v2628_v47, %v2628_v47  ;;  %v2576_v4 = vadd.f32 %v4626_v46, %v2516_v29  ;;  %v2052_v20 = vadd.f32 %v1856_v40, %v4311_v49 }
 0x1cc   : > { %v2324_v53 = vpop.f32.mrf.mxu1  ;;  %v3678_v54 = vpop.f32.mrf.mxu0 }
 0x1cd   : > { %2895 = vst.msk [vmem:[%s4638_s22 + $0x10] sm:$0xf] %vm2890_vm5, %v3261_v7  ;;  %v2629_v5 = vmax.f32 %v2576_v4, 0.0  ;;  %v2517_v38 = vadd.f32 %v2321_v52, %v2052_v20 }
 0x1ce   : > { %v3793_v1 = vpop.f32.mrf.mxu1  ;;  %v1859_v55 = vpop.f32.mrf.mxu0 }
 0x1cf   : > { %v3262_v42 = vpack.c.bf16 %v2629_v5, %v2629_v5  ;;  %v2577_v35 = vadd.f32 %v4626_v46, %v2517_v38  ;;  %v2053_v36 = vadd.f32 %v1859_v55, %v4318_v59 }
 0x1d0   : > { %v2329_v25 = vpop.f32.mrf.mxu1  ;;  %v3679_v19 = vpop.f32.mrf.mxu0 }
 0x1d1   : > { %2896 = vst.msk [vmem:[%s4638_s22 + $0x14] sm:$0xf] %vm2890_vm5, %v3262_v42  ;;  %v2630_v45 = vmax.f32 %v2577_v35, 0.0  ;;  %v2518_v49 = vadd.f32 %v2324_v53, %v2053_v36 }
 0x1d2   : > { %v3796_v57 = vpop.f32.mrf.mxu1  ;;  %v1864_v3 = vpop.f32.mrf.mxu0 }
 0x1d3   : > { %v3263_v12 = vpack.c.bf16 %v2630_v45, %v2630_v45  ;;  %v2578_v52 = vadd.f32 %v4626_v46, %v2518_v49  ;;  %v2054_v18 = vadd.f32 %v1864_v3, %v4324_v6 }
 0x1d4   : > { %v2332_v11 = vpop.f32.mrf.mxu1  ;;  %v3682_v32 = vpop.f32.mrf.mxu0 }
 0x1d5   : > { %2897 = vst.msk [vmem:[%s4638_s22 + $0x18] sm:$0xf] %vm2890_vm5, %v3263_v12  ;;  %v2631_v47 = vmax.f32 %v2578_v52, 0.0  ;;  %v2519_v59 = vadd.f32 %v2329_v25, %v2054_v18 }
 0x1d6   : > { %v3797_v62 = vpop.f32.mrf.mxu1  ;;  %v1867_v40 = vpop.f32.mrf.mxu0 }
 0x1d7   : > { %v3264_v7 = vpack.c.bf16 %v2631_v47, %v2631_v47  ;;  %v2579_v53 = vadd.f32 %v4626_v46, %v2519_v59  ;;  %v2055_v4 = vadd.f32 %v1867_v40, %v4331_v16 }
 0x1d8   : > { %v2337_v29 = vpop.f32.mrf.mxu1  ;;  %v3683_v1 = vpop.f32.mrf.mxu0 }
 0x1d9   : > { %2898 = vst.msk [vmem:[%s4638_s22 + $0x1c] sm:$0xf] %vm2890_vm5, %v3264_v7  ;;  %v2632_v54 = vmax.f32 %v2579_v53, 0.0  ;;  %v2520_v6 = vadd.f32 %v2332_v11, %v2055_v4 }
 0x1da   : > { %v3800_v20 = vpop.f32.mrf.mxu1  ;;  %v1872_v38 = vpop.f32.mrf.mxu0 }
 0x1db   : > { %v3265_v55 = vpack.c.bf16 %v2632_v54, %v2632_v54  ;;  %v2580_v25 = vadd.f32 %v4626_v46, %v2520_v6  ;;  %v2056_v42 = vadd.f32 %v1872_v38, %v4337_v27 }
 0x1dc   : > { %v2340_v5 = vpop.f32.mrf.mxu1  ;;  %v3686_v36 = vpop.f32.mrf.mxu0 }
 0x1dd   : > { %2899 = vst.msk [vmem:[%s4638_s22 + $0x20] sm:$0xf] %vm2890_vm5, %v3265_v55  ;;  %v2633_v57 = vmax.f32 %v2580_v25, 0.0  ;;  %v2521_v16 = vadd.f32 %v2337_v29, %v2056_v42 }
 0x1de   : > { %v3801_v35 = vpop.f32.mrf.mxu1  ;;  %v1875_v45 = vpop.f32.mrf.mxu0 }
 0x1df   : > { %v3266_v49 = vpack.c.bf16 %v2633_v57, %v2633_v57  ;;  %v2581_v11 = vadd.f32 %v4626_v46, %v2521_v16  ;;  %v2057_v3 = vadd.f32 %v1875_v45, %v4344_v37 }
 0x1e0   : > { %v2345_v19 = vpop.f32.mrf.mxu1  ;;  %v3687_v52 = vpop.f32.mrf.mxu0 }
 0x1e1   : > { %2900 = vst.msk [vmem:[%s4638_s22 + $0x24] sm:$0xf] %vm2890_vm5, %v3266_v49  ;;  %v2634_v18 = vmax.f32 %v2581_v11, 0.0  ;;  %v2522_v27 = vadd.f32 %v2340_v5, %v2057_v3 }
 0x1e2   : > { %v3804_v12 = vpop.f32.mrf.mxu1  ;;  %v1880_v32 = vpop.f32.mrf.mxu0 }
 0x1e3   : > { %v3267_v47 = vpack.c.bf16 %v2634_v18, %v2634_v18  ;;  %v2582_v59 = vadd.f32 %v4626_v46, %v2522_v27  ;;  %v2058_v29 = vadd.f32 %v1880_v32, %v4350_v50 }
 0x1e4   : > { %v2348_v62 = vpop.f32.mrf.mxu1  ;;  %v3690_v7 = vpop.f32.mrf.mxu0 }
 0x1e5   : > { %2901 = vst.msk [vmem:[%s4638_s22 + $0x28] sm:$0xf] %vm2890_vm5, %v3267_v47  ;;  %v2635_v53 = vmax.f32 %v2582_v59, 0.0  ;;  %v2523_v37 = vadd.f32 %v2345_v19, %v2058_v29 }
 0x1e6   : > { %v3805_v40 = vpop.f32.mrf.mxu1  ;;  %v1883_v20 = vpop.f32.mrf.mxu0 }
 0x1e7   : > { %v3268_v1 = vpack.c.bf16 %v2635_v53, %v2635_v53  ;;  %v2583_v54 = vadd.f32 %v4626_v46, %v2523_v37  ;;  %v2059_v6 = vadd.f32 %v1883_v20, %v4357_v61 }
 0x1e8   : > { %v2353_v4 = vpop.f32.mrf.mxu1  ;;  %v3691_v38 = vpop.f32.mrf.mxu0 }
 0x1e9   : > { %2902 = vst.msk [vmem:[%s4638_s22 + $0x2c] sm:$0xf] %vm2890_vm5, %v3268_v1  ;;  %v2636_v55 = vmax.f32 %v2583_v54, 0.0  ;;  %v2524_v50 = vadd.f32 %v2348_v62, %v2059_v6 }
 0x1ea   : > { %v3808_v5 = vpop.f32.mrf.mxu1  ;;  %v1888_v42 = vpop.f32.mrf.mxu0 }
 0x1eb   : > { %v3269_v35 = vpack.c.bf16 %v2636_v55, %v2636_v55  ;;  %v2584_v36 = vadd.f32 %v4626_v46, %v2524_v50  ;;  %v2060_v57 = vadd.f32 %v1888_v42, %v4363_v10 }
 0x1ec   : > { %v2356_v25 = vpop.f32.mrf.mxu1  ;;  %v3694_v19 = vpop.f32.mrf.mxu0 }
 0x1ed   : > { %2903 = vst.msk [vmem:[%s4638_s22 + $0x30] sm:$0xf] %vm2890_vm5, %v3269_v35  ;;  %v2637_v45 = vmax.f32 %v2584_v36, 0.0  ;;  %v2525_v61 = vadd.f32 %v2353_v4, %v2060_v57 }
 0x1ee   : > { %v3809_v16 = vpop.f32.mrf.mxu1  ;;  %v1891_v11 = vpop.f32.mrf.mxu0 }
 0x1ef   : > { %v3270_v3 = vpack.c.bf16 %v2637_v45, %v2637_v45  ;;  %v2585_v12 = vadd.f32 %v4626_v46, %v2525_v61  ;;  %v2061_v52 = vadd.f32 %v1891_v11, %v4370_v21 }
 0x1f0   : > { %v2361_v49 = vpop.f32.mrf.mxu1  ;;  %v3695_v27 = vpop.f32.mrf.mxu0 }
 0x1f1   : > { %2904 = vst.msk [vmem:[%s4638_s22 + $0x34] sm:$0xf] %vm2890_vm5, %v3270_v3  ;;  %v2638_v62 = vmax.f32 %v2585_v12, 0.0  ;;  %v2526_v10 = vadd.f32 %v2356_v25, %v2061_v52 }
 0x1f2   : > { %v3812_v18 = vpop.f32.mrf.mxu1  ;;  %v1896_v47 = vpop.f32.mrf.mxu0 }
 0x1f3   : > { %v3271_v59 = vpack.c.bf16 %v2638_v62, %v2638_v62  ;;  %v2586_v29 = vadd.f32 %v4626_v46, %v2526_v10  ;;  %v2062_v40 = vadd.f32 %v1896_v47, %v4376_v33 }
 0x1f4   : > { %v2364_v32 = vpop.f32.mrf.mxu1  ;;  %v3698_v53 = vpop.f32.mrf.mxu0 }
 0x1f5   : > { %2905 = vst.msk [vmem:[%s4638_s22 + $0x38] sm:$0xf] %vm2890_vm5, %v3271_v59  ;;  %v2639_v37 = vmax.f32 %v2586_v29, 0.0  ;;  %v2527_v21 = vadd.f32 %v2361_v49, %v2062_v40 }
 0x1f6   : > { %v3813_v7 = vpop.f32.mrf.mxu1  ;;  %v1899_v20 = vpop.f32.mrf.mxu0 }
 0x1f7   : > { %v3272_v1 = vpack.c.bf16 %v2639_v37, %v2639_v37  ;;  %v2587_v54 = vadd.f32 %v4626_v46, %v2527_v21  ;;  %v2063_v6 = vadd.f32 %v1899_v20, %v4383_v44 }
 0x1f8   : > { %v2369_v4 = vpop.f32.mrf.mxu1  ;;  %v3699_v38 = vpop.f32.mrf.mxu0 }
 0x1f9   : > { %2906 = vst.msk [vmem:[%s4638_s22 + $0x3c] sm:$0xf] %vm2890_vm5, %v3272_v1  ;;  %v2640_v55 = vmax.f32 %v2587_v54, 0.0  ;;  %v2528_v33 = vadd.f32 %v2364_v32, %v2063_v6 }
 0x1fa   : > { %v3816_v5 = vpop.f32.mrf.mxu1  ;;  %v1904_v25 = vpop.f32.mrf.mxu0 }
 0x1fb   : > { %v3273_v42 = vpack.c.bf16 %v2640_v55, %v2640_v55  ;;  %v2588_v35 = vadd.f32 %v4626_v46, %v2528_v33  ;;  %v2064_v36 = vadd.f32 %v1904_v25, %v4389_v58 }
 0x1fc   : > { %v2372_v50 = vpop.f32.mrf.mxu1  ;;  %v3702_v16 = vpop.f32.mrf.mxu0 }
 0x1fd   : > { %2907 = vst.msk [vmem:[%s4638_s22 + $0x40] sm:$0xf] %vm2890_vm5, %v3273_v42  ;;  %v2641_v19 = vmax.f32 %v2588_v35, 0.0  ;;  %v2529_v44 = vadd.f32 %v2369_v4, %v2064_v36 }
 0x1fe   : > { %v3817_v57 = vpop.f32.mrf.mxu1  ;;  %v1907_v61 = vpop.f32.mrf.mxu0 }
 0x1ff   : > { %v3274_v49 = vpack.c.bf16 %v2641_v19, %v2641_v19  ;;  %v2589_v11 = vadd.f32 %v4626_v46, %v2529_v44  ;;  %v2065_v3 = vadd.f32 %v1907_v61, %v4396_v8 }
 0x200   : > { %v2377_v45 = vpop.f32.mrf.mxu1  ;;  %v3703_v52 = vpop.f32.mrf.mxu0 }
 0x201   : > { %2908 = vst.msk [vmem:[%s4638_s22 + $0x44] sm:$0xf] %vm2890_vm5, %v3274_v49  ;;  %v2642_v18 = vmax.f32 %v2589_v11, 0.0  ;;  %v2530_v58 = vadd.f32 %v2372_v50, %v2065_v3 }
 0x202   : > { %v3820_v12 = vpop.f32.mrf.mxu1  ;;  %v1912_v62 = vpop.f32.mrf.mxu0 }
 0x203   : > { %v3275_v10 = vpack.c.bf16 %v2642_v18, %v2642_v18  ;;  %v2590_v32 = vadd.f32 %v4626_v46, %v2530_v58  ;;  %v2066_v47 = vadd.f32 %v1912_v62, %v4402_v22 }
 0x204   : > { %v2380_v27 = vpop.f32.mrf.mxu1  ;;  %v3706_v29 = vpop.f32.mrf.mxu0 }
 0x205   : > { %2909 = vst.msk [vmem:[%s4638_s22 + $0x48] sm:$0xf] %vm2890_vm5, %v3275_v10  ;;  %v2643_v40 = vmax.f32 %v2590_v32, 0.0  ;;  %v2531_v8 = vadd.f32 %v2377_v45, %v2066_v47 }
 0x206   : > { %v3821_v59 = vpop.f32.mrf.mxu1  ;;  %v1915_v53 = vpop.f32.mrf.mxu0 }
 0x207   : > { %v3276_v37 = vpack.c.bf16 %v2643_v40, %v2643_v40  ;;  %v2591_v21 = vadd.f32 %v4626_v46, %v2531_v8  ;;  %v2067_v4 = vadd.f32 %v1915_v53, %v4409_v34 }
 0x208   : > { %v2385_v7 = vpop.f32.mrf.mxu1  ;;  %v3707_v1 = vpop.f32.mrf.mxu0 }
 0x209   : > { %2910 = vst.msk [vmem:[%s4638_s22 + $0x4c] sm:$0xf] %vm2890_vm5, %v3276_v37  ;;  %v2644_v54 = vmax.f32 %v2591_v21, 0.0  ;;  %v2532_v22 = vadd.f32 %v2380_v27, %v2067_v4 }
 0x20a   : > { %v3824_v20 = vpop.f32.mrf.mxu1  ;;  %v1920_v5 = vpop.f32.mrf.mxu0 }
 0x20b   : > { %v3277_v38 = vpack.c.bf16 %v2644_v54, %v2644_v54  ;;  %v2592_v55 = vadd.f32 %v4626_v46, %v2532_v22  ;;  %v2068_v33 = vadd.f32 %v1920_v5, %v4415_v48 }
 0x20c   : > { %v2388_v6 = vpop.f32.mrf.mxu1  ;;  %v3710_v25 = vpop.f32.mrf.mxu0 }
 0x20d   : > { %2911 = vst.msk [vmem:[%s4638_s22 + $0x50] sm:$0xf] %vm2890_vm5, %v3277_v38  ;;  %v2645_v42 = vmax.f32 %v2592_v55, 0.0  ;;  %v2533_v34 = vadd.f32 %v2385_v7, %v2068_v33 }
 0x20e   : > { %v3825_v50 = vpop.f32.mrf.mxu1  ;;  %v1923_v36 = vpop.f32.mrf.mxu0 }
 0x20f   : > { %v3278_v57 = vpack.c.bf16 %v2645_v42, %v2645_v42  ;;  %v2593_v16 = vadd.f32 %v4626_v46, %v2533_v34  ;;  %v2069_v19 = vadd.f32 %v1923_v36, %v4422_v63 }
 0x210   : > { %v2393_v35 = vpop.f32.mrf.mxu1  ;;  %v3711_v45 = vpop.f32.mrf.mxu0 }
 0x211   : > { %2912 = vst.msk [vmem:[%s4638_s22 + $0x54] sm:$0xf] %vm2890_vm5, %v3278_v57  ;;  %v2646_v61 = vmax.f32 %v2593_v16, 0.0  ;;  %v2534_v48 = vadd.f32 %v2388_v6, %v2069_v19 }
 0x212   : > { %v3828_v44 = vpop.f32.mrf.mxu1  ;;  %v1928_v11 = vpop.f32.mrf.mxu0 }
 0x213   : > { %v3279_v3 = vpack.c.bf16 %v2646_v61, %v2646_v61  ;;  %v2594_v12 = vadd.f32 %v4626_v46, %v2534_v48  ;;  %v2070_v52 = vadd.f32 %v1928_v11, %v4428_v14 }
 0x214   : > { %v2396_v49 = vpop.f32.mrf.mxu1  ;;  %v3714_v58 = vpop.f32.mrf.mxu0 }
 0x215   : > { %2913 = vst.msk [vmem:[%s4638_s22 + $0x58] sm:$0xf] %vm2890_vm5, %v3279_v3  ;;  %v2647_v27 = vmax.f32 %v2594_v12, 0.0  ;;  %v2535_v63 = vadd.f32 %v2393_v35, %v2070_v52 }
 0x216   : > { %v3829_v18 = vpop.f32.mrf.mxu1  ;;  %v1931_v10 = vpop.f32.mrf.mxu0 }
 0x217   : > { %v3280_v32 = vpack.c.bf16 %v2647_v27, %v2647_v27  ;;  %v2595_v47 = vadd.f32 %v4626_v46, %v2535_v63  ;;  %v2071_v59 = vadd.f32 %v1931_v10, %v4435_v28 }
 0x218   : > { %v2401_v62 = vpop.f32.mrf.mxu1  ;;  %v3715_v40 = vpop.f32.mrf.mxu0 }
 0x219   : > { %2914 = vst.msk [vmem:[%s4638_s22 + $0x5c] sm:$0xf] %vm2890_vm5, %v3280_v32  ;;  %v2648_v8 = vmax.f32 %v2595_v47, 0.0  ;;  %v2536_v14 = vadd.f32 %v2396_v49, %v2071_v59 }
 0x21a   : > { %v3832_v29 = vpop.f32.mrf.mxu1  ;;  %v1936_v53 = vpop.f32.mrf.mxu0 }
 0x21b   : > { %v3281_v37 = vpack.c.bf16 %v2648_v8, %v2648_v8  ;;  %v2596_v21 = vadd.f32 %v4626_v46, %v2536_v14  ;;  %v2072_v4 = vadd.f32 %v1936_v53, %v4441_v43 }
 0x21c   : > { %v2404_v7 = vpop.f32.mrf.mxu1  ;;  %v3718_v1 = vpop.f32.mrf.mxu0 }
 0x21d   : > { %2915 = vst.msk [vmem:[%s4638_s22 + $0x60] sm:$0xf] %vm2890_vm5, %v3281_v37  ;;  %v2649_v54 = vmax.f32 %v2596_v21, 0.0  ;;  %v2537_v28 = vadd.f32 %v2401_v62, %v2072_v4 }
 0x21e   : > { %v3833_v20 = vpop.f32.mrf.mxu1  ;;  %v1939_v6 = vpop.f32.mrf.mxu0 }
 0x21f   : > { %v3282_v5 = vpack.c.bf16 %v2649_v54, %v2649_v54  ;;  %v2597_v38 = vadd.f32 %v4626_v46, %v2537_v28  ;;  %v2073_v55 = vadd.f32 %v1939_v6, %v4448_v60 }
 0x220   : > { %v2409_v22 = vpop.f32.mrf.mxu1  ;;  %v3719_v50 = vpop.f32.mrf.mxu0 }
 0x221   : > { %2916 = vst.msk [vmem:[%s4638_s22 + $0x64] sm:$0xf] %vm2890_vm5, %v3282_v5  ;;  %v2650_v25 = vmax.f32 %v2597_v38, 0.0  ;;  %v2538_v43 = vadd.f32 %v2404_v7, %v2073_v55 }
 0x222   : > { %v3836_v33 = vpop.f32.mrf.mxu1  ;;  %v1944_v34 = vpop.f32.mrf.mxu0 }
 0x223   : > { %v3283_v35 = vpack.c.bf16 %v2650_v25, %v2650_v25  ;;  %v2598_v36 = vadd.f32 %v4626_v46, %v2538_v43  ;;  %v2074_v57 = vadd.f32 %v1944_v34, %v4454_v13 }
 0x224   : > { %v2412_v42 = vpop.f32.mrf.mxu1  ;;  %v3722_v19 = vpop.f32.mrf.mxu0 }
 0x225   : > { %2917 = vst.msk [vmem:[%s4638_s22 + $0x68] sm:$0xf] %vm2890_vm5, %v3283_v35  ;;  %v2651_v44 = vmax.f32 %v2598_v36, 0.0  ;;  %v2539_v60 = vadd.f32 %v2409_v22, %v2074_v57 }
 0x226   : > { %v3837_v16 = vpop.f32.mrf.mxu1  ;;  %v1947_v61 = vpop.f32.mrf.mxu0 }
 0x227   : > { %v3284_v48 = vpack.c.bf16 %v2651_v44, %v2651_v44  ;;  %v2599_v49 = vadd.f32 %v4626_v46, %v2539_v60  ;;  %v2075_v11 = vadd.f32 %v1947_v61, %v4461_v26 }
 0x228   : > { %v2417_v45 = vpop.f32.mrf.mxu1  ;;  %v3723_v12 = vpop.f32.mrf.mxu0 }
 0x229   : > { %2918 = vst.msk [vmem:[%s4638_s22 + $0x6c] sm:$0xf] %vm2890_vm5, %v3284_v48  ;;  %v2652_v52 = vmax.f32 %v2599_v49, 0.0  ;;  %v2540_v13 = vadd.f32 %v2412_v42, %v2075_v11 }
 0x22a   : > { %v3840_v3 = vpop.f32.mrf.mxu1  ;;  %v1952_v58 = vpop.f32.mrf.mxu0 }
 0x22b   : > { %v3285_v27 = vpack.c.bf16 %v2652_v52, %v2652_v52  ;;  %v2600_v63 = vadd.f32 %v4626_v46, %v2540_v13  ;;  %v2076_v62 = vadd.f32 %v1952_v58, %v4467_v51 }
 0x22c   : > { %v2420_v18 = vpop.f32.mrf.mxu1  ;;  %v3726_v32 = vpop.f32.mrf.mxu0 }
 0x22d   : > { %2919 = vst.msk [vmem:[%s4638_s22 + $0x70] sm:$0xf] %vm2890_vm5, %v3285_v27  ;;  %v2653_v47 = vmax.f32 %v2600_v63, 0.0  ;;  %v2541_v26 = vadd.f32 %v2417_v45, %v2076_v62 }
 0x22e   : > { %v3841_v10 = vpop.f32.mrf.mxu1  ;;  %v1955_v29 = vpop.f32.mrf.mxu0 }
 0x22f   : > { %v3286_v40 = vpack.c.bf16 %v2653_v47, %v2653_v47  ;;  %v2601_v8 = vadd.f32 %v4626_v46, %v2541_v26  ;;  %v2077_v14 = vadd.f32 %v1955_v29, %v4474_v56 }
 0x230   : > { %v2425_v59 = vpop.f32.mrf.mxu1  ;;  %v3727_v53 = vpop.f32.mrf.mxu0 }
 0x231   : > { %2920 = vst.msk [vmem:[%s4638_s22 + $0x74] sm:$0xf] %vm2890_vm5, %v3286_v40  ;;  %v2654_v37 = vmax.f32 %v2601_v8, 0.0  ;;  %v2542_v51 = vadd.f32 %v2420_v18, %v2077_v14 }
 0x232   : > { %v3844_v7 = vpop.f32.mrf.mxu1  ;;  %v1960_v4 = vpop.f32.mrf.mxu0 }
 0x233   : > { %v3287_v20 = vpack.c.bf16 %v2654_v37, %v2654_v37  ;;  %v2602_v1 = vadd.f32 %v4626_v46, %v2542_v51  ;;  %v2078_v54 = vadd.f32 %v1960_v4, %v4480_v23 }
 0x234   : > { %v2428_v21 = vpop.f32.mrf.mxu1  ;;  %v3730_v22 = vpop.f32.mrf.mxu0 }
 0x235   : > { %2921 = vst.msk [vmem:[%s4638_s22 + $0x78] sm:$0xf] %vm2890_vm5, %v3287_v20  ;;  %v2655_v6 = vmax.f32 %v2602_v1, 0.0  ;;  %v2543_v56 = vadd.f32 %v2425_v59, %v2078_v54 }
 0x236   : > { %v3845_v28 = vpop.f32.mrf.mxu1  ;;  %v1963_v38 = vpop.f32.mrf.mxu0 }
 0x237   : > { %v3288_v55 = vpack.c.bf16 %v2655_v6, %v2655_v6  ;;  %v2603_v33 = vadd.f32 %v4626_v46, %v2543_v56  ;;  %v2079_v50 = vadd.f32 %v1963_v38, %v4487_v30 }
 0x238   : > { %v2433_v5 = vpop.f32.mrf.mxu1  ;;  %v3731_v43 = vpop.f32.mrf.mxu0 }
 0x239   : > { %2922 = vst.msk [vmem:[%s4638_s22 + $0x7c] sm:$0xf] %vm2890_vm5, %v3288_v55  ;;  %v2656_v42 = vmax.f32 %v2603_v33, 0.0  ;;  %v2544_v23 = vadd.f32 %v2428_v21, %v2079_v50 }
 0x23a   : > { %v3848_v25 = vpop.f32.mrf.mxu1  ;;  %v1968_v35 = vpop.f32.mrf.mxu0 }
 0x23b   : > { %v3289_v36 = vpack.c.bf16 %v2656_v42, %v2656_v42  ;;  %v2604_v57 = vadd.f32 %v4626_v46, %v2544_v23  ;;  %v2080_v16 = vadd.f32 %v1968_v35, %v4493_v0 }
 0x23c   : > { %v2436_v34 = vpop.f32.mrf.mxu1  ;;  %v3734_v44 = vpop.f32.mrf.mxu0 }
 0x23d   : > { %2923 = vst.msk [vmem:[%s4638_s22 + $0x80] sm:$0xf] %vm2890_vm5, %v3289_v36  ;;  %v2657_v60 = vmax.f32 %v2604_v57, 0.0  ;;  %v2545_v30 = vadd.f32 %v2433_v5, %v2080_v16 }
 0x23e   : > { %v3849_v19 = vpop.f32.mrf.mxu1  ;;  %v1971_v61 = vpop.f32.mrf.mxu0 }
 0x23f   : > { %v3290_v48 = vpack.c.bf16 %v2657_v60, %v2657_v60  ;;  %v2605_v49 = vadd.f32 %v4626_v46, %v2545_v30  ;;  %v2081_v11 = vadd.f32 %v1971_v61, %v4500_v2  ;;  %v4870_v60 = vld [vmem:[#allocation2_spill] sm:$0xff] }
 0x240   : > { %v2441_v45 = vpop.f32.mrf.mxu1  ;;  %v3735_v12 = vpop.f32.mrf.mxu0 }
 0x241   : > { %2924 = vst.msk [vmem:[%s4638_s22 + $0x84] sm:$0xf] %vm2890_vm5, %v3290_v48  ;;  %v2658_v52 = vmax.f32 %v2605_v49, 0.0  ;;  %v2546_v0 = vadd.f32 %v2436_v34, %v2081_v11 }
 0x242   : > { %v3852_v3 = vpop.f32.mrf.mxu1  ;;  %v1976_v18 = vpop.f32.mrf.mxu0 }
 0x243   : > { %v3291_v58 = vpack.c.bf16 %v2658_v52, %v2658_v52  ;;  %v2606_v27 = vadd.f32 %v4626_v46, %v2546_v0  ;;  %v2082_v63 = vadd.f32 %v1976_v18, %v4506_v41  ;;  %v4871_v52 = vld [vmem:[#allocation3_spill] sm:$0xff] }
 0x244   : > { %v2444_v13 = vpop.f32.mrf.mxu1  ;;  %v3738_v10 = vpop.f32.mrf.mxu0 }
 0x245   : > { %2925 = vst.msk [vmem:[%s4638_s22 + $0x88] sm:$0xf] %vm2890_vm5, %v3291_v58  ;;  %v2659_v32 = vmax.f32 %v2606_v27, 0.0  ;;  %v2547_v2 = vadd.f32 %v2441_v45, %v2082_v63 }
 0x246   : > { %v3853_v62 = vpop.f32.mrf.mxu1  ;;  %v1979_v26 = vpop.f32.mrf.mxu0 }
 0x247   : > { %v3292_v59 = vpack.c.bf16 %v2659_v32, %v2659_v32  ;;  %v2607_v29 = vadd.f32 %v4626_v46, %v2547_v2  ;;  %v2083_v40 = vadd.f32 %v1979_v26, %v4513_v39  ;;  %v4872_v2 = vld [vmem:[#allocation4_spill] sm:$0xff] }
 0x248   : > { %v2449_v47 = vpop.f32.mrf.mxu1  ;;  %v3739_v14 = vpop.f32.mrf.mxu0 }
 0x249   : > { %2926 = vst.msk [vmem:[%s4638_s22 + $0x8c] sm:$0xf] %vm2890_vm5, %v3292_v59  ;;  %v2660_v7 = vmax.f32 %v2607_v29, 0.0  ;;  %v2548_v41 = vadd.f32 %v2444_v13, %v2083_v40 }
 0x24a   : > { %v3856_v8 = vpop.f32.mrf.mxu1  ;;  %v1984_v37 = vpop.f32.mrf.mxu0 }
 0x24b   : > { %v3293_v51 = vpack.c.bf16 %v2660_v7, %v2660_v7  ;;  %v2608_v21 = vadd.f32 %v4626_v46, %v2548_v41  ;;  %v2084_v4 = vadd.f32 %v1984_v37, %v4519_v31 }
 0x24c   : > { %v2452_v53 = vpop.f32.mrf.mxu1  ;;  %v3742_v1 = vpop.f32.mrf.mxu0 }
 0x24d   : > { %2927 = vst.msk [vmem:[%s4638_s22 + $0x90] sm:$0xf] %vm2890_vm5, %v3293_v51  ;;  %v2661_v54 = vmax.f32 %v2608_v21, 0.0  ;;  %v2549_v39 = vadd.f32 %v2449_v47, %v2084_v4 }
 0x24e   : > { %v3857_v20 = vpop.f32.mrf.mxu1  ;;  %v1987_v22 = vpop.f32.mrf.mxu0 }
 0x24f   : > { %v3294_v6 = vpack.c.bf16 %v2661_v54, %v2661_v54  ;;  %v2609_v56 = vadd.f32 %v4626_v46, %v2549_v39  ;;  %v2085_v5 = vadd.f32 %v1987_v22, %v4526_v15  ;;  %v4874_v22 = vld [vmem:[#allocation6_spill] sm:$0xff] }
 0x250   : > { %v2457_v28 = vpop.f32.mrf.mxu1  ;;  %v3743_v55 = vpop.f32.mrf.mxu0 }
 0x251   : > { %2928 = vst.msk [vmem:[%s4638_s22 + $0x94] sm:$0xf] %vm2890_vm5, %v3294_v6  ;;  %v2662_v33 = vmax.f32 %v2609_v56, 0.0  ;;  %v2550_v31 = vadd.f32 %v2452_v53, %v2085_v5  ;;  %v4873_v53 = vld [vmem:[#allocation5_spill] sm:$0xff] }
 0x252   : > { %v3860_v38 = vpop.f32.mrf.mxu1  ;;  %v1992_v25 = vpop.f32.mrf.mxu0 }
 0x253   : > { %v3295_v43 = vpack.c.bf16 %v2662_v33, %v2662_v33  ;;  %v2610_v42 = vadd.f32 %v4626_v46, %v2550_v31  ;;  %v2086_v23 = vadd.f32 %v1992_v25, %v4532_v17 }
 0x254   : > { %v2460_v50 = vpop.f32.mrf.mxu1  ;;  %v3746_v35 = vpop.f32.mrf.mxu0 }
 0x255   : > { %2929 = vst.msk [vmem:[%s4638_s22 + $0x98] sm:$0xf] %vm2890_vm5, %v3295_v43  ;;  %v2663_v36 = vmax.f32 %v2610_v42, 0.0  ;;  %v2551_v15 = vadd.f32 %v2457_v28, %v2086_v23  ;;  %v4875_v43 = vld [vmem:[#allocation7_spill] sm:$0xff] }
 0x256   : > { %v3861_v34 = vpop.f32.mrf.mxu1  ;;  %v1995_v16 = vpop.f32.mrf.mxu0 }
 0x257   : > { %v3296_v19 = vpack.c.bf16 %v2663_v36, %v2663_v36  ;;  %v2611_v44 = vadd.f32 %v4626_v46, %v2551_v15  ;;  %v2087_v30 = vadd.f32 %v1995_v16, %v4870_v60 }
 0x258   : > { %v2465_v57 = vpop.f32.mrf.mxu1  ;;  %v3747_v61 = vpop.f32.mrf.mxu0 }
 0x259   : > { %2930 = vst.msk [vmem:[%s4638_s22 + $0x9c] sm:$0xf] %vm2890_vm5, %v3296_v19  ;;  %v2664_v48 = vmax.f32 %v2611_v44, 0.0  ;;  %v2552_v17 = vadd.f32 %v2460_v50, %v2087_v30  ;;  %v4876_v44 = vld [vmem:[#allocation8_spill] sm:$0xff] }
 0x25a   : > { %v3864_v45 = vpop.f32.mrf.mxu1  ;;  %v2000_v11 = vpop.f32.mrf.mxu0 }
 0x25b   : > { %v3297_v3 = vpack.c.bf16 %v2664_v48, %v2664_v48  ;;  %v2612_v12 = vadd.f32 %v4626_v46, %v2552_v17  ;;  %v2088_v0 = vadd.f32 %v2000_v11, %v4871_v52 }
 0x25c   : > { %v2468_v49 = vpop.f32.mrf.mxu1  ;;  %v3750_v18 = vpop.f32.mrf.mxu0 }
 0x25d   : > { %2931 = vst.msk [vmem:[%s4638_s22 + $0xa0] sm:$0xf] %vm2890_vm5, %v3297_v3  ;;  %v2665_v58 = vmax.f32 %v2612_v12, 0.0  ;;  %v2553_v27 = vadd.f32 %v2465_v57, %v2088_v0  ;;  %v4877_v12 = vld [vmem:[#allocation9_spill] sm:$0xff] }
 0x25e   : > { %v3865_v13 = vpop.f32.mrf.mxu1  ;;  %v2003_v62 = vpop.f32.mrf.mxu0 }
 0x25f   : > { %v3298_v10 = vpack.c.bf16 %v2665_v58, %v2665_v58  ;;  %v2613_v32 = vadd.f32 %v4626_v46, %v2553_v27  ;;  %v2089_v47 = vadd.f32 %v2003_v62, %v4872_v2 }
 0x260   : > { %v2473_v63 = vpop.f32.mrf.mxu1  ;;  %v3751_v59 = vpop.f32.mrf.mxu0 }
 0x261   : > { %2932 = vst.msk [vmem:[%s4638_s22 + $0xa4] sm:$0xf] %vm2890_vm5, %v3298_v10  ;;  %v2666_v29 = vmax.f32 %v2613_v32, 0.0  ;;  %v2554_v40 = vadd.f32 %v2468_v49, %v2089_v47  ;;  %v4878_v32 = vld [vmem:[#allocation10_spill] sm:$0xff] }
 0x262   : > { %v3868_v26 = vpop.f32.mrf.mxu1  ;;  %v2008_v14 = vpop.f32.mrf.mxu0 }
 0x263   : > { %v3299_v7 = vpack.c.bf16 %v2666_v29, %v2666_v29  ;;  %v2614_v41 = vadd.f32 %v4626_v46, %v2554_v40  ;;  %v2090_v37 = vadd.f32 %v2008_v14, %v4873_v53 }
 0x264   : > { %v2476_v8 = vpop.f32.mrf.mxu1  ;;  %v3754_v21 = vpop.f32.mrf.mxu0 }
 0x265   : > { %2933 = vst.msk [vmem:[%s4638_s22 + $0xa8] sm:$0xf] %vm2890_vm5, %v3299_v7  ;;  %v2667_v4 = vmax.f32 %v2614_v41, 0.0  ;;  %v2555_v20 = vadd.f32 %v2473_v63, %v2090_v37  ;;  %v4879_v41 = vld [vmem:[#allocation11_spill] sm:$0xff] }
 0x266   : > { %v3869_v51 = vpop.f32.mrf.mxu1  ;;  %v2011_v54 = vpop.f32.mrf.mxu0 }
 0x267   : > { %v3300_v39 = vpack.c.bf16 %v2667_v4, %v2667_v4  ;;  %v2615_v28 = vadd.f32 %v4626_v46, %v2555_v20  ;;  %v2091_v6 = vadd.f32 %v2011_v54, %v4874_v22 }
 0x268   : > { %v2481_v1 = vpop.f32.mrf.mxu1  ;;  %v3755_v5 = vpop.f32.mrf.mxu0 }
 0x269   : > { %2934 = vst.msk [vmem:[%s4638_s22 + $0xac] sm:$0xf] %vm2890_vm5, %v3300_v39  ;;  %v2668_v38 = vmax.f32 %v2615_v28, 0.0  ;;  %v2556_v55 = vadd.f32 %v2476_v8, %v2091_v6  ;;  %v3966_v39 = vld [vmem:[%s4858_s2] ss:$0 sm:$0xff] }
 0x26a   : > { %v3872_v56 = vpop.f32.mrf.mxu1  ;;  %v2016_v31 = vpop.f32.mrf.mxu0 }
 0x26b   : > { %v3301_v50 = vpack.c.bf16 %v2668_v38, %v2668_v38  ;;  %v2616_v25 = vadd.f32 %v4626_v46, %v2556_v55  ;;  %v2092_v42 = vadd.f32 %v2016_v31, %v4875_v43 }
 0x26c   : > { %v2484_v33 = vpop.f32.mrf.mxu1  ;;  %v3758_v34 = vpop.f32.mrf.mxu0 }
 0x26d   : > { %2935 = vst.msk [vmem:[%s4638_s22 + $0xb0] sm:$0xf] %vm2890_vm5, %v3301_v50  ;;  %v2669_v35 = vmax.f32 %v2616_v25, 0.0  ;;  %v2557_v36 = vadd.f32 %v2481_v1, %v2092_v42 }
 0x26e   : > { %v3873_v23 = vpop.f32.mrf.mxu1  ;;  %v2019_v57 = vpop.f32.mrf.mxu0 }
 0x26f   : > { %v3302_v16 = vpack.c.bf16 %v2669_v35, %v2669_v35  ;;  %v2617_v19 = vadd.f32 %v4626_v46, %v2557_v36  ;;  %v2093_v60 = vadd.f32 %v2019_v57, %v4876_v44 }
 0x270   : > { %v2489_v15 = vpop.f32.mrf.mxu1  ;;  %v3759_v45 = vpop.f32.mrf.mxu0 }
 0x271   : > { %2936 = vst.msk [vmem:[%s4638_s22 + $0xb4] sm:$0xf] %vm2890_vm5, %v3302_v16  ;;  %v2670_v61 = vmax.f32 %v2617_v19, 0.0  ;;  %v2558_v48 = vadd.f32 %v2484_v33, %v2093_v60 }
 0x272   : > { %v3876_v30 = vpop.f32.mrf.mxu1  ;;  %v2024_v49 = vpop.f32.mrf.mxu0 }
 0x273   : > { %v3303_v11 = vpack.c.bf16 %v2670_v61, %v2670_v61  ;;  %v2618_v3 = vadd.f32 %v4626_v46, %v2558_v48  ;;  %v2094_v52 = vadd.f32 %v2024_v49, %v4877_v12 }
 0x274   : > { %v2492_v17 = vpop.f32.mrf.mxu1  ;;  %v3762_v13 = vpop.f32.mrf.mxu0 }
 0x275   : > { %2937 = vst.msk [vmem:[%s4638_s22 + $0xb8] sm:$0xf] %vm2890_vm5, %v3303_v11  ;;  %v2671_v18 = vmax.f32 %v2618_v3, 0.0  ;;  %v2559_v58 = vadd.f32 %v2489_v15, %v2094_v52 }
 0x276   : > { %v3877_v0 = vpop.f32.mrf.mxu1  ;;  %v2027_v63 = vpop.f32.mrf.mxu0 }
 0x277   : > { %v3304_v62 = vpack.c.bf16 %v2671_v18, %v2671_v18  ;;  %v2619_v10 = vadd.f32 %v4626_v46, %v2559_v58  ;;  %v2095_v2 = vadd.f32 %v2027_v63, %v4878_v32 }
 0x278   : > { %v2497_v27 = vpop.f32.mrf.mxu1  ;;  %v3763_v26 = vpop.f32.mrf.mxu0 }
 0x279   : > { %2938 = vst.msk [vmem:[%s4638_s22 + $0xbc] sm:$0xf] %vm2890_vm5, %v3304_v62  ;;  %v2672_v59 = vmax.f32 %v2619_v10, 0.0  ;;  %v2560_v29 = vadd.f32 %v2492_v17, %v2095_v2 }
 0x27a   : > { %v3880_v47 = vpop.f32.mrf.mxu1  ;;  %v2032_v8 = vpop.f32.mrf.mxu0 }
 0x27b   : > { %v3305_v14 = vpack.c.bf16 %v2672_v59, %v2672_v59  ;;  %v2620_v7 = vadd.f32 %v4626_v46, %v2560_v29  ;;  %v2096_v53 = vadd.f32 %v2032_v8, %v4879_v41 }
 0x27c   : > { %v2500_v40 = vpop.f32.mrf.mxu1  ;;  %v3766_v51 = vpop.f32.mrf.mxu0 }
 0x27d   : > { %2939 = vst.msk [vmem:[%s4638_s22 + $0xc0] sm:$0xf] %vm2890_vm5, %v3305_v14  ;;  %v2673_v21 = vmax.f32 %v2620_v7, 0.0  ;;  %v2561_v4 = vadd.f32 %v2497_v27, %v2096_v53 }
 0x27e   : > { %v3881_v37 = vpop.f32.mrf.mxu1  ;;  %v2035_v1 = vpop.f32.mrf.mxu0 }
 0x27f   : > { %v3306_v54 = vpack.c.bf16 %v2673_v21, %v2673_v21  ;;  %v2621_v28 = vadd.f32 %v3966_v39, %v2561_v4  ;;  %v2097_v22 = vadd.f32 %v2035_v1, %v4604_v24 }
 0x280   : > { %v2505_v20 = vpop.f32.mrf.mxu1  ;;  %v3767_v6 = vpop.f32.mrf.mxu0 }
 0x281   : > { %2940 = vst.msk [vmem:[%s4638_s22 + $0xc4] sm:$0xf] %vm2890_vm5, %v3306_v54  ;;  %v2674_v56 = vmax.f32 %v2621_v28, 0.0  ;;  %v2562_v5 = vadd.f32 %v2500_v40, %v2097_v22 }
 0x282   : > { %v3884_v46 = vpop.f32.mrf.mxu1  ;;  %v2040_v55 = vpop.f32.mrf.mxu0 }
 0x283   : > { %v3307_v33 = vpack.c.bf16 %v2674_v56, %v2674_v56  ;;  %v2622_v31 = vadd.f32 %v3966_v39, %v2562_v5  ;;  %v2098_v50 = vadd.f32 %v2040_v55, %v4610_v9 }
 0x284   : > { %v2508_v38 = vpop.f32.mrf.mxu1  ;;  %v3770_v43 = vpop.f32.mrf.mxu0 }
 0x285   : > { %2941 = vst.msk [vmem:[%s4638_s22 + $0xc8] sm:$0xf] %vm2890_vm5, %v3307_v33  ;;  %v2675_v42 = vmax.f32 %v2622_v31, 0.0  ;;  %v2563_v24 = vadd.f32 %v2505_v20, %v2098_v50 }
 0x286   : > { %v3885_v25 = vpop.f32.mrf.mxu1  ;;  %v2043_v23 = vpop.f32.mrf.mxu0 }
 0x287   : > { %v3308_v34 = vpack.c.bf16 %v2675_v42, %v2675_v42  ;;  %v2623_v35 = vadd.f32 %v3966_v39, %v2563_v24 }
 0x288   : > { %v3771_v36 = vpop.f32.mrf.mxu0 }
 0x289   : > { %2942 = vst.msk [vmem:[%s4638_s22 + $0xcc] sm:$0xf] %vm2890_vm5, %v3308_v34  ;;  %v2676_v15 = vmax.f32 %v2623_v35, 0.0 }
 0x28b   : > { %v3309_v57 = vpack.c.bf16 %v2676_v15, %v2676_v15 }
 0x28d   : > { %2944 = vst.msk [vmem:[%s4638_s22 + $0xd0] sm:$0x3] %vm2943_vm6, %v3309_v57 }
 0x28e PF: > { %s13_s12 = sadd.s32 1, %s3973_s12  }
 0x28f   : > { %p10_p4 = scmp.ge.s32.totalorder %s13_s12, 4  }
 0x291   :  { %12 = sbr.rel (!%p10_p4) target bundleno = 1 (0x1), region = 65 }

// kernel: robot_control_forward.5
= control target key start
LH: loop header
LB: loop body
LE: loop exit
PB: predicated region body
PF: predicated region fallthrough
CT: control target
= control target key end

     0   :  { %s1537_s12 = smov 0   ;;  %s1771_s0 = inlined_call_operand.vmem [shape: bf16[2,101,128], index: 0, kind: input, shape index: {}]   ;;  %s1772_s1 = inlined_call_operand.vmem [shape: bf16[4,128,64], index: 1, kind: input, shape index: {}]   ;;  %s1773_s2 = inlined_call_operand.vmem [shape: f32[1,64], index: 2, kind: input, shape index: {}]   ;;  %s1774_s3 = inlined_call_operand.vmem [shape: bf16[2,90,64], index: 3, kind: output, shape index: {}]  }
   0x1 LB: > { %s1157_s13 = sadd.s32 4294967295, %s1515_s12   ;;  %p1161_p0 = scmp.ge.s32.totalorder %s1515_s12, 1  ;;  %s1515_s12 = sphi %s1537_s12, %s13_s12  }
   0x2   : > { %p137_p1 = scmp.lt.s32.totalorder %s1515_s12, 3 }
   0x4   : > { %p138_p2 = pnand %p1161_p0, %p137_p1 }
   0x5   : > { %p161_p3 = scmp.lt.s32.totalorder (!%p138_p2), %s1157_s13, 1 }
   0x6   : > { %141 = sbr.rel (%p138_p2) target bundleno = 302 (0x12e), region = 32 }
   0xb   : > { %v1463_v0 = vld [vmem:[%s1772_s1 + $0x78] sm:$0xff]   ;;  %v1465_v2 = vld [vmem:[%s1772_s1 + $0x70] sm:$0xff]   ;;  %v1467_v4 = vld [vmem:[%s1772_s1 + $0x68] sm:$0xff]   ;;  %s1776_s13 = smov (!%p161_p3, %s1157_s13), 1  ;;  %vm248_vm0 = vsmask.f32 7424 }
   0xc   : > { %v1464_v1 = vld [vmem:[%s1772_s1 + $0x38] sm:$0xff]   ;;  %1341 = vmatprep.subr.bf16.mxu0 %v1463_v0  ;;  %v1466_v3 = vld [vmem:[%s1772_s1 + $0x30] sm:$0xff]   ;;  %v1468_v5 = vld [vmem:[%s1772_s1 + $0x28] sm:$0xff]   ;;  %s1453_s30 = smul.u32 52, %s1776_s13  ;;  %vm628_vm1 = vcmask 1046528   ;;  %vm1088_vm3 = vcmask 519168  }
   0xd   : > { %1369 = vmatprep.subr.bf16.mxu1 %v1464_v1  ;;  %1342 = vmatpush3.bf16.msra.mxu0 %v1463_v0  ;;  %v1469_v6 = vld [vmem:[%s1772_s1 + $0x60] sm:$0xff]   ;;  %v1471_v8 = vld [vmem:[%s1772_s1 + $0x58] sm:$0xff]   ;;  %v1473_v10 = vld [vmem:[%s1772_s1 + $0x50] sm:$0xff]   ;;  %vm808_vm2 = vsmask.f32 6400  ;;  %s1454_s7 = smul.u32 48, %s1776_s13 }
   0xe   : > { %1370 = vmatpush3.bf16.msra.mxu1 %v1464_v1  ;;  %1343 = vmatprep.subr.bf16.mxu0 %v1465_v2  ;;  %v1470_v7 = vld [vmem:[%s1772_s1 + $0x20] sm:$0xff]   ;;  %v1472_v9 = vld [vmem:[%s1772_s1 + $0x18] sm:$0xff]   ;;  %s1584_s14 = scalar_lea.vmem %s1771_s0, %s1453_s30  ;;  %v1474_v11 = vld [vmem:[%s1772_s1 + $0x10] sm:$0xff]   ;;  %vm1100_vm4 = vcmask 516096  }
   0xf   : > { %1371 = vmatprep.subr.bf16.mxu1 %v1466_v3  ;;  %v1479_v12 = vld [vmem:[%s1584_s14] sm:$0xff]   ;;  %v1480_v13 = vld [vmem:[%s1584_s14 + $0x8] sm:$0xff]   ;;  %v1592_v14 = vld [vmem:[%s1584_s14 + $0x10] sm:$0xff]   ;;  %s1727_s13 = scalar_lea.vmem %s1774_s3, %s1454_s7 }
  0x10   : > { %v1475_v15 = vld [vmem:[%s1772_s1 + $0x48] sm:$0xff]   ;;  %v250_v16 = vshrl.u32 %v1479_v12, 16  ;;  %v252_v17 = vshll.u32 %v1479_v12, 16  ;;  %v257_v18 = vshll.u32 %v1480_v13, 16  ;;  %1385 = vmatprep.mubr.bf16.mxu1 %v1479_v12  ;;  %v261_v22 = vshrl.u32 %v1480_v13, 16  ;;  %v1477_v25 = vld [vmem:[%s1772_s1 + $0x40] sm:$0xff]  }
  0x11   : > { %1344 = vmatpush3.bf16.msra.mxu0 %v1465_v2  ;;  %v1476_v19 = vld [vmem:[%s1772_s1 + $0x8] sm:$0xff]   ;;  %v265_v23 = vshll.u32 %v1592_v14, 16  ;;  %v1478_v26 = vld [vmem:[%s1772_s1] sm:$0xff]   ;;  %v1488_v28 = vld [vmem:[%s1584_s14 + $0x18] sm:$0xff]   ;;  %v269_v29 = vshrl.u32 %v1592_v14, 16 }
  0x12   : > { %1372 = vmatpush3.bf16.msra.mxu1 %v1466_v3  ;;  %1345 = vmatprep.subr.bf16.mxu0 %v1467_v4  ;;  %v254_v20 = vrot.slane %v252_v17, 1  ;;  %v259_v21 = vrot.slane %v257_v18, 1  ;;  %v1611_v32 = vld [vmem:[%s1584_s14 + $0x20] sm:$0xff]   ;;  %v1482_v33 = vld [vmem:[%s1772_s1 + $0xb8] sm:$0xff]   ;;  %v273_v34 = vshll.u32 %v1488_v28, 16  ;;  %v277_v39 = vshrl.u32 %v1488_v28, 16 }
  0x13   : > { %1373 = vmatprep.subr.bf16.mxu1 %v1468_v5  ;;  %v267_v31 = vrot.slane %v265_v23, 1  ;;  %v1483_v35 = vld [vmem:[%s1772_s1 + $0xf8] sm:$0xff]   ;;  %v281_v40 = vshll.u32 %v1611_v32, 16  ;;  %v1484_v41 = vld [vmem:[%s1772_s1 + $0xb0] sm:$0xff]   ;;  %v1625_v42 = vld [vmem:[%s1584_s14 + $0x28] sm:$0xf] }
  0x14   : > { %v255_v24 = vor.u32 %v254_v20, %v250_v16  ;;  %v263_v30 = vor.u32 %v261_v22, %v259_v21  ;;  %v275_v37 = vrot.slane %v273_v34, 1  ;;  %v200_v43 = vld [vmem:[%s1584_s14 + $0x2c] sm:$0x3]  ;;  %v1485_v44 = vld [vmem:[%s1772_s1 + $0xf0] sm:$0xff]   ;;  %v285_v47 = vshrl.u32 %v1611_v32, 16  ;;  %v1490_v56 = vld [vmem:[%s1772_s1 + $0xa0] sm:$0xff]  }
  0x15   : > { %1346 = vmatpush3.bf16.msra.mxu0 %v1467_v4  ;;  %v271_v36 = vor.u32 %v269_v29, %v267_v31  ;;  %v1185_v45 = vcombine.low %v1625_v42, %v200_v43  ;;  %v283_v49 = vrot.slane %v281_v40, 1  ;;  %v1486_v51 = vld [vmem:[%s1772_s1 + $0xa8] sm:$0xff]   ;;  %v1491_v58 = vld [vmem:[%s1772_s1 + $0xe0] sm:$0xff]   ;;  %v1492_v0 = vld [vmem:[%s1772_s1 + $0x98] sm:$0xff]  }
  0x16   : > { %1374 = vmatpush3.bf16.msra.mxu1 %v1468_v5  ;;  %1347 = vmatprep.subr.bf16.mxu0 %v1469_v6  ;;  %v260_v27 = vsel %vm248_vm0, %v255_v24, %v259_v21  ;;  %v268_v38 = vsel %vm248_vm0, %v263_v30, %v267_v31  ;;  %v279_v48 = vor.u32 %v277_v39, %v275_v37  ;;  %v1487_v52 = vld [vmem:[%s1772_s1 + $0xe8] sm:$0xff]   ;;  %v1493_v1 = vld [vmem:[%s1772_s1 + $0xd8] sm:$0xff]   ;;  %v1497_v17 = vld [vmem:[%s1772_s1 + $0xd0] sm:$0xff]  }
  0x17   : > { %1375 = vmatprep.subr.bf16.mxu1 %v1470_v7  ;;  %1357 = vmatprep.mubr.bf16.mxu0 %v260_v27  ;;  %v276_v46 = vsel %vm248_vm0, %v271_v36, %v275_v37  ;;  %v289_v50 = vshll.u32 %v1185_v45, 16  ;;  %v287_v53 = vor.u32 %v285_v47, %v283_v49  ;;  %v1502_v57 = vld [vmem:[%s1584_s14 + $0x4] sm:$0xfe]   ;;  %v1650_v59 = vld [vmem:[%s1584_s14 + $0xc] sm:$0xff]   ;;  %v293_v61 = vshrl.u32 %v1185_v45, 16  ;;  %v1504_v16 = vld [vmem:[%s1584_s14 + $0x14] sm:$0xff]  }
  0x18   : > { %v284_v55 = vsel %vm248_vm0, %v279_v48, %v283_v49  ;;  %v810_v62 = vshrl.u32 %v1502_v57, 16  ;;  %v813_v63 = vshll.u32 %v1502_v57, 16  ;;  %v818_v2 = vshrl.u32 %v1650_v59, 16  ;;  %v183_v4 = vld [vmem:[%s1584_s14 + $0x2c] sm:$0x1]  ;;  %v1673_v18 = vld [vmem:[%s1584_s14 + $0x1c] sm:$0xff]  }
  0x19   : > { %1348 = vmatpush3.bf16.msra.mxu0 %v1469_v6  ;;  %v291_v54 = vrot.slane %v289_v50, 1  ;;  %v821_v3 = vshll.u32 %v1650_v59, 16  ;;  %v1194_v12 = vcombine.low %v1625_v42, %v183_v4  ;;  %v1498_v21 = vld [vmem:[%s1772_s1 + $0x88] sm:$0xff]   ;;  %v827_v22 = vshrl.u32 %v1504_v16, 16  ;;  %v1500_v29 = vld [vmem:[%s1772_s1 + $0x80] sm:$0xff]  }
  0x1a   : > { %1376 = vmatpush3.bf16.msra.mxu1 %v1470_v7  ;;  %1349 = vmatprep.subr.bf16.mxu0 %v1471_v8  ;;  %v812_v5 = vrot.slane %v810_v62, 1  ;;  %v815_v6 = vrot.slane %v813_v63, 2  ;;  %v820_v7 = vrot.slane %v818_v2, 1  ;;  %v830_v23 = vshll.u32 %v1504_v16, 16  ;;  %v1499_v24 = vld [vmem:[%s1772_s1 + $0xc8] sm:$0xff]  }
  0x1b   : > { %1377 = vmatprep.subr.bf16.mxu1 %v1472_v9  ;;  %v292_v60 = vsel %vm248_vm0, %v287_v53, %v291_v54  ;;  %v579_v27 = vld [vmem:[%s1584_s14 + $0x2c] sm:$0xf]  ;;  %v829_v30 = vrot.slane %v827_v22, 1  ;;  %v632_v37 = vrot.slane %v1504_v16, 1  ;;  %v580_v43 = vld [vmem:[%s1584_s14 + $0x30] sm:$0x3] }
  0x1c   : > { %v832_v31 = vrot.slane %v830_v23, 2 }
  0x1d   : > { %1350 = vmatpush3.bf16.msra.mxu0 %v1471_v8  ;;  %v823_v8 = vrot.slane %v821_v3, 2 }
  0x1e   : > { %1378 = vmatpush3.bf16.msra.mxu1 %v1472_v9  ;;  %1351 = vmatprep.subr.bf16.mxu0 %v1473_v10  ;;  %v295_v9 = vor.u32 %v293_v61, %v291_v54  ;;  %v833_v39 = vor.u32 %v832_v31, %v829_v30 }
  0x1f   : > { %1379 = vmatprep.subr.bf16.mxu1 %v1474_v11 }
  0x21   : > { %1352 = vmatpush3.bf16.msra.mxu0 %v1473_v10  ;;  %v629_v10 = vrot.slane %v1502_v57, 1 }
  0x22   : > { %1380 = vmatpush3.bf16.msra.mxu1 %v1474_v11  ;;  %1353 = vmatprep.subr.bf16.mxu0 %v1475_v15  ;;  %v630_v11 = vrot.slane %v1650_v59, 1 }
  0x23   : > { %1381 = vmatprep.subr.bf16.mxu1 %v1476_v19 }
  0x25   : > { %1354 = vmatpush3.bf16.msra.mxu0 %v1475_v15  ;;  %v1496_v15 = vld [vmem:[%s1772_s1 + $0x90] sm:$0xff]  }
  0x26   : > { %1382 = vmatpush3.bf16.msra.mxu1 %v1476_v19  ;;  %1355 = vmatprep.subr.bf16.mxu0 %v1477_v25  ;;  %v631_v19 = vsel %vm628_vm1, %v629_v10, %v630_v11 }
  0x27   : > { %1383 = vmatprep.subr.bf16.mxu1 %v1478_v26 }
  0x29   : > { %1356 = vmatpush3.bf16.msra.mxu0 %v1477_v25  ;;  %v836_v25 = vshrl.u32 %v1673_v18, 16 }
  0x2a   : > { %1384 = vmatpush3.bf16.msra.mxu1 %v1478_v26  ;;  %1397 = vmatprep.subr.bf16.mxu0 %v1482_v33  ;;  %v839_v26 = vshll.u32 %v1673_v18, 16 }
  0x2b   : > { %1425 = vmatprep.subr.bf16.mxu1 %v1483_v35  ;;  %v838_v34 = vrot.slane %v836_v25, 1 }
  0x2c   : > { %1358 = vmatmul.mubr.bf16.vlgmr.msra.gmra.mxu0 %v268_v38  ;;  %v634_v38 = vrot.slane %v1673_v18, 1 }
  0x2d   : > { %1386 = vmatmul.mubr.bf16.vlgmr.msra.gmra.mxu1 %v1480_v13  ;;  %1398 = vmatpush3.bf16.msra.mxu0 %v1482_v33  ;;  %v816_v13 = vor.u32 %v815_v6, %v812_v5  ;;  %v1501_v33 = vld [vmem:[%s1772_s1 + $0xc0] sm:$0xff]  }
  0x2e   : > { %1426 = vmatpush3.bf16.msra.mxu1 %v1483_v35  ;;  %1399 = vmatprep.subr.bf16.mxu0 %v1484_v41  ;;  %v841_v35 = vrot.slane %v839_v26, 2  ;;  %v635_v47 = vsel %vm628_vm1, %v632_v37, %v634_v38 }
  0x2f   : > { %1427 = vmatprep.subr.bf16.mxu1 %v1485_v44  ;;  %1361 = vmatprep.mubr.bf16.mxu0 %v276_v46  ;;  %v633_v46 = vsel %vm628_vm1, %v630_v11, %v632_v37 }
  0x30   : > { %1389 = vmatprep.mubr.bf16.mxu1 %v1592_v14  ;;  %v824_v14 = vor.u32 %v823_v8, %v820_v7  ;;  %v842_v42 = vor.u32 %v841_v35, %v838_v34 }
  0x31   : > { %1400 = vmatpush3.bf16.msra.mxu0 %v1484_v41 }
  0x32   : > { %1428 = vmatpush3.bf16.msra.mxu1 %v1485_v44  ;;  %1401 = vmatprep.subr.bf16.mxu0 %v1486_v51  ;;  %v825_v20 = vsel %vm808_vm2, %v816_v13, %v824_v14  ;;  %v834_v48 = vsel %vm808_vm2, %v824_v14, %v833_v39 }
  0x33   : > { %1429 = vmatprep.subr.bf16.mxu1 %v1487_v52 }
  0x34   : > { %1362 = vmatmul.mubr.bf16.gmra.mxu0 %v284_v55 }
  0x35   : > { %1402 = vmatpush3.bf16.msra.mxu0 %v1486_v51  ;;  %1390 = vmatmul.mubr.bf16.gmra.mxu1 %v1488_v28  ;;  %v787_v28 = vld [vmem:[%s1584_s14 + $0x30] sm:$0x7]  ;;  %v1224_v51 = vcombine.low %v579_v27, %v580_v43 }
  0x36   : > { %1430 = vmatpush3.bf16.msra.mxu1 %v1487_v52  ;;  %1403 = vmatprep.subr.bf16.mxu0 %v1490_v56  ;;  %v1249_v36 = vcombine.low %v579_v27, %v787_v28  ;;  %v843_v52 = vsel %vm808_vm2, %v833_v39, %v842_v42  ;;  %v1719_v28 = vld [vmem:[%s1773_s2] ss:$0 sm:$0xff] }
  0x37   : > { %1431 = vmatprep.subr.bf16.mxu1 %v1491_v58  ;;  %1365 = vmatprep.mubr.bf16.mxu0 %v292_v60  ;;  %v638_v57 = vrot.slane %v1224_v51, 1 }
  0x38   : > { %1393 = vmatprep.mubr.bf16.mxu1 %v1611_v32  ;;  %v1506_v32 = vld [vmem:[%s1584_s14 + $0x24] sm:$0xff]   ;;  %v854_v44 = vshrl.u32 %v1249_v36, 16  ;;  %v857_v45 = vshll.u32 %v1249_v36, 16 }
  0x39   : > { %1404 = vmatpush3.bf16.msra.mxu0 %v1490_v56  ;;  %v845_v40 = vshrl.u32 %v1506_v32, 16  ;;  %v848_v41 = vshll.u32 %v1506_v32, 16  ;;  %v636_v55 = vrot.slane %v1506_v32, 1 }
  0x3a   : > { %1432 = vmatpush3.bf16.msra.mxu1 %v1491_v58  ;;  %1405 = vmatprep.subr.bf16.mxu0 %v1492_v0  ;;  %v856_v53 = vrot.slane %v854_v44, 1  ;;  %v859_v54 = vrot.slane %v857_v45, 2 }
  0x3b   : > { %1433 = vmatprep.subr.bf16.mxu1 %v1493_v1  ;;  %v847_v49 = vrot.slane %v845_v40, 1  ;;  %v850_v50 = vrot.slane %v848_v41, 2  ;;  %v637_v59 = vsel %vm628_vm1, %v634_v38, %v636_v55  ;;  %v639_v61 = vsel %vm628_vm1, %v636_v55, %v638_v57 }
  0x3c   : > { %1366 = vmatmul.mubr.bf16.gmra.mxu0 %v295_v9  ;;  %v860_v58 = vor.u32 %v859_v54, %v856_v53 }
  0x3d   : > { %1406 = vmatpush3.bf16.msra.mxu0 %v1492_v0  ;;  %1394 = vmatmul.mubr.bf16.gmra.mxu1 %v1194_v12  ;;  %v851_v56 = vor.u32 %v850_v50, %v847_v49 }
  0x3e   : > { %1434 = vmatpush3.bf16.msra.mxu1 %v1493_v1  ;;  %1407 = vmatprep.subr.bf16.mxu0 %v1496_v15 }
  0x3f   : > { %1435 = vmatprep.subr.bf16.mxu1 %v1497_v17  ;;  %1413 = vmatprep.mubr.bf16.mxu0 %v631_v19  ;;  %v852_v60 = vsel %vm808_vm2, %v842_v42, %v851_v56  ;;  %v861_v62 = vsel %vm808_vm2, %v851_v56, %v860_v58 }
  0x40   : > { %1441 = vmatprep.mubr.bf16.mxu1 %v825_v20 }
  0x41   : > { %1408 = vmatpush3.bf16.msra.mxu0 %v1496_v15 }
  0x42   : > { %1436 = vmatpush3.bf16.msra.mxu1 %v1497_v17  ;;  %1409 = vmatprep.subr.bf16.mxu0 %v1498_v21 }
  0x43   : > { %1437 = vmatprep.subr.bf16.mxu1 %v1499_v24 }
  0x45   : > { %1410 = vmatpush3.bf16.msra.mxu0 %v1498_v21 }
  0x46   : > { %1438 = vmatpush3.bf16.msra.mxu1 %v1499_v24  ;;  %1411 = vmatprep.subr.bf16.mxu0 %v1500_v29 }
  0x47   : > { %1439 = vmatprep.subr.bf16.mxu1 %v1501_v33 }
  0x49   : > { %1412 = vmatpush3.bf16.msra.mxu0 %v1500_v29 }
  0x4a   : > { %1440 = vmatpush3.bf16.msra.mxu1 %v1501_v33 }
  0x4c   : > { %1414 = vmatmul.mubr.bf16.vlgmr.msra.gmra.mxu0 %v633_v46 }
  0x4d   : > { %1442 = vmatmul.mubr.bf16.vlgmr.msra.gmra.mxu1 %v834_v48  ;;  %1417 = vmatprep.mubr.bf16.mxu0 %v635_v47 }
  0x4e   : > { %1445 = vmatprep.mubr.bf16.mxu1 %v843_v52 }
  0x54   : > { %1418 = vmatmul.mubr.bf16.gmra.mxu0 %v637_v59 }
  0x55   : > { %1446 = vmatmul.mubr.bf16.gmra.mxu1 %v852_v60  ;;  %1421 = vmatprep.mubr.bf16.mxu0 %v639_v61 }
  0x56   : > { %1449 = vmatprep.mubr.bf16.mxu1 %v861_v62 }
  0x5c   : > { %1422 = vmatmul.mubr.bf16.gmra.mxu0 %v638_v57 }
  0x5d   : > { %1450 = vmatmul.mubr.bf16.gmra.mxu1 %v860_v58 }
  0xec   : > { %v1359_v63 = vpop.f32.mrf.mxu0 }
  0xed   : > { %v1387_v0 = vpop.f32.mrf.mxu1 }
  0xee   : > { %v384_v1 = vpop.f32.mrf.mxu0  ;;  %v531_v22 = vadd.f32 %v1387_v0, %v1359_v63 }
  0xef   : > { %v522_v2 = vpop.f32.mrf.mxu1 }
  0xf0   : > { %v1360_v3 = vpop.f32.mrf.mxu0  ;;  %v523_v25 = vadd.f32 %v522_v2, %v384_v1 }
  0xf1   : > { %v1388_v4 = vpop.f32.mrf.mxu1 }
  0xf2   : > { %v387_v5 = vpop.f32.mrf.mxu0  ;;  %v534_v30 = vadd.f32 %v1388_v4, %v1360_v3 }
  0xf3   : > { %v525_v6 = vpop.f32.mrf.mxu1 }
  0xf4   : > { %v1363_v7 = vpop.f32.mrf.mxu0  ;;  %v526_v35 = vadd.f32 %v525_v6, %v387_v5 }
  0xf5   : > { %v1391_v8 = vpop.f32.mrf.mxu1 }
  0xf6   : > { %v400_v9 = vpop.f32.mrf.mxu0  ;;  %v547_v46 = vadd.f32 %v1391_v8, %v1363_v7 }
  0xf7   : > { %v538_v10 = vpop.f32.mrf.mxu1 }
  0xf8   : > { %v1364_v11 = vpop.f32.mrf.mxu0  ;;  %v539_v47 = vadd.f32 %v538_v10, %v400_v9 }
  0xf9   : > { %v1392_v12 = vpop.f32.mrf.mxu1 }
  0xfa   : > { %v403_v13 = vpop.f32.mrf.mxu0  ;;  %v550_v54 = vadd.f32 %v1392_v12, %v1364_v11 }
  0xfb   : > { %v541_v14 = vpop.f32.mrf.mxu1 }
  0xfc   : > { %v1367_v15 = vpop.f32.mrf.mxu0  ;;  %v542_v62 = vadd.f32 %v541_v14, %v403_v13 }
  0xfd   : > { %v1395_v16 = vpop.f32.mrf.mxu1 }
  0xfe   : > { %v1704_v17 = vpop.f32.mrf.mxu0  ;;  %v563_v6 = vadd.f32 %v1395_v16, %v1367_v15 }
  0xff   : > { %v1706_v18 = vpop.f32.mrf.mxu1 }
 0x100   : > { %v1708_v19 = vpop.f32.mrf.mxu0 }
 0x101   : > { %v1710_v20 = vpop.f32.mrf.mxu1 }
 0x102   : > { %v1712_v21 = vpop.f32.mrf.mxu0 }
 0x103   : > { %v1714_v23 = vpop.f32.mrf.mxu1 }
 0x10c   : > { %v1415_v24 = vpop.f32.mrf.mxu0 }
 0x10d   : > { %v777_v26 = vadd.f32 %v1415_v24, %v531_v22  ;;  %v1443_v27 = vpop.f32.mrf.mxu1 }
 0x10e   : > { %v728_v29 = vpop.f32.mrf.mxu0 }
 0x10f   : > { %v999_v31 = vadd.f32 %v1443_v27, %v777_v26  ;;  %v775_v32 = vadd.f32 %v728_v29, %v523_v25  ;;  %v950_v33 = vpop.f32.mrf.mxu1  ;;  %v555_v27 = vadd.f32 %v1706_v18, %v1704_v17  ;;  %v566_v29 = vadd.f32 %v1710_v20, %v1708_v19 }
 0x110   : > { %v1416_v34 = vpop.f32.mrf.mxu0 }
 0x111   : > { %v1018_v36 = vadd.f32 %v1719_v28, %v999_v31  ;;  %v997_v37 = vadd.f32 %v950_v33, %v775_v32  ;;  %v778_v38 = vadd.f32 %v1416_v34, %v534_v30  ;;  %v1444_v39 = vpop.f32.mrf.mxu1 }
 0x112   : > { %v731_v40 = vpop.f32.mrf.mxu0 }
 0x113   : > { %v1030_v41 = vmax.f32 %v1018_v36, 0.0  ;;  %v1016_v42 = vadd.f32 %v1719_v28, %v997_v37  ;;  %v1000_v43 = vadd.f32 %v1444_v39, %v778_v38  ;;  %v776_v44 = vadd.f32 %v731_v40, %v526_v35  ;;  %v953_v45 = vpop.f32.mrf.mxu1 }
 0x114   : > { %v1419_v48 = vpop.f32.mrf.mxu0  ;;  %v558_v37 = vadd.f32 %v1714_v23, %v1712_v21 }
 0x115   : > { %v1275_v49 = vpack.c.bf16 %v1030_v41, %v1030_v41  ;;  %v1028_v50 = vmax.f32 %v1016_v42, 0.0  ;;  %v1019_v51 = vadd.f32 %v1719_v28, %v1000_v43  ;;  %v998_v52 = vadd.f32 %v953_v45, %v776_v44  ;;  %v1447_v53 = vpop.f32.mrf.mxu1 }
 0x116   : > { %v781_v55 = vadd.f32 %v1419_v48, %v547_v46  ;;  %v744_v56 = vpop.f32.mrf.mxu0 }
 0x117   : > { %1091 = vst.msk [vmem:[%s1727_s13 + $0x8] sm:$0xf] %vm1088_vm3, %v1275_v49  ;;  %v1273_v57 = vpack.c.bf16 %v1028_v50, %v1028_v50  ;;  %v1031_v58 = vmax.f32 %v1019_v51, 0.0  ;;  %v1017_v59 = vadd.f32 %v1719_v28, %v998_v52  ;;  %v779_v60 = vadd.f32 %v744_v56, %v539_v47  ;;  %v966_v61 = vpop.f32.mrf.mxu1 }
 0x118   : > { %v1003_v63 = vadd.f32 %v1447_v53, %v781_v55  ;;  %v1420_v0 = vpop.f32.mrf.mxu0 }
 0x119   : > { %1089 = vst.msk [vmem:[%s1727_s13] sm:$0xf] %vm1088_vm3, %v1273_v57  ;;  %v1276_v1 = vpack.c.bf16 %v1031_v58, %v1031_v58  ;;  %v1029_v2 = vmax.f32 %v1017_v59, 0.0  ;;  %v1001_v3 = vadd.f32 %v966_v61, %v779_v60  ;;  %v782_v4 = vadd.f32 %v1420_v0, %v550_v54  ;;  %v1448_v5 = vpop.f32.mrf.mxu1 }
 0x11a   : > { %v1022_v7 = vadd.f32 %v1719_v28, %v1003_v63  ;;  %v747_v8 = vpop.f32.mrf.mxu0 }
 0x11b   : > { %1092 = vst.msk [vmem:[%s1727_s13 + $0xc] sm:$0xf] %vm1088_vm3, %v1276_v1  ;;  %v1274_v9 = vpack.c.bf16 %v1029_v2, %v1029_v2  ;;  %v1020_v10 = vadd.f32 %v1719_v28, %v1001_v3  ;;  %v1004_v11 = vadd.f32 %v1448_v5, %v782_v4  ;;  %v780_v12 = vadd.f32 %v747_v8, %v542_v62  ;;  %v969_v13 = vpop.f32.mrf.mxu1 }
 0x11c   : > { %v1034_v14 = vmax.f32 %v1022_v7, 0.0  ;;  %v1423_v22 = vpop.f32.mrf.mxu0 }
 0x11d   : > { %1090 = vst.msk [vmem:[%s1727_s13 + $0x4] sm:$0xf] %vm1088_vm3, %v1274_v9  ;;  %v1032_v24 = vmax.f32 %v1020_v10, 0.0  ;;  %v1023_v25 = vadd.f32 %v1719_v28, %v1004_v11  ;;  %v1002_v15 = vadd.f32 %v969_v13, %v780_v12  ;;  %v785_v16 = vadd.f32 %v1423_v22, %v563_v6  ;;  %v1451_v26 = vpop.f32.mrf.mxu1 }
 0x11e   : > { %v1279_v30 = vpack.c.bf16 %v1034_v14, %v1034_v14  ;;  %v760_v31 = vpop.f32.mrf.mxu0 }
 0x11f   : > { %v1277_v32 = vpack.c.bf16 %v1032_v24, %v1032_v24  ;;  %v1035_v33 = vmax.f32 %v1023_v25, 0.0  ;;  %v1021_v34 = vadd.f32 %v1719_v28, %v1002_v15  ;;  %v1007_v35 = vadd.f32 %v1451_v26, %v785_v16  ;;  %v982_v36 = vpop.f32.mrf.mxu1 }
 0x120   : > { %1095 = vst.msk [vmem:[%s1727_s13 + $0x18] sm:$0xf] %vm1088_vm3, %v1279_v30  ;;  %v783_v38 = vadd.f32 %v760_v31, %v555_v27  ;;  %v1424_v39 = vpop.f32.mrf.mxu0 }
 0x121   : > { %1093 = vst.msk [vmem:[%s1727_s13 + $0x10] sm:$0xf] %vm1088_vm3, %v1277_v32  ;;  %v1280_v17 = vpack.c.bf16 %v1035_v33, %v1035_v33  ;;  %v1033_v18 = vmax.f32 %v1021_v34, 0.0  ;;  %v1026_v19 = vadd.f32 %v1719_v28, %v1007_v35  ;;  %v786_v20 = vadd.f32 %v1424_v39, %v566_v29  ;;  %v1452_v40 = vpop.f32.mrf.mxu1 }
 0x122   : > { %v1005_v41 = vadd.f32 %v982_v36, %v783_v38  ;;  %v763_v42 = vpop.f32.mrf.mxu0 }
 0x123   : > { %1096 = vst.msk [vmem:[%s1727_s13 + $0x1c] sm:$0xf] %vm1088_vm3, %v1280_v17  ;;  %v1278_v43 = vpack.c.bf16 %v1033_v18, %v1033_v18  ;;  %v1038_v21 = vmax.f32 %v1026_v19, 0.0  ;;  %v1008_v23 = vadd.f32 %v1452_v40, %v786_v20  ;;  %v784_v44 = vadd.f32 %v763_v42, %v558_v37  ;;  %v985_v46 = vpop.f32.mrf.mxu1 }
 0x124   : > { %v1024_v45 = vadd.f32 %v1719_v28, %v1005_v41 }
 0x125   : > { %1094 = vst.msk [vmem:[%s1727_s13 + $0x14] sm:$0xf] %vm1088_vm3, %v1278_v43  ;;  %v1283_v47 = vpack.c.bf16 %v1038_v21, %v1038_v21  ;;  %v1027_v48 = vadd.f32 %v1719_v28, %v1008_v23  ;;  %v1006_v49 = vadd.f32 %v985_v46, %v784_v44 }
 0x126   : > { %v1036_v50 = vmax.f32 %v1024_v45, 0.0 }
 0x127   : > { %1099 = vst.msk [vmem:[%s1727_s13 + $0x28] sm:$0xf] %vm1088_vm3, %v1283_v47  ;;  %v1039_v51 = vmax.f32 %v1027_v48, 0.0  ;;  %v1025_v52 = vadd.f32 %v1719_v28, %v1006_v49 }
 0x128   : > { %v1281_v53 = vpack.c.bf16 %v1036_v50, %v1036_v50 }
 0x129   : > { %v1284_v54 = vpack.c.bf16 %v1039_v51, %v1039_v51  ;;  %v1037_v55 = vmax.f32 %v1025_v52, 0.0 }
 0x12a   : > { %1097 = vst.msk [vmem:[%s1727_s13 + $0x20] sm:$0xf] %vm1088_vm3, %v1281_v53 }
 0x12b   : > { %1101 = vst.msk [vmem:[%s1727_s13 + $0x2c] sm:$0x1] %vm1100_vm4, %v1284_v54  ;;  %v1282_v56 = vpack.c.bf16 %v1037_v55, %v1037_v55 }
 0x12d   : > { %1098 = vst.msk [vmem:[%s1727_s13 + $0x24] sm:$0xf] %vm1088_vm3, %v1282_v56 }
 0x12e PF: > { %s13_s12 = sadd.s32 1, %s1515_s12  }
 0x12f   : > { %p10_p4 = scmp.ge.s32.totalorder %s13_s12, 4  }
 0x131   :  { %12 = sbr.rel (!%p10_p4) target bundleno = 1 (0x1), region = 65 }

// kernel: robot_control_forward.6
= control target key start
LH: loop header
LB: loop body
LE: loop exit
PB: predicated region body
PF: predicated region fallthrough
CT: control target
= control target key end

     0   :  { %s2178_s12 = smov 0   ;;  %s2461_s0 = inlined_call_operand.vmem [shape: bf16[2,83,64], index: 0, kind: input, shape index: {}]   ;;  %s2462_s1 = inlined_call_operand.vmem [shape: bf16[9,64,64], index: 1, kind: input, shape index: {}]   ;;  %s2463_s2 = inlined_call_operand.vmem [shape: f32[1,64], index: 2, kind: input, shape index: {}]   ;;  %s2464_s3 = inlined_call_operand.vmem [shape: bf16[2,63,64], index: 3, kind: output, shape index: {}]  }
   0x1 LB: > { %s1667_s13 = sadd.s32 4294967295, %s2156_s12   ;;  %p1671_p0 = scmp.ge.s32.totalorder %s2156_s12, 1  ;;  %s2156_s12 = sphi %s2178_s12, %s13_s12  }
   0x2   : > { %p137_p1 = scmp.lt.s32.totalorder %s2156_s12, 3 }
   0x4   : > { %p138_p2 = pnand %p1671_p0, %p137_p1 }
   0x6   : > { %141 = sbr.rel (%p138_p2) target bundleno = 301 (0x12d), region = 32 }
   0xb   : > { %v2089_v0 = vld [vmem:[%s2462_s1 + $0x38] sm:$0xff]   ;;  %p161_p3 = scmp.lt.s32.totalorder %s1667_s13, 1  ;;  %v2091_v2 = vld [vmem:[%s2462_s1 + $0x30] sm:$0xff]   ;;  %v2093_v4 = vld [vmem:[%s2462_s1 + $0x28] sm:$0xff]   ;;  %vm273_vm0 = vcmask 523264   ;;  %vm489_vm2 = vcmask 1046528  }
   0xc   : > { %v2090_v1 = vld [vmem:[%s2462_s1 + $0x18] sm:$0xff]   ;;  %1928 = vmatprep.subr.bf16.mxu0 %v2089_v0  ;;  %v2092_v3 = vld [vmem:[%s2462_s1 + $0x10] sm:$0xff]   ;;  %v2094_v5 = vld [vmem:[%s2462_s1 + $0x8] sm:$0xff]   ;;  %vm217_vm1 = vsmask.f32 7424  ;;  %vm1424_vm4 = vcmask 1045504  }
   0xd   : > { %s2470_s13 = smov (!%p161_p3, %s1667_s13), 1  ;;  %1944 = vmatprep.subr.bf16.mxu1 %v2090_v1  ;;  %1929 = vmatpush3.bf16.msra.mxu0 %v2089_v0  ;;  %v2095_v6 = vld [vmem:[%s2462_s1 + $0x20] sm:$0xff]   ;;  %v2100_v16 = vld [vmem:[%s2462_s1 + $0x58] sm:$0xff]   ;;  %v2102_v23 = vld [vmem:[%s2462_s1 + $0x50] sm:$0xff]   ;;  %vm932_vm3 = vsmask.f32 6400 }
   0xe   : > { %1945 = vmatpush3.bf16.msra.mxu1 %v2090_v1  ;;  %1930 = vmatprep.subr.bf16.mxu0 %v2091_v2  ;;  %s2080_s24 = smul.u32 44, %s2470_s13  ;;  %v2096_v7 = vld [vmem:[%s2462_s1] sm:$0xff]   ;;  %v2101_v19 = vld [vmem:[%s2462_s1 + $0x78] sm:$0xff]   ;;  %v2103_v28 = vld [vmem:[%s2462_s1 + $0x70] sm:$0xff]   ;;  %s1847_s18 = sshll.u32 %s2470_s13, 5  ;;  %vm1598_vm5 = vcmask 519168  }
   0xf   : > { %1946 = vmatprep.subr.bf16.mxu1 %v2092_v3  ;;  %v2105_v32 = vld [vmem:[%s2462_s1 + $0x48] sm:$0xff]   ;;  %v2107_v52 = vld [vmem:[%s2462_s1 + $0x40] sm:$0xff]   ;;  %vm1607_vm6 = vsmask.f32 3328  ;;  %s2438_s13 = scalar_lea.vmem %s2464_s3, %s1847_s18 }
  0x10   : > { %s2213_s4 = scalar_lea.vmem %s2461_s0, %s2080_s24  ;;  %v2106_v34 = vld [vmem:[%s2462_s1 + $0x68] sm:$0xff]   ;;  %v2108_v53 = vld [vmem:[%s2462_s1 + $0x60] sm:$0xff]   ;;  %vm1608_vm7 = vmand %vm1598_vm5, %vm1607_vm6 }
  0x11   : > { %1931 = vmatpush3.bf16.msra.mxu0 %v2091_v2  ;;  %v2097_v8 = vld [vmem:[%s2213_s4] sm:$0xff]   ;;  %v2098_v9 = vld [vmem:[%s2213_s4 + $0x8] sm:$0xff]   ;;  %v2099_v10 = vld [vmem:[%s2213_s4 + $0x10] sm:$0xff]  }
  0x12   : > { %1947 = vmatpush3.bf16.msra.mxu1 %v2092_v3  ;;  %1932 = vmatprep.subr.bf16.mxu0 %v2093_v4  ;;  %v219_v11 = vshrl.u32 %v2097_v8, 16  ;;  %v221_v12 = vshll.u32 %v2097_v8, 16  ;;  %v226_v13 = vshll.u32 %v2098_v9, 16  ;;  %v230_v14 = vshrl.u32 %v2098_v9, 16  ;;  %v2104_v24 = vld [vmem:[%s2213_s4 + $0x18] sm:$0xff]  }
  0x13   : > { %1948 = vmatprep.subr.bf16.mxu1 %v2094_v5  ;;  %1952 = vmatprep.mubr.msk.bf16.mxu1 %vm273_vm0, %v2097_v8  ;;  %v234_v15 = vshll.u32 %v2099_v10, 16  ;;  %v238_v25 = vshrl.u32 %v2099_v10, 16  ;;  %v242_v30 = vshll.u32 %v2104_v24, 16  ;;  %v246_v31 = vshrl.u32 %v2104_v24, 16  ;;  %v448_v35 = vld [vmem:[%s2213_s4] sm:$0xe] }
  0x14   : > { %v223_v17 = vrot.slane %v221_v12, 1  ;;  %v228_v18 = vrot.slane %v226_v13, 1  ;;  %v449_v36 = vld [vmem:[%s2213_s4 + $0x4] sm:$0xf]  ;;  %v450_v37 = vld [vmem:[%s2213_s4 + $0x8] sm:$0xf] }
  0x15   : > { %1933 = vmatpush3.bf16.msra.mxu0 %v2093_v4  ;;  %v236_v20 = vrot.slane %v234_v15, 1  ;;  %v244_v33 = vrot.slane %v242_v30, 1  ;;  %v451_v38 = vld [vmem:[%s2213_s4 + $0xc] sm:$0xf]  ;;  %v1711_v41 = vcombine.low %v448_v35, %v449_v36  ;;  %v452_v43 = vld [vmem:[%s2213_s4 + $0x10] sm:$0xf]  ;;  %v1732_v46 = vcombine.low %v449_v36, %v450_v37 }
  0x16   : > { %1949 = vmatpush3.bf16.msra.mxu1 %v2094_v5  ;;  %1934 = vmatprep.subr.bf16.mxu0 %v2095_v6  ;;  %v224_v21 = vor.u32 %v223_v17, %v219_v11  ;;  %v232_v22 = vor.u32 %v230_v14, %v228_v18  ;;  %v1712_v42 = vcombine.low %v450_v37, %v451_v38  ;;  %v453_v44 = vld [vmem:[%s2213_s4 + $0x14] sm:$0xf]  ;;  %v454_v45 = vld [vmem:[%s2213_s4 + $0x18] sm:$0xf]  ;;  %v455_v0 = vld [vmem:[%s2213_s4 + $0x1c] sm:$0xf] }
  0x17   : > { %1950 = vmatprep.subr.bf16.mxu1 %v2096_v7  ;;  %v240_v29 = vor.u32 %v238_v25, %v236_v20  ;;  %v248_v40 = vor.u32 %v246_v31, %v244_v33  ;;  %v1713_v47 = vcombine.low %v452_v43, %v453_v44  ;;  %v1733_v48 = vcombine.low %v451_v38, %v452_v43  ;;  %v608_v1 = vld [vmem:[%s2213_s4 + $0x20] sm:$0xf]  ;;  %v2115_v4 = vld [vmem:[%s2462_s1 + $0x98] sm:$0xff]   ;;  %v2117_v14 = vld [vmem:[%s2462_s1 + $0x90] sm:$0xff]  }
  0x18   : > { %v229_v26 = vsel %vm217_vm1, %v224_v21, %v228_v18  ;;  %v237_v27 = vsel %vm217_vm1, %v232_v22, %v236_v20  ;;  %v1734_v49 = vcombine.low %v453_v44, %v454_v45  ;;  %v490_v50 = vrot.slane %v1711_v41, 1  ;;  %v2118_v15 = vld [vmem:[%s2462_s1 + $0xb0] sm:$0xff]   ;;  %v2126_v21 = vld [vmem:[%s2213_s4 + $0x4] sm:$0xfe]  }
  0x19   : > { %1935 = vmatpush3.bf16.msra.mxu0 %v2095_v6  ;;  %1936 = vmatprep.mubr.msk.bf16.mxu0 %vm273_vm0, %v229_v26  ;;  %v245_v39 = vsel %vm217_vm1, %v240_v29, %v244_v33  ;;  %v491_v51 = vrot.slane %v1712_v42, 1  ;;  %v625_v54 = vshrl.u32 %v1732_v46, 16  ;;  %v627_v55 = vshll.u32 %v1732_v46, 16  ;;  %v2292_v25 = vld [vmem:[%s2213_s4 + $0x14] sm:$0xff]   ;;  %v2124_v35 = vld [vmem:[%s2462_s1 + $0x80] sm:$0xff]  }
  0x1a   : > { %1951 = vmatpush3.bf16.msra.mxu1 %v2096_v7  ;;  %1960 = vmatprep.subr.bf16.mxu0 %v2100_v16  ;;  %v632_v56 = vshll.u32 %v1733_v48, 16  ;;  %v636_v57 = vshrl.u32 %v1733_v48, 16  ;;  %v493_v58 = vrot.slane %v1713_v47, 1  ;;  %v640_v59 = vshll.u32 %v1734_v49, 16  ;;  %v2116_v7 = vld [vmem:[%s2462_s1 + $0xb8] sm:$0xff]   ;;  %v2125_v36 = vld [vmem:[%s2462_s1 + $0xa0] sm:$0xff]  }
  0x1b   : > { %1976 = vmatprep.subr.bf16.mxu1 %v2101_v19  ;;  %v492_v60 = vsel %vm489_vm2, %v490_v50, %v491_v51  ;;  %v629_v61 = vrot.slane %v627_v55, 1  ;;  %v1714_v5 = vcombine.low %v454_v45, %v455_v0  ;;  %v644_v6 = vshrl.u32 %v1734_v49, 16  ;;  %v2129_v50 = vld [vmem:[%s2462_s1 + $0xd8] sm:$0xff]  }
  0x1c   : > { %1937 = vmatmul.mubr.msk.bf16.vlgmr.msra.gmra.mxu0 %vm273_vm0, %v237_v27  ;;  %v634_v62 = vrot.slane %v632_v56, 1  ;;  %v642_v63 = vrot.slane %v640_v59, 1  ;;  %v1735_v8 = vcombine.low %v455_v0, %v608_v1  ;;  %v494_v11 = vsel %vm489_vm2, %v491_v51, %v493_v58  ;;  %v2122_v27 = vld [vmem:[%s2462_s1 + $0x88] sm:$0xff]   ;;  %v2130_v55 = vld [vmem:[%s2462_s1 + $0xf8] sm:$0xff]   ;;  %v2132_v59 = vld [vmem:[%s2462_s1 + $0xf0] sm:$0xff]  }
  0x1d   : > { %1953 = vmatmul.mubr.msk.bf16.vlgmr.msra.gmra.mxu1 %vm273_vm0, %v2098_v9  ;;  %1961 = vmatpush3.bf16.msra.mxu0 %v2100_v16  ;;  %v630_v2 = vor.u32 %v629_v61, %v625_v54  ;;  %v2121_v9 = vld [vmem:[%s2213_s4 + $0x20] ss:$0 sps:$4 sm:$0x11]   ;;  %v495_v12 = vrot.slane %v1714_v5, 1  ;;  %v934_v29 = vshrl.u32 %v2126_v21, 16  ;;  %v937_v30 = vshll.u32 %v2126_v21, 16 }
  0x1e   : > { %1977 = vmatpush3.bf16.msra.mxu1 %v2101_v19  ;;  %1962 = vmatprep.subr.bf16.mxu0 %v2102_v23  ;;  %v638_v3 = vor.u32 %v636_v57, %v634_v62  ;;  %v646_v16 = vor.u32 %v644_v6, %v642_v63  ;;  %v648_v17 = vshll.u32 %v1735_v8, 16  ;;  %v652_v18 = vshrl.u32 %v1735_v8, 16  ;;  %v2134_v54 = vld [vmem:[%s2213_s4 + $0x24] ss:$0 sps:$4 sm:$0x11]  }
  0x1f   : > { %1978 = vmatprep.subr.bf16.mxu1 %v2103_v28  ;;  %1956 = vmatprep.mubr.msk.bf16.mxu1 %vm273_vm0, %v2099_v10  ;;  %v635_v10 = vsel %vm217_vm1, %v630_v2, %v634_v62  ;;  %v496_v20 = vsel %vm489_vm2, %v493_v58, %v495_v12  ;;  %v805_v31 = vrot.slane %v2126_v21, 1  ;;  %v936_v37 = vrot.slane %v934_v29, 1  ;;  %v2131_v58 = vld [vmem:[%s2462_s1 + $0xd0] sm:$0xff]   ;;  %v2336_v8 = vld [vmem:[%s2213_s4 + $0xc] sm:$0xf] }
  0x20   : > { %1940 = vmatprep.mubr.msk.bf16.mxu0 %vm273_vm0, %v245_v39  ;;  %v643_v13 = vsel %vm217_vm1, %v638_v3, %v642_v63  ;;  %v650_v19 = vrot.slane %v648_v17, 1  ;;  %v939_v38 = vrot.slane %v937_v30, 2  ;;  %v951_v39 = vshrl.u32 %v2292_v25, 16  ;;  %v2136_v17 = vld [vmem:[%s2462_s1 + $0xe8] sm:$0xff]  }
  0x21   : > { %1963 = vmatpush3.bf16.msra.mxu0 %v2102_v23  ;;  %v497_v23 = vrot.slane %v2121_v9, 1  ;;  %v808_v49 = vrot.slane %v2292_v25, 1  ;;  %v812_v61 = vrot.slane %v2134_v54, 1  ;;  %v969_v62 = vshrl.u32 %v2134_v54, 16 }
  0x22   : > { %1979 = vmatpush3.bf16.msra.mxu1 %v2103_v28  ;;  %1964 = vmatprep.subr.bf16.mxu0 %v2105_v32  ;;  %v651_v22 = vsel %vm217_vm1, %v646_v16, %v650_v19  ;;  %v654_v26 = vor.u32 %v652_v18, %v650_v19  ;;  %v2123_v28 = vld [vmem:[%s2462_s1 + $0xa8] sm:$0xff]   ;;  %v940_v44 = vor.u32 %v939_v38, %v936_v37  ;;  %v953_v45 = vrot.slane %v951_v39, 1 }
  0x23   : > { %1980 = vmatprep.subr.bf16.mxu1 %v2106_v34  ;;  %v498_v41 = vsel %vm489_vm2, %v495_v12, %v497_v23  ;;  %v972_v63 = vshll.u32 %v2134_v54, 16  ;;  %v2135_v16 = vld [vmem:[%s2462_s1 + $0xc8] sm:$0xff]   ;;  %v2137_v23 = vld [vmem:[%s2462_s1 + $0xc0] sm:$0xff]  }
  0x24   : > { %1941 = vmatmul.mubr.msk.bf16.gmra.mxu0 %vm273_vm0, %v248_v40  ;;  %v954_v40 = vshll.u32 %v2292_v25, 16 }
  0x25   : > { %1957 = vmatmul.mubr.msk.bf16.gmra.mxu1 %vm273_vm0, %v2104_v24  ;;  %1965 = vmatpush3.bf16.msra.mxu0 %v2105_v32  ;;  %v2127_v24 = vld [vmem:[%s2213_s4 + $0xc] sm:$0xff]   ;;  %v974_v5 = vrot.slane %v972_v63, 2 }
  0x26   : > { %1981 = vmatpush3.bf16.msra.mxu1 %v2106_v34  ;;  %1966 = vmatprep.subr.bf16.mxu0 %v2107_v52  ;;  %v806_v32 = vrot.slane %v2127_v24, 1  ;;  %v942_v33 = vshrl.u32 %v2127_v24, 16  ;;  %v945_v34 = vshll.u32 %v2127_v24, 16  ;;  %v956_v46 = vrot.slane %v954_v40, 2  ;;  %v2138_v24 = vld [vmem:[%s2462_s1 + $0xe0] sm:$0xff]   ;;  %v2146_v63 = vld [vmem:[%s2462_s1 + $0x108] sm:$0xff]  }
  0x27   : > { %1982 = vmatprep.subr.bf16.mxu1 %v2108_v53  ;;  %1968 = vmatprep.mubr.msk.bf16.mxu0 %vm273_vm0, %v492_v60 }
  0x28   : > { %1984 = vmatprep.mubr.msk.bf16.mxu1 %vm273_vm0, %v635_v10  ;;  %v944_v42 = vrot.slane %v942_v33, 1  ;;  %v947_v43 = vrot.slane %v945_v34, 2  ;;  %v807_v48 = vsel %vm489_vm2, %v805_v31, %v806_v32  ;;  %v809_v0 = vsel %vm489_vm2, %v806_v32, %v808_v49  ;;  %v2371_v33 = vld [vmem:[%s2213_s4 + $0x20] sm:$0xff]  }
  0x29   : > { %1967 = vmatpush3.bf16.msra.mxu0 %v2107_v52  ;;  %v957_v52 = vor.u32 %v956_v46, %v953_v45  ;;  %v1281_v38 = vshrl.u32 %v2371_v33, 16  ;;  %v1284_v40 = vshll.u32 %v2371_v33, 16  ;;  %v2142_v46 = vld [vmem:[%s2462_s1 + $0x118] sm:$0xff]  }
  0x2a   : > { %1983 = vmatpush3.bf16.msra.mxu1 %v2108_v53  ;;  %1992 = vmatprep.subr.bf16.mxu0 %v2115_v4  ;;  %v948_v47 = vor.u32 %v947_v43, %v944_v42  ;;  %v2133_v53 = vld [vmem:[%s2213_s4 + $0x1c] sm:$0xff]  }
  0x2b   : > { %2008 = vmatprep.subr.bf16.mxu1 %v2116_v7  ;;  %v960_v56 = vshrl.u32 %v2133_v53, 16  ;;  %v963_v57 = vshll.u32 %v2133_v53, 16  ;;  %v810_v60 = vrot.slane %v2133_v53, 1  ;;  %v1283_v45 = vrot.slane %v1281_v38, 1 }
  0x2c   : > { %1969 = vmatmul.mubr.msk.bf16.vlgmr.msra.gmra.mxu0 %vm273_vm0, %v494_v11  ;;  %v949_v51 = vsel %vm932_vm3, %v940_v44, %v948_v47  ;;  %v958_v1 = vsel %vm932_vm3, %v948_v47, %v957_v52  ;;  %v2343_v11 = vld [vmem:[%s2213_s4 + $0x10] sm:$0xff]   ;;  %v1286_v47 = vrot.slane %v1284_v40, 2 }
  0x2d   : > { %1985 = vmatmul.mubr.msk.bf16.vlgmr.msra.gmra.mxu1 %vm273_vm0, %v643_v13  ;;  %1993 = vmatpush3.bf16.msra.mxu0 %v2115_v4  ;;  %v962_v2 = vrot.slane %v960_v56, 1  ;;  %v965_v3 = vrot.slane %v963_v57, 2  ;;  %v971_v4 = vrot.slane %v969_v62, 1  ;;  %v811_v9 = vsel %vm489_vm2, %v808_v49, %v810_v60  ;;  %v1407_v56 = vld [vmem:[%s2213_s4 + $0x8] sm:$0xc]  ;;  %v2143_v57 = vld [vmem:[%s2462_s1 + $0x110] sm:$0xff]  }
  0x2e   : > { %2009 = vmatpush3.bf16.msra.mxu1 %v2116_v7  ;;  %1994 = vmatprep.subr.bf16.mxu0 %v2117_v14  ;;  %v1086_v7 = vld [vmem:[%s2213_s4 + $0x8] sm:$0xe]  ;;  %v1263_v21 = vshrl.u32 %v2343_v11, 16  ;;  %v1128_v25 = vrot.slane %v2343_v11, 1 }
  0x2f   : > { %2010 = vmatprep.subr.bf16.mxu1 %v2118_v15  ;;  %1972 = vmatprep.mubr.msk.bf16.mxu0 %vm273_vm0, %v496_v20  ;;  %v966_v6 = vor.u32 %v965_v3, %v962_v2  ;;  %v1789_v10 = vcombine.low %v1086_v7, %v2336_v8  ;;  %v975_v13 = vor.u32 %v974_v5, %v971_v4  ;;  %v1430_v3 = vrot.slane %v2371_v33, 2  ;;  %v2147_v7 = vld [vmem:[%s2462_s1 + $0x100] sm:$0xff]  }
  0x30   : > { %1988 = vmatprep.mubr.msk.bf16.mxu1 %vm273_vm0, %v651_v22  ;;  %v1266_v22 = vshll.u32 %v2343_v11, 16  ;;  %v1265_v31 = vrot.slane %v1263_v21, 1 }
  0x31   : > { %1995 = vmatpush3.bf16.msra.mxu0 %v2117_v14  ;;  %v967_v12 = vsel %vm932_vm3, %v957_v52, %v966_v6  ;;  %v2347_v14 = vld [vmem:[%s2213_s4 + $0x18] sm:$0xff]   ;;  %v1255_v18 = vshrl.u32 %v1789_v10, 16  ;;  %v1127_v19 = vrot.slane %v1789_v10, 1  ;;  %v1258_v20 = vshll.u32 %v1789_v10, 16 }
  0x32   : > { %2011 = vmatpush3.bf16.msra.mxu1 %v2118_v15  ;;  %1996 = vmatprep.subr.bf16.mxu0 %v2122_v27  ;;  %v813_v15 = vsel %vm489_vm2, %v810_v60, %v812_v61  ;;  %v976_v29 = vsel %vm932_vm3, %v966_v6, %v975_v13  ;;  %v1268_v32 = vrot.slane %v1266_v22, 2  ;;  %v1130_v43 = vrot.slane %v2347_v14, 1  ;;  %v2149_v6 = vld [vmem:[%s2213_s4 + $0x28] ss:$0 sps:$4 sm:$0x33]  }
  0x33   : > { %2012 = vmatprep.subr.bf16.mxu1 %v2123_v28  ;;  %v1260_v30 = vrot.slane %v1258_v20, 2  ;;  %v1129_v39 = vsel %vm489_vm2, %v1127_v19, %v1128_v25  ;;  %v1826_v60 = vcombine.low %v1407_v56, %v2336_v8  ;;  %v1428_v2 = vrot.slane %v2347_v14, 2 }
  0x34   : > { %1973 = vmatmul.mubr.msk.bf16.gmra.mxu0 %vm273_vm0, %v498_v41  ;;  %v1269_v37 = vor.u32 %v1268_v32, %v1265_v31  ;;  %v2145_v41 = vld [vmem:[%s2213_s4 + $0x28] ss:$0 sps:$4 sm:$0x11]   ;;  %v1131_v52 = vsel %vm489_vm2, %v1128_v25, %v1130_v43  ;;  %v1432_v10 = vrot.slane %v2149_v6, 2 }
  0x35   : > { %1989 = vmatmul.mubr.msk.bf16.gmra.mxu1 %vm273_vm0, %v654_v26  ;;  %1997 = vmatpush3.bf16.msra.mxu0 %v2122_v27  ;;  %v1257_v26 = vrot.slane %v1255_v18, 1  ;;  %v1272_v27 = vshrl.u32 %v2347_v14, 16  ;;  %v1293_v49 = vshll.u32 %v2145_v41, 16  ;;  %v1134_v61 = vrot.slane %v2145_v41, 1 }
  0x36   : > { %2013 = vmatpush3.bf16.msra.mxu1 %v2123_v28  ;;  %1998 = vmatprep.subr.bf16.mxu0 %v2124_v35  ;;  %v1275_v28 = vshll.u32 %v2347_v14, 16 }
  0x37   : > { %2014 = vmatprep.subr.bf16.mxu1 %v2125_v36  ;;  %2000 = vmatprep.mubr.msk.bf16.mxu0 %vm273_vm0, %v807_v48  ;;  %v1274_v34 = vrot.slane %v1272_v27, 1  ;;  %v1290_v48 = vshrl.u32 %v2145_v41, 16 }
  0x38   : > { %2016 = vmatprep.mubr.msk.bf16.mxu1 %vm273_vm0, %v949_v51  ;;  %v1287_v51 = vor.u32 %v1286_v47, %v1283_v45 }
  0x39   : > { %1999 = vmatpush3.bf16.msra.mxu0 %v2124_v35  ;;  %v1277_v35 = vrot.slane %v1275_v28, 2  ;;  %v1292_v54 = vrot.slane %v1290_v48, 1 }
  0x3a   : > { %2015 = vmatpush3.bf16.msra.mxu1 %v2125_v36  ;;  %2024 = vmatprep.subr.bf16.mxu0 %v2129_v50  ;;  %v1261_v36 = vor.u32 %v1260_v30, %v1257_v26 }
  0x3b   : > { %2040 = vmatprep.subr.bf16.mxu1 %v2130_v55  ;;  %v1278_v44 = vor.u32 %v1277_v35, %v1274_v34 }
  0x3c   : > { %2001 = vmatmul.mubr.msk.bf16.vlgmr.msra.gmra.mxu0 %vm273_vm0, %v809_v0  ;;  %v1270_v42 = vsel %vm932_vm3, %v1261_v36, %v1269_v37  ;;  %v1425_v0 = vrot.slane %v1826_v60, 2 }
  0x3d   : > { %2017 = vmatmul.mubr.msk.bf16.vlgmr.msra.gmra.mxu1 %vm273_vm0, %v958_v1  ;;  %2025 = vmatpush3.bf16.msra.mxu0 %v2129_v50  ;;  %v1132_v50 = vrot.slane %v2371_v33, 1  ;;  %v1279_v53 = vsel %vm932_vm3, %v1269_v37, %v1278_v44  ;;  %v1426_v1 = vrot.slane %v2343_v11, 2 }
  0x3e   : > { %2041 = vmatpush3.bf16.msra.mxu1 %v2130_v55  ;;  %2026 = vmatprep.subr.bf16.mxu0 %v2131_v58  ;;  %v1295_v55 = vrot.slane %v1293_v49, 2 }
  0x3f   : > { %2042 = vmatprep.subr.bf16.mxu1 %v2132_v59  ;;  %2004 = vmatprep.mubr.msk.bf16.mxu0 %vm273_vm0, %v811_v9  ;;  %v1135_v4 = vsel %vm489_vm2, %v1132_v50, %v1134_v61  ;;  %v1427_v8 = vsel %vm1424_vm4, %v1425_v0, %v1426_v1  ;;  %v1431_v9 = vsel %vm1424_vm4, %v1428_v2, %v1430_v3 }
  0x40   : > { %2020 = vmatprep.mubr.msk.bf16.mxu1 %vm273_vm0, %v967_v12  ;;  %v1296_v62 = vor.u32 %v1295_v55, %v1292_v54  ;;  %v1429_v11 = vsel %vm1424_vm4, %v1426_v1, %v1428_v2  ;;  %v1433_v12 = vsel %vm1424_vm4, %v1430_v3, %v1432_v10 }
  0x41   : > { %2027 = vmatpush3.bf16.msra.mxu0 %v2131_v58  ;;  %v1133_v58 = vsel %vm489_vm2, %v1130_v43, %v1132_v50 }
  0x42   : > { %2043 = vmatpush3.bf16.msra.mxu1 %v2132_v59  ;;  %2028 = vmatprep.subr.bf16.mxu0 %v2135_v16  ;;  %v1288_v59 = vsel %vm932_vm3, %v1278_v44, %v1287_v51  ;;  %v1297_v5 = vsel %vm932_vm3, %v1287_v51, %v1296_v62 }
  0x43   : > { %2044 = vmatprep.subr.bf16.mxu1 %v2136_v17 }
  0x44   : > { %2005 = vmatmul.mubr.msk.bf16.gmra.mxu0 %vm273_vm0, %v813_v15 }
  0x45   : > { %2021 = vmatmul.mubr.msk.bf16.gmra.mxu1 %vm273_vm0, %v976_v29  ;;  %2029 = vmatpush3.bf16.msra.mxu0 %v2135_v16 }
  0x46   : > { %2045 = vmatpush3.bf16.msra.mxu1 %v2136_v17  ;;  %2030 = vmatprep.subr.bf16.mxu0 %v2137_v23 }
  0x47   : > { %2046 = vmatprep.subr.bf16.mxu1 %v2138_v24  ;;  %2032 = vmatprep.mubr.msk.bf16.mxu0 %vm273_vm0, %v1129_v39 }
  0x48   : > { %2048 = vmatprep.mubr.msk.bf16.mxu1 %vm273_vm0, %v1270_v42 }
  0x49   : > { %2031 = vmatpush3.bf16.msra.mxu0 %v2137_v23 }
  0x4a   : > { %2047 = vmatpush3.bf16.msra.mxu1 %v2138_v24  ;;  %2056 = vmatprep.subr.bf16.mxu0 %v2142_v46 }
  0x4b   : > { %2072 = vmatprep.subr.bf16.mxu1 %v2142_v46 }
  0x4c   : > { %2033 = vmatmul.mubr.msk.bf16.vlgmr.msra.gmra.mxu0 %vm273_vm0, %v1131_v52 }
  0x4d   : > { %2049 = vmatmul.mubr.msk.bf16.vlgmr.msra.gmra.mxu1 %vm273_vm0, %v1279_v53  ;;  %2057 = vmatpush3.bf16.msra.mxu0 %v2142_v46 }
  0x4e   : > { %2076 = vmatpush3.bf16.msra.mxu1 %v2142_v46  ;;  %2058 = vmatprep.subr.bf16.mxu0 %v2143_v57 }
  0x4f   : > { %2073 = vmatprep.subr.bf16.mxu1 %v2143_v57  ;;  %2036 = vmatprep.mubr.msk.bf16.mxu0 %vm273_vm0, %v1133_v58 }
  0x50   : > { %2052 = vmatprep.mubr.msk.bf16.mxu1 %vm273_vm0, %v1288_v59 }
  0x51   : > { %2059 = vmatpush3.bf16.msra.mxu0 %v2143_v57 }
  0x52   : > { %2077 = vmatpush3.bf16.msra.mxu1 %v2143_v57  ;;  %2060 = vmatprep.subr.bf16.mxu0 %v2146_v63 }
  0x53   : > { %2074 = vmatprep.subr.bf16.mxu1 %v2146_v63 }
  0x54   : > { %2037 = vmatmul.mubr.msk.bf16.gmra.mxu0 %vm273_vm0, %v1135_v4 }
  0x55   : > { %2053 = vmatmul.mubr.msk.bf16.gmra.mxu1 %vm273_vm0, %v1297_v5  ;;  %2061 = vmatpush3.bf16.msra.mxu0 %v2146_v63 }
  0x56   : > { %2078 = vmatpush3.bf16.msra.mxu1 %v2146_v63  ;;  %2062 = vmatprep.subr.bf16.mxu0 %v2147_v7 }
  0x57   : > { %2075 = vmatprep.subr.bf16.mxu1 %v2147_v7  ;;  %2064 = vmatprep.mubr.msk.bf16.mxu0 %vm273_vm0, %v1427_v8 }
  0x58   : > { %2068 = vmatprep.mubr.msk.bf16.mxu1 %vm273_vm0, %v1431_v9 }
  0x59   : > { %2063 = vmatpush3.bf16.msra.mxu0 %v2147_v7 }
  0x5a   : > { %2079 = vmatpush3.bf16.msra.mxu1 %v2147_v7 }
  0x5c   : > { %2065 = vmatmul.mubr.msk.bf16.vlgmr.msra.gmra.mxu0 %vm273_vm0, %v1429_v11 }
  0x5d   : > { %2069 = vmatmul.mubr.msk.bf16.vlgmr.msra.gmra.mxu1 %vm273_vm0, %v1433_v12 }
  0xdc   : > { %v1938_v13 = vpop.f32.mrf.mxu0 }
  0xdd   : > { %v1954_v14 = vpop.f32.mrf.mxu1 }
  0xde   : > { %v320_v15 = vpop.f32.mrf.mxu0  ;;  %v426_v59 = vadd.f32 %v1954_v14, %v1938_v13 }
  0xdf   : > { %v417_v16 = vpop.f32.mrf.mxu1 }
  0xe0   : > { %v1939_v17 = vpop.f32.mrf.mxu0  ;;  %v418_v63 = vadd.f32 %v417_v16, %v320_v15 }
  0xe1   : > { %v1955_v18 = vpop.f32.mrf.mxu1 }
  0xe2   : > { %v323_v19 = vpop.f32.mrf.mxu0  ;;  %v429_v7 = vadd.f32 %v1955_v18, %v1939_v17 }
  0xe3   : > { %v420_v20 = vpop.f32.mrf.mxu1 }
  0xe4   : > { %v1942_v21 = vpop.f32.mrf.mxu0 }
  0xe5   : > { %v1958_v22 = vpop.f32.mrf.mxu1 }
  0xe6   : > { %v336_v23 = vpop.f32.mrf.mxu0  ;;  %v442_v60 = vadd.f32 %v1958_v22, %v1942_v21 }
  0xe7   : > { %v433_v24 = vpop.f32.mrf.mxu1 }
  0xe8   : > { %v1943_v25 = vpop.f32.mrf.mxu0  ;;  %v434_v0 = vadd.f32 %v433_v24, %v336_v23 }
  0xe9   : > { %v1959_v26 = vpop.f32.mrf.mxu1 }
  0xea   : > { %v339_v27 = vpop.f32.mrf.mxu0  ;;  %v445_v8 = vadd.f32 %v1959_v26, %v1943_v25 }
  0xeb   : > { %v436_v28 = vpop.f32.mrf.mxu1 }
  0xec   : > { %v1970_v29 = vpop.f32.mrf.mxu0 }
  0xed   : > { %v1986_v30 = vpop.f32.mrf.mxu1  ;;  %v602_v1 = vadd.f32 %v1970_v29, %v426_v59 }
  0xee   : > { %v569_v31 = vpop.f32.mrf.mxu0 }
  0xef   : > { %v725_v32 = vpop.f32.mrf.mxu1  ;;  %v600_v5 = vadd.f32 %v569_v31, %v418_v63  ;;  %v758_v11 = vadd.f32 %v1986_v30, %v602_v1 }
  0xf0   : > { %v1971_v33 = vpop.f32.mrf.mxu0 }
  0xf1   : > { %v1987_v34 = vpop.f32.mrf.mxu1  ;;  %v603_v13 = vadd.f32 %v1971_v33, %v429_v7  ;;  %v756_v15 = vadd.f32 %v725_v32, %v600_v5 }
  0xf2   : > { %v572_v35 = vpop.f32.mrf.mxu0 }
  0xf3   : > { %v2422_v36 = vpop.f32.mrf.mxu1  ;;  %v759_v25 = vadd.f32 %v1987_v34, %v603_v13 }
  0xf4   : > { %v1974_v37 = vpop.f32.mrf.mxu0 }
  0xf5   : > { %v1990_v38 = vpop.f32.mrf.mxu1  ;;  %v606_v2 = vadd.f32 %v1974_v37, %v442_v60 }
  0xf6   : > { %v585_v39 = vpop.f32.mrf.mxu0 }
  0xf7   : > { %v741_v40 = vpop.f32.mrf.mxu1  ;;  %v604_v6 = vadd.f32 %v585_v39, %v434_v0  ;;  %v762_v12 = vadd.f32 %v1990_v38, %v606_v2 }
  0xf8   : > { %v1975_v41 = vpop.f32.mrf.mxu0 }
  0xf9   : > { %v1991_v42 = vpop.f32.mrf.mxu1  ;;  %v607_v14 = vadd.f32 %v1975_v41, %v445_v8  ;;  %v760_v16 = vadd.f32 %v741_v40, %v604_v6 }
  0xfa   : > { %v588_v43 = vpop.f32.mrf.mxu0 }
  0xfb   : > { %v744_v44 = vpop.f32.mrf.mxu1  ;;  %v763_v26 = vadd.f32 %v1991_v42, %v607_v14 }
  0xfc   : > { %v2002_v45 = vpop.f32.mrf.mxu0 }
  0xfd   : > { %v2018_v46 = vpop.f32.mrf.mxu1  ;;  %v917_v23 = vadd.f32 %v2002_v45, %v758_v11 }
  0xfe   : > { %v884_v47 = vpop.f32.mrf.mxu0 }
  0xff   : > { %v1047_v48 = vpop.f32.mrf.mxu1  ;;  %v915_v17 = vadd.f32 %v884_v47, %v756_v15 }
 0x100   : > { %v2003_v49 = vpop.f32.mrf.mxu0 }
 0x101   : > { %v2424_v50 = vpop.f32.mrf.mxu1  ;;  %v918_v33 = vadd.f32 %v2003_v49, %v759_v25  ;;  %v1078_v45 = vadd.f32 %v1047_v48, %v915_v17 }
 0x102   : > { %2465 = vst [vmem:[#allocation2_spill] sm:$0xff] %v2424_v50  ;;  %v887_v51 = vpop.f32.mrf.mxu0  ;;  %v437_v50 = vadd.f32 %v436_v28, %v339_v27 }
 0x103   : > { %v2426_v52 = vpop.f32.mrf.mxu1 }
 0x104   : > { %2466 = vst [vmem:[#allocation3_spill] sm:$0xff] %v2426_v52  ;;  %v2006_v53 = vpop.f32.mrf.mxu0  ;;  %v421_v52 = vadd.f32 %v420_v20, %v323_v19  ;;  %v605_v37 = vadd.f32 %v588_v43, %v437_v50  ;;  %v1080_v19 = vadd.f32 %v2018_v46, %v917_v23 }
 0x105   : > { %v2022_v54 = vpop.f32.mrf.mxu1  ;;  %v921_v24 = vadd.f32 %v2006_v53, %v762_v12 }
 0x106   : > { %v900_v55 = vpop.f32.mrf.mxu0  ;;  %v601_v29 = vadd.f32 %v572_v35, %v421_v52  ;;  %v761_v28 = vadd.f32 %v744_v44, %v605_v37 }
 0x107   : > { %v1063_v56 = vpop.f32.mrf.mxu1  ;;  %v919_v18 = vadd.f32 %v900_v55, %v760_v16  ;;  %v1084_v20 = vadd.f32 %v2022_v54, %v921_v24 }
 0x108   : > { %v2007_v57 = vpop.f32.mrf.mxu0  ;;  %v757_v27 = vadd.f32 %v2422_v36, %v601_v29 }
 0x109   : > { %v2023_v58 = vpop.f32.mrf.mxu1  ;;  %v922_v32 = vadd.f32 %v2007_v57, %v763_v26  ;;  %v1082_v35 = vadd.f32 %v1063_v56, %v919_v18  ;;  %v2467_v59 = vld [vmem:[#allocation2_spill] sm:$0xff] }
 0x10a   : > { %v903_v61 = vpop.f32.mrf.mxu0  ;;  %v916_v52 = vadd.f32 %v887_v51, %v757_v27  ;;  %v1081_v46 = vadd.f32 %v2467_v59, %v918_v33  ;;  %v1836_v51 = vld [vmem:[%s2463_s2] ss:$0 sm:$0xff] }
 0x10b   : > { %v1066_v62 = vpop.f32.mrf.mxu1  ;;  %v920_v47 = vadd.f32 %v903_v61, %v761_v28  ;;  %v1085_v54 = vadd.f32 %v2023_v58, %v922_v32  ;;  %v2468_v57 = vld [vmem:[#allocation3_spill] sm:$0xff] }
 0x10c   : > { %v2034_v3 = vpop.f32.mrf.mxu0  ;;  %v1079_v63 = vadd.f32 %v2468_v57, %v916_v52 }
 0x10d   : > { %v2050_v4 = vpop.f32.mrf.mxu1  ;;  %v1239_v43 = vadd.f32 %v2034_v3, %v1080_v19  ;;  %v1083_v48 = vadd.f32 %v1066_v62, %v920_v47 }
 0x10e   : > { %v1206_v9 = vpop.f32.mrf.mxu0 }
 0x10f   : > { %v1368_v10 = vpop.f32.mrf.mxu1  ;;  %v1237_v42 = vadd.f32 %v1206_v9, %v1078_v45  ;;  %v1401_v44 = vadd.f32 %v2050_v4, %v1239_v43 }
 0x110   : > { %v2035_v21 = vpop.f32.mrf.mxu0 }
 0x111   : > { %v2051_v22 = vpop.f32.mrf.mxu1  ;;  %v1240_v56 = vadd.f32 %v2035_v21, %v1081_v46  ;;  %v1399_v2 = vadd.f32 %v1368_v10, %v1237_v42 }
 0x112   : > { %v1209_v31 = vpop.f32.mrf.mxu0 }
 0x113   : > { %v1371_v39 = vpop.f32.mrf.mxu1  ;;  %v1238_v6 = vadd.f32 %v1209_v31, %v1079_v63  ;;  %v1402_v13 = vadd.f32 %v2051_v22, %v1240_v56 }
 0x114   : > { %v2038_v30 = vpop.f32.mrf.mxu0 }
 0x115   : > { %v2054_v38 = vpop.f32.mrf.mxu1  ;;  %v1243_v50 = vadd.f32 %v2038_v30, %v1084_v20  ;;  %v1400_v29 = vadd.f32 %v1371_v39, %v1238_v6 }
 0x116   : > { %v1222_v40 = vpop.f32.mrf.mxu0 }
 0x117   : > { %v1384_v41 = vpop.f32.mrf.mxu1  ;;  %v1241_v55 = vadd.f32 %v1222_v40, %v1082_v35  ;;  %v1405_v49 = vadd.f32 %v2054_v38, %v1243_v50  ;;  %v1609_v35 = vld [vmem:[%s2438_s13 + $0x1c] sm:$0xf] }
 0x118   : > { %v2039_v53 = vpop.f32.mrf.mxu0 }
 0x119   : > { %v2055_v34 = vpop.f32.mrf.mxu1  ;;  %v1244_v0 = vadd.f32 %v2039_v53, %v1085_v54  ;;  %v1403_v3 = vadd.f32 %v1384_v41, %v1241_v55 }
 0x11a   : > { %v1225_v60 = vpop.f32.mrf.mxu0 }
 0x11b   : > { %v1387_v36 = vpop.f32.mrf.mxu1  ;;  %v1242_v7 = vadd.f32 %v1225_v60, %v1083_v48  ;;  %v1406_v14 = vadd.f32 %v2055_v34, %v1244_v0 }
 0x11c   : > { %v2066_v1 = vpop.f32.mrf.mxu0 }
 0x11d   : > { %v2070_v61 = vpop.f32.mrf.mxu1  ;;  %v1537_v5 = vadd.f32 %v2066_v1, %v1401_v44  ;;  %v1404_v37 = vadd.f32 %v1387_v36, %v1242_v7 }
 0x11e   : > { %v1541_v58 = vadd.f32 %v2070_v61, %v1405_v49  ;;  %v1504_v4 = vpop.f32.mrf.mxu0 }
 0x11f   : > { %v1520_v8 = vpop.f32.mrf.mxu1  ;;  %v1552_v9 = vadd.f32 %v1836_v51, %v1537_v5  ;;  %v1535_v62 = vadd.f32 %v1504_v4, %v1399_v2 }
 0x120   : > { %v1556_v11 = vadd.f32 %v1836_v51, %v1541_v58  ;;  %v1539_v12 = vadd.f32 %v1520_v8, %v1403_v3  ;;  %v2067_v21 = vpop.f32.mrf.mxu0 }
 0x121   : > { %v2071_v15 = vpop.f32.mrf.mxu1  ;;  %v1560_v16 = vmax.f32 %v1552_v9, 0.0  ;;  %v1550_v23 = vadd.f32 %v1836_v51, %v1535_v62  ;;  %v1538_v31 = vadd.f32 %v2067_v21, %v1402_v13 }
 0x122   : > { %v1564_v10 = vmax.f32 %v1556_v11, 0.0  ;;  %v1554_v24 = vadd.f32 %v1836_v51, %v1539_v12  ;;  %v1542_v22 = vadd.f32 %v2071_v15, %v1406_v14  ;;  %v1507_v17 = vpop.f32.mrf.mxu0 }
 0x123   : > { %v1523_v18 = vpop.f32.mrf.mxu1  ;;  %v1850_v25 = vpack.c.bf16 %v1560_v16, %v1560_v16  ;;  %v1558_v30 = vmax.f32 %v1550_v23, 0.0  ;;  %v1553_v39 = vadd.f32 %v1836_v51, %v1538_v31  ;;  %v1536_v20 = vadd.f32 %v1507_v17, %v1400_v29 }
 0x124   : > { %v1854_v26 = vpack.c.bf16 %v1564_v10, %v1564_v10  ;;  %v1562_v38 = vmax.f32 %v1554_v24, 0.0  ;;  %v1557_v19 = vadd.f32 %v1836_v51, %v1542_v22  ;;  %v1540_v27 = vadd.f32 %v1523_v18, %v1404_v37 }
 0x125   : > { %1601 = vst.msk [vmem:[%s2438_s13 + $0x8] sm:$0xf] %vm1598_vm5, %v1850_v25  ;;  %v1848_v28 = vpack.c.bf16 %v1558_v30, %v1558_v30  ;;  %v1561_v32 = vmax.f32 %v1553_v39, 0.0  ;;  %v1551_v41 = vadd.f32 %v1836_v51, %v1536_v20 }
 0x126   : > { %1605 = vst.msk [vmem:[%s2438_s13 + $0x18] sm:$0xf] %vm1598_vm5, %v1854_v26  ;;  %v1852_v33 = vpack.c.bf16 %v1562_v38, %v1562_v38  ;;  %v1565_v40 = vmax.f32 %v1557_v19, 0.0  ;;  %v1555_v45 = vadd.f32 %v1836_v51, %v1540_v27 }
 0x127   : > { %1599 = vst.msk [vmem:[%s2438_s13] sm:$0xf] %vm1598_vm5, %v1848_v28  ;;  %v1851_v43 = vpack.c.bf16 %v1561_v32, %v1561_v32  ;;  %v1559_v52 = vmax.f32 %v1551_v41, 0.0 }
 0x128   : > { %1603 = vst.msk [vmem:[%s2438_s13 + $0x10] sm:$0xf] %vm1598_vm5, %v1852_v33  ;;  %v1855_v50 = vpack.c.bf16 %v1565_v40, %v1565_v40  ;;  %v1563_v47 = vmax.f32 %v1555_v45, 0.0 }
 0x129   : > { %1602 = vst.msk [vmem:[%s2438_s13 + $0xc] sm:$0xf] %vm1598_vm5, %v1851_v43  ;;  %v1849_v34 = vpack.c.bf16 %v1559_v52, %v1559_v52 }
 0x12a   : > { %v1610_v53 = vsel %vm1608_vm7, %v1855_v50, %v1609_v35  ;;  %v1853_v42 = vpack.c.bf16 %v1563_v47, %v1563_v47 }
 0x12b   : > { %1611 = vst [vmem:[%s2438_s13 + $0x1c] sm:$0xf] %v1610_v53  ;;  %1600 = vst.msk [vmem:[%s2438_s13 + $0x4] sm:$0xf] %vm1598_vm5, %v1849_v34 }
 0x12c   : > { %1604 = vst.msk [vmem:[%s2438_s13 + $0x14] sm:$0xf] %vm1598_vm5, %v1853_v42 }
 0x12d PF: > { %s13_s12 = sadd.s32 1, %s2156_s12  }
 0x12e   : > { %p10_p4 = scmp.ge.s32.totalorder %s13_s12, 4  }
 0x130   :  { %12 = sbr.rel (!%p10_p4) target bundleno = 1 (0x1), region = 70 }

// kernel: robot_control_forward.7
= control target key start
LH: loop header
LB: loop body
LE: loop exit
PB: predicated region body
PF: predicated region fallthrough
CT: control target
= control target key end

     0   :  { %vm4366_vm0 = vmmov 0   ;;  %vm1789_vm1 = vcmask 523264   ;;  %vm2898_vm2 = vcmask 130048   ;;  %vm3027_vm3 = vcmask 261120   ;;  %s5393_s3 = inlined_call_operand.vmem [shape: bf16[3136,32], index: 3, kind: input, shape index: {}]   ;;  %s5394_s0 = inlined_call_operand.vmem [shape: bf16[16,3136], index: 0, kind: input, shape index: {}]   ;;  %s5395_s5 = inlined_call_operand.vmem [shape: bf16[768,32], index: 5, kind: input, shape index: {}]   ;;  %s5396_s1 = inlined_call_operand.vmem [shape: bf16[16,768], index: 1, kind: input, shape index: {}]   ;;  %s5397_s7 = inlined_call_operand.vmem [shape: bf16[16,16], index: 7, kind: input, shape index: {}]   ;;  %s5398_s2 = inlined_call_operand.vmem [shape: bf16[16,16], index: 2, kind: input, shape index: {}]   ;;  %s5399_s11 = inlined_call_operand.vmem [shape: bf16[32,32], index: 11, kind: input, shape index: {}]   ;;  %s5400_s9 = inlined_call_operand.vmem [shape: bf16[16,32], index: 9, kind: input, shape index: {}]   ;;  %s5401_s12 = inlined_call_operand.vmem [shape: bf16[32,32], index: 12, kind: input, shape index: {}]   ;;  %s5402_s4 = inlined_call_operand.vmem [shape: f32[1,32], index: 4, kind: input, shape index: {}]   ;;  %s5403_s8 = inlined_call_operand.vmem [shape: f32[1,16], index: 8, kind: input, shape index: {}]   ;;  %s5404_s6 = inlined_call_operand.vmem [shape: f32[1,32], index: 6, kind: input, shape index: {}]   ;;  %s5405_s13 = inlined_call_operand.vmem [shape: bf16[32,32], index: 13, kind: input, shape index: {}]   ;;  %s5406_s10 = inlined_call_operand.vmem [shape: f32[1,32], index: 10, kind: input, shape index: {}]   ;;  %s5407_s15 = inlined_call_operand.vmem [shape: bf16[32,16], index: 15, kind: input, shape index: {}]   ;;  %s5408_s14 = inlined_call_operand.vmem [shape: f32[1,32], index: 14, kind: input, shape index: {}]   ;;  %s5409_s17 = inlined_call_operand.vmem [shape: bf16[16,128], index: 17, kind: input, shape index: {}]   ;;  %s5410_s16 = inlined_call_operand.vmem [shape: f32[1,16], index: 16, kind: input, shape index: {}]   ;;  %s5411_s18 = inlined_call_operand.vmem [shape: f32[1,128], index: 18, kind: input, shape index: {}]   ;;  %s5412_s19 = inlined_call_operand.vmem [shape: f32[16,128], index: 19, kind: output, shape index: {}]  }
   0x1   :  { %5417 = sst [smem:[#allocation2_spill]] %s5393_s3 }
   0x2   :  { %5418 = sst [smem:[#allocation3_spill]] %s5394_s0 }
   0x3   :  { %5419 = sst [smem:[#allocation4_spill]] %s5395_s5 }
   0x4   :  { %5420 = sst [smem:[#allocation5_spill]] %s5396_s1 }
   0x5   :  { %s5421_s20 = sld [smem:[#allocation2_spill]] }
   0x6   :  { %s5422_s26 = sld [smem:[#allocation3_spill]] }
   0x7   :  { %s5423_s30 = sld [smem:[#allocation4_spill]] }
   0x8   :  { %s5424_s24 = sld [smem:[#allocation5_spill]] }
   0xb   :  { %v4059_v0 = vld [vmem:[%s5421_s20 + $0x78] sm:$0xff]   ;;  %v4063_v4 = vld [vmem:[%s5421_s20 + $0x70] sm:$0xff]   ;;  %v4067_v8 = vld [vmem:[%s5421_s20 + $0x68] sm:$0xff]  }
   0xc   :  { %v4060_v1 = vld [vmem:[%s5421_s20 + $0xf8] sm:$0xff]   ;;  %3642 = vmatprep.subr.bf16.mxu0 %v4059_v0  ;;  %v4064_v5 = vld [vmem:[%s5421_s20 + $0xf0] sm:$0xff]   ;;  %v4068_v9 = vld [vmem:[%s5421_s20 + $0xe8] sm:$0xff]  }
   0xd   :  { %v4061_v2 = vld [vmem:[%s5421_s20 + $0x38] sm:$0xff]   ;;  %3664 = vmatprep.subr.bf16.mxu1 %v4060_v1  ;;  %v4065_v6 = vld [vmem:[%s5421_s20 + $0x30] sm:$0xff]   ;;  %v4069_v10 = vld [vmem:[%s5421_s20 + $0x28] sm:$0xff]  }
   0xe   :  { %v4062_v3 = vld [vmem:[%s5421_s20 + $0xb8] sm:$0xff]   ;;  %3643 = vmatpush3.bf16.msra.mxu0 %v4061_v2  ;;  %v4066_v7 = vld [vmem:[%s5421_s20 + $0xb0] sm:$0xff]   ;;  %v4070_v11 = vld [vmem:[%s5421_s20 + $0xa8] sm:$0xff]  }
   0xf   :  { %3665 = vmatpush3.bf16.msra.mxu1 %v4062_v3  ;;  %3644 = vmatprep.subr.bf16.mxu0 %v4063_v4  ;;  %v4071_v12 = vld [vmem:[%s5421_s20 + $0x60] sm:$0xff]   ;;  %v4075_v16 = vld [vmem:[%s5421_s20 + $0x58] sm:$0xff]   ;;  %v4079_v20 = vld [vmem:[%s5421_s20 + $0x50] sm:$0xff]  }
  0x10   :  { %3666 = vmatprep.subr.bf16.mxu1 %v4064_v5  ;;  %v4072_v13 = vld [vmem:[%s5421_s20 + $0xe0] sm:$0xff]   ;;  %v4076_v17 = vld [vmem:[%s5421_s20 + $0xd8] sm:$0xff]   ;;  %v4080_v21 = vld [vmem:[%s5421_s20 + $0xd0] sm:$0xff]  }
  0x11   :  { %v4073_v14 = vld [vmem:[%s5421_s20 + $0x20] sm:$0xff]   ;;  %v4077_v18 = vld [vmem:[%s5421_s20 + $0x18] sm:$0xff]   ;;  %v4081_v22 = vld [vmem:[%s5421_s20 + $0x10] sm:$0xff]  }
  0x12   :  { %3645 = vmatpush3.bf16.msra.mxu0 %v4065_v6  ;;  %v4074_v15 = vld [vmem:[%s5421_s20 + $0xa0] sm:$0xff]   ;;  %v4078_v19 = vld [vmem:[%s5421_s20 + $0x98] sm:$0xff]   ;;  %v4082_v23 = vld [vmem:[%s5421_s20 + $0x90] sm:$0xff]  }
  0x13   :  { %3667 = vmatpush3.bf16.msra.mxu1 %v4066_v7  ;;  %3646 = vmatprep.subr.bf16.mxu0 %v4067_v8  ;;  %v4083_v24 = vld [vmem:[%s5421_s20 + $0x48] sm:$0xff]   ;;  %v4087_v28 = vld [vmem:[%s5421_s20 + $0x40] sm:$0xff]   ;;  %v4097_v36 = vld [vmem:[%s5421_s20 + $0x178] sm:$0xff]  }
  0x14   :  { %3668 = vmatprep.subr.bf16.mxu1 %v4068_v9  ;;  %v4084_v25 = vld [vmem:[%s5421_s20 + $0xc8] sm:$0xff]   ;;  %v4088_v29 = vld [vmem:[%s5421_s20 + $0xc0] sm:$0xff]   ;;  %v4098_v37 = vld [vmem:[%s5421_s20 + $0x1f8] sm:$0xff]  }
  0x15   :  { %v4085_v26 = vld [vmem:[%s5421_s20 + $0x8] sm:$0xff]   ;;  %v4089_v30 = vld [vmem:[%s5421_s20] sm:$0xff]   ;;  %v4099_v38 = vld [vmem:[%s5421_s20 + $0x138] sm:$0xff]  }
  0x16   :  { %3647 = vmatpush3.bf16.msra.mxu0 %v4069_v10  ;;  %v4086_v27 = vld [vmem:[%s5421_s20 + $0x88] sm:$0xff]   ;;  %v4090_v31 = vld [vmem:[%s5421_s20 + $0x80] sm:$0xff]   ;;  %v4100_v39 = vld [vmem:[%s5421_s20 + $0x1b8] sm:$0xff]  }
  0x17   :  { %3669 = vmatpush3.bf16.msra.mxu1 %v4070_v11  ;;  %3648 = vmatprep.subr.bf16.mxu0 %v4071_v12  ;;  %v4091_v32 = vld [vmem:[%s5422_s26] ss:$100 sps:$4 sm:$0xff]   ;;  %v4094_v34 = vld [vmem:[%s5422_s26 + $0x8] ss:$100 sps:$4 sm:$0xff]   ;;  %v4101_v40 = vld [vmem:[%s5421_s20 + $0x170] sm:$0xff]  }
  0x18   :  { %3670 = vmatprep.subr.bf16.mxu1 %v4072_v13  ;;  %v4093_v33 = vld [vmem:[%s5422_s26 + $0x4] ss:$100 sps:$4 sm:$0xff]   ;;  %v4096_v35 = vld [vmem:[%s5422_s26 + $0xc] ss:$100 sps:$4 sm:$0xff]   ;;  %v4113_v52 = vld [vmem:[%s5421_s20 + $0x158] sm:$0xff]  }
  0x19   :  { %1825 = vmatprep.mubr.bf16.mxu0 %v4093_v33  ;;  %1866 = vmatprep.mubr.bf16.mxu1 %v4096_v35  ;;  %v4102_v41 = vld [vmem:[%s5421_s20 + $0x1f0] sm:$0xff]   ;;  %v4105_v44 = vld [vmem:[%s5421_s20 + $0x168] sm:$0xff]   ;;  %v4109_v48 = vld [vmem:[%s5421_s20 + $0x160] sm:$0xff]  }
  0x1a   :  { %3649 = vmatpush3.bf16.msra.mxu0 %v4073_v14  ;;  %v4103_v42 = vld [vmem:[%s5421_s20 + $0x130] sm:$0xff]   ;;  %v4106_v45 = vld [vmem:[%s5421_s20 + $0x1e8] sm:$0xff]   ;;  %v4110_v49 = vld [vmem:[%s5421_s20 + $0x1e0] sm:$0xff]  }
  0x1b   :  { %3671 = vmatpush3.bf16.msra.mxu1 %v4074_v15  ;;  %3650 = vmatprep.subr.bf16.mxu0 %v4075_v16  ;;  %v4104_v43 = vld [vmem:[%s5421_s20 + $0x1b0] sm:$0xff]   ;;  %v4107_v46 = vld [vmem:[%s5421_s20 + $0x128] sm:$0xff]   ;;  %v4111_v50 = vld [vmem:[%s5421_s20 + $0x120] sm:$0xff]  }
  0x1c   :  { %3672 = vmatprep.subr.bf16.mxu1 %v4076_v17  ;;  %v4108_v47 = vld [vmem:[%s5421_s20 + $0x1a8] sm:$0xff]   ;;  %v4112_v51 = vld [vmem:[%s5421_s20 + $0x1a0] sm:$0xff]   ;;  %v4114_v53 = vld [vmem:[%s5421_s20 + $0x1d8] sm:$0xff]  }
  0x1d   :  { %v4115_v54 = vld [vmem:[%s5421_s20 + $0x118] sm:$0xff]   ;;  %v4117_v56 = vld [vmem:[%s5421_s20 + $0x150] sm:$0xff]   ;;  %v4121_v60 = vld [vmem:[%s5421_s20 + $0x148] sm:$0xff]  }
  0x1e   :  { %3651 = vmatpush3.bf16.msra.mxu0 %v4077_v18  ;;  %v4116_v55 = vld [vmem:[%s5421_s20 + $0x198] sm:$0xff]   ;;  %v4118_v57 = vld [vmem:[%s5421_s20 + $0x1d0] sm:$0xff]   ;;  %v4122_v61 = vld [vmem:[%s5421_s20 + $0x1c8] sm:$0xff]  }
  0x1f   :  { %3673 = vmatpush3.bf16.msra.mxu1 %v4078_v19  ;;  %3652 = vmatprep.subr.bf16.mxu0 %v4079_v20  ;;  %v4119_v58 = vld [vmem:[%s5421_s20 + $0x110] sm:$0xff]   ;;  %v4123_v62 = vld [vmem:[%s5421_s20 + $0x108] sm:$0xff]   ;;  %v4125_v0 = vld [vmem:[%s5421_s20 + $0x140] sm:$0xff]  }
  0x20   :  { %3674 = vmatprep.subr.bf16.mxu1 %v4080_v21  ;;  %v4120_v59 = vld [vmem:[%s5421_s20 + $0x190] sm:$0xff]   ;;  %v4124_v63 = vld [vmem:[%s5421_s20 + $0x188] sm:$0xff]   ;;  %v4126_v1 = vld [vmem:[%s5421_s20 + $0x1c0] sm:$0xff]  }
  0x21   :  { %v4127_v2 = vld [vmem:[%s5421_s20 + $0x100] sm:$0xff]   ;;  %v4129_v4 = vld [vmem:[%s5422_s26 + $0x10] ss:$100 sps:$4 sm:$0xff]   ;;  %v4132_v6 = vld [vmem:[%s5422_s26 + $0x18] ss:$100 sps:$4 sm:$0xff]  }
  0x22   :  { %3653 = vmatpush3.bf16.msra.mxu0 %v4081_v22  ;;  %v4128_v3 = vld [vmem:[%s5421_s20 + $0x180] sm:$0xff]   ;;  %v4131_v5 = vld [vmem:[%s5422_s26 + $0x14] ss:$100 sps:$4 sm:$0xff]   ;;  %v4143_v16 = vld [vmem:[%s5421_s20 + $0x268] sm:$0xff]  }
  0x23   :  { %3675 = vmatpush3.bf16.msra.mxu1 %v4082_v23  ;;  %3654 = vmatprep.subr.bf16.mxu0 %v4083_v24  ;;  %v4134_v7 = vld [vmem:[%s5422_s26 + $0x1c] ss:$100 sps:$4 sm:$0xff]   ;;  %v4139_v12 = vld [vmem:[%s5421_s20 + $0x270] sm:$0xff]   ;;  %v4144_v17 = vld [vmem:[%s5421_s20 + $0x2e8] sm:$0xff]  }
  0x24   :  { %3676 = vmatprep.subr.bf16.mxu1 %v4084_v25  ;;  %v4135_v8 = vld [vmem:[%s5421_s20 + $0x278] sm:$0xff]   ;;  %v4140_v13 = vld [vmem:[%s5421_s20 + $0x2f0] sm:$0xff]   ;;  %v4145_v18 = vld [vmem:[%s5421_s20 + $0x228] sm:$0xff]  }
  0x25   :  { %v4136_v9 = vld [vmem:[%s5421_s20 + $0x2f8] sm:$0xff]   ;;  %v4141_v14 = vld [vmem:[%s5421_s20 + $0x230] sm:$0xff]   ;;  %v4146_v19 = vld [vmem:[%s5421_s20 + $0x2a8] sm:$0xff]  }
  0x26   :  { %3655 = vmatpush3.bf16.msra.mxu0 %v4085_v26  ;;  %v4137_v10 = vld [vmem:[%s5421_s20 + $0x238] sm:$0xff]   ;;  %v4142_v15 = vld [vmem:[%s5421_s20 + $0x2b0] sm:$0xff]   ;;  %v4147_v20 = vld [vmem:[%s5421_s20 + $0x260] sm:$0xff]  }
  0x27   :  { %3677 = vmatpush3.bf16.msra.mxu1 %v4086_v27  ;;  %3656 = vmatprep.subr.bf16.mxu0 %v4087_v28  ;;  %v4138_v11 = vld [vmem:[%s5421_s20 + $0x2b8] sm:$0xff]   ;;  %v4148_v21 = vld [vmem:[%s5421_s20 + $0x2e0] sm:$0xff]   ;;  %v4155_v28 = vld [vmem:[%s5421_s20 + $0x250] sm:$0xff]  }
  0x28   :  { %3678 = vmatprep.subr.bf16.mxu1 %v4088_v29  ;;  %v4149_v22 = vld [vmem:[%s5421_s20 + $0x220] sm:$0xff]   ;;  %v4151_v24 = vld [vmem:[%s5421_s20 + $0x258] sm:$0xff]   ;;  %v4156_v29 = vld [vmem:[%s5421_s20 + $0x2d0] sm:$0xff]  }
  0x29   :  { %v4150_v23 = vld [vmem:[%s5421_s20 + $0x2a0] sm:$0xff]   ;;  %v4152_v25 = vld [vmem:[%s5421_s20 + $0x2d8] sm:$0xff]   ;;  %v4160_v33 = vld [vmem:[%s5421_s20 + $0x2c8] sm:$0xff]  }
  0x2a   :  { %3657 = vmatpush3.bf16.msra.mxu0 %v4089_v30  ;;  %v4153_v26 = vld [vmem:[%s5421_s20 + $0x218] sm:$0xff]   ;;  %v4157_v30 = vld [vmem:[%s5421_s20 + $0x210] sm:$0xff]   ;;  %v4162_v35 = vld [vmem:[%s5421_s20 + $0x288] sm:$0xff]  }
  0x2b   :  { %3679 = vmatpush3.bf16.msra.mxu1 %v4090_v31  ;;  %3686 = vmatprep.subr.bf16.mxu0 %v4097_v36  ;;  %v4154_v27 = vld [vmem:[%s5421_s20 + $0x298] sm:$0xff]   ;;  %v4158_v31 = vld [vmem:[%s5421_s20 + $0x290] sm:$0xff]   ;;  %v4163_v36 = vld [vmem:[%s5421_s20 + $0x240] sm:$0xff]  }
  0x2c   :  { %3708 = vmatprep.subr.bf16.mxu1 %v4098_v37  ;;  %v4164_v37 = vld [vmem:[%s5421_s20 + $0x2c0] sm:$0xff]  }
  0x2d   :  { %1826 = vmatmul.mubr.bf16.vlgmr.msra.gmra.mxu0 %v4091_v32  ;;  %v4159_v32 = vld [vmem:[%s5421_s20 + $0x248] sm:$0xff]  }
  0x2e   :  { %1867 = vmatmul.mubr.bf16.vlgmr.msra.gmra.mxu1 %v4094_v34  ;;  %3687 = vmatpush3.bf16.msra.mxu0 %v4099_v38  ;;  %v4161_v34 = vld [vmem:[%s5421_s20 + $0x208] sm:$0xff]   ;;  %v4165_v38 = vld [vmem:[%s5421_s20 + $0x200] sm:$0xff]  }
  0x2f   :  { %3709 = vmatpush3.bf16.msra.mxu1 %v4100_v39  ;;  %3688 = vmatprep.subr.bf16.mxu0 %v4101_v40  ;;  %v4166_v39 = vld [vmem:[%s5421_s20 + $0x280] sm:$0xff]  }
  0x30   :  { %3710 = vmatprep.subr.bf16.mxu1 %v4102_v41  ;;  %1907 = vmatprep.mubr.bf16.mxu0 %v4131_v5  ;;  %v4167_v40 = vld [vmem:[%s5422_s26 + $0x20] ss:$100 sps:$4 sm:$0xff]   ;;  %v4198_v5 = vld [vmem:[%s5421_s20 + $0x3c8] sm:$0xff]  }
  0x31   :  { %1948 = vmatprep.mubr.bf16.mxu1 %v4134_v7  ;;  %v4169_v41 = vld [vmem:[%s5422_s26 + $0x24] ss:$100 sps:$4 sm:$0xff]  }
  0x32   :  { %3689 = vmatpush3.bf16.msra.mxu0 %v4103_v42  ;;  %v4170_v42 = vld [vmem:[%s5422_s26 + $0x28] ss:$100 sps:$4 sm:$0xff]  }
  0x33   :  { %3711 = vmatpush3.bf16.msra.mxu1 %v4104_v43  ;;  %3690 = vmatprep.subr.bf16.mxu0 %v4105_v44  ;;  %v4172_v43 = vld [vmem:[%s5422_s26 + $0x2c] ss:$100 sps:$4 sm:$0xff]   ;;  %v4173_v44 = vld [vmem:[%s5421_s20 + $0x378] sm:$0xff]  }
  0x34   :  { %3712 = vmatprep.subr.bf16.mxu1 %v4106_v45  ;;  %v4174_v45 = vld [vmem:[%s5421_s20 + $0x3f8] sm:$0xff]   ;;  %v4200_v7 = vld [vmem:[%s5421_s20 + $0x388] sm:$0xff]  }
  0x36   :  { %3691 = vmatpush3.bf16.msra.mxu0 %v4107_v46  ;;  %v4175_v46 = vld [vmem:[%s5421_s20 + $0x338] sm:$0xff]  }
  0x37   :  { %3713 = vmatpush3.bf16.msra.mxu1 %v4108_v47  ;;  %3692 = vmatprep.subr.bf16.mxu0 %v4109_v48  ;;  %v4176_v47 = vld [vmem:[%s5421_s20 + $0x3b8] sm:$0xff]   ;;  %v4177_v48 = vld [vmem:[%s5421_s20 + $0x370] sm:$0xff]  }
  0x38   :  { %3714 = vmatprep.subr.bf16.mxu1 %v4110_v49  ;;  %v4178_v49 = vld [vmem:[%s5421_s20 + $0x3f0] sm:$0xff]  }
  0x3a   :  { %3693 = vmatpush3.bf16.msra.mxu0 %v4111_v50  ;;  %v4179_v50 = vld [vmem:[%s5421_s20 + $0x330] sm:$0xff]  }
  0x3b   :  { %3715 = vmatpush3.bf16.msra.mxu1 %v4112_v51  ;;  %3694 = vmatprep.subr.bf16.mxu0 %v4113_v52  ;;  %v4180_v51 = vld [vmem:[%s5421_s20 + $0x3b0] sm:$0xff]   ;;  %v4181_v52 = vld [vmem:[%s5421_s20 + $0x368] sm:$0xff]  }
  0x3c   :  { %3716 = vmatprep.subr.bf16.mxu1 %v4114_v53  ;;  %v4182_v53 = vld [vmem:[%s5421_s20 + $0x3e8] sm:$0xff]  }
  0x3e   :  { %3695 = vmatpush3.bf16.msra.mxu0 %v4115_v54  ;;  %v4183_v54 = vld [vmem:[%s5421_s20 + $0x328] sm:$0xff]  }
  0x3f   :  { %3717 = vmatpush3.bf16.msra.mxu1 %v4116_v55  ;;  %3696 = vmatprep.subr.bf16.mxu0 %v4117_v56  ;;  %v4184_v55 = vld [vmem:[%s5421_s20 + $0x3a8] sm:$0xff]   ;;  %v4185_v56 = vld [vmem:[%s5421_s20 + $0x360] sm:$0xff]  }
  0x40   :  { %3718 = vmatprep.subr.bf16.mxu1 %v4118_v57  ;;  %v4186_v57 = vld [vmem:[%s5421_s20 + $0x3e0] sm:$0xff]  }
  0x42   :  { %3697 = vmatpush3.bf16.msra.mxu0 %v4119_v58  ;;  %v4187_v58 = vld [vmem:[%s5421_s20 + $0x320] sm:$0xff]  }
  0x43   :  { %3719 = vmatpush3.bf16.msra.mxu1 %v4120_v59  ;;  %3698 = vmatprep.subr.bf16.mxu0 %v4121_v60  ;;  %v4188_v59 = vld [vmem:[%s5421_s20 + $0x3a0] sm:$0xff]   ;;  %v4189_v60 = vld [vmem:[%s5421_s20 + $0x358] sm:$0xff]  }
  0x44   :  { %3720 = vmatprep.subr.bf16.mxu1 %v4122_v61  ;;  %v4190_v61 = vld [vmem:[%s5421_s20 + $0x3d8] sm:$0xff]  }
  0x46   :  { %3699 = vmatpush3.bf16.msra.mxu0 %v4123_v62  ;;  %v4191_v62 = vld [vmem:[%s5421_s20 + $0x318] sm:$0xff]  }
  0x47   :  { %3721 = vmatpush3.bf16.msra.mxu1 %v4124_v63  ;;  %3700 = vmatprep.subr.bf16.mxu0 %v4125_v0  ;;  %v4192_v63 = vld [vmem:[%s5421_s20 + $0x398] sm:$0xff]   ;;  %v4193_v0 = vld [vmem:[%s5421_s20 + $0x350] sm:$0xff]  }
  0x48   :  { %3722 = vmatprep.subr.bf16.mxu1 %v4126_v1  ;;  %v4194_v1 = vld [vmem:[%s5421_s20 + $0x3d0] sm:$0xff]  }
  0x4a   :  { %3701 = vmatpush3.bf16.msra.mxu0 %v4127_v2  ;;  %v4195_v2 = vld [vmem:[%s5421_s20 + $0x310] sm:$0xff]  }
  0x4b   :  { %3723 = vmatpush3.bf16.msra.mxu1 %v4128_v3  ;;  %3730 = vmatprep.subr.bf16.mxu0 %v4135_v8  ;;  %v4196_v3 = vld [vmem:[%s5421_s20 + $0x390] sm:$0xff]   ;;  %v4201_v8 = vld [vmem:[%s5421_s20 + $0x340] sm:$0xff]  }
  0x4c   :  { %3752 = vmatprep.subr.bf16.mxu1 %v4136_v9  ;;  %v4202_v9 = vld [vmem:[%s5421_s20 + $0x3c0] sm:$0xff]  }
  0x4d   :  { %1908 = vmatmul.mubr.bf16.vlgmr.msra.gmra.mxu0 %v4129_v4  ;;  %v4197_v4 = vld [vmem:[%s5421_s20 + $0x348] sm:$0xff]  }
  0x4e   :  { %1949 = vmatmul.mubr.bf16.vlgmr.msra.gmra.mxu1 %v4132_v6  ;;  %3731 = vmatpush3.bf16.msra.mxu0 %v4137_v10  ;;  %v4199_v6 = vld [vmem:[%s5421_s20 + $0x308] sm:$0xff]   ;;  %v4203_v10 = vld [vmem:[%s5421_s20 + $0x300] sm:$0xff]  }
  0x4f   :  { %3753 = vmatpush3.bf16.msra.mxu1 %v4138_v11  ;;  %3732 = vmatprep.subr.bf16.mxu0 %v4139_v12  ;;  %v4204_v11 = vld [vmem:[%s5421_s20 + $0x380] sm:$0xff]   ;;  %v4205_v12 = vld [vmem:[%s5422_s26 + $0x30] ss:$100 sps:$4 sm:$0xff]  }
  0x50   :  { %3754 = vmatprep.subr.bf16.mxu1 %v4140_v13  ;;  %1989 = vmatprep.mubr.bf16.mxu0 %v4169_v41  ;;  %v4207_v13 = vld [vmem:[%s5422_s26 + $0x34] ss:$100 sps:$4 sm:$0xff]   ;;  %v4236_v41 = vld [vmem:[%s5421_s20 + $0x4c8] sm:$0xff]  }
  0x51   :  { %2030 = vmatprep.mubr.bf16.mxu1 %v4172_v43  ;;  %v4238_v43 = vld [vmem:[%s5421_s20 + $0x488] sm:$0xff]  }
  0x52   :  { %3733 = vmatpush3.bf16.msra.mxu0 %v4141_v14  ;;  %v4208_v14 = vld [vmem:[%s5422_s26 + $0x38] ss:$100 sps:$4 sm:$0xff]  }
  0x53   :  { %3755 = vmatpush3.bf16.msra.mxu1 %v4142_v15  ;;  %3734 = vmatprep.subr.bf16.mxu0 %v4143_v16  ;;  %v4210_v15 = vld [vmem:[%s5422_s26 + $0x3c] ss:$100 sps:$4 sm:$0xff]  }
  0x54   :  { %3756 = vmatprep.subr.bf16.mxu1 %v4144_v17  ;;  %v4211_v16 = vld [vmem:[%s5421_s20 + $0x478] sm:$0xff]  }
  0x55   :  { %v4212_v17 = vld [vmem:[%s5421_s20 + $0x4f8] sm:$0xff]  }
  0x56   :  { %3735 = vmatpush3.bf16.msra.mxu0 %v4145_v18  ;;  %v4213_v18 = vld [vmem:[%s5421_s20 + $0x438] sm:$0xff]  }
  0x57   :  { %3757 = vmatpush3.bf16.msra.mxu1 %v4146_v19  ;;  %3736 = vmatprep.subr.bf16.mxu0 %v4147_v20  ;;  %v4214_v19 = vld [vmem:[%s5421_s20 + $0x4b8] sm:$0xff]   ;;  %v4215_v20 = vld [vmem:[%s5421_s20 + $0x470] sm:$0xff]  }
  0x58   :  { %3758 = vmatprep.subr.bf16.mxu1 %v4148_v21  ;;  %v4216_v21 = vld [vmem:[%s5421_s20 + $0x4f0] sm:$0xff]  }
  0x5a   :  { %3737 = vmatpush3.bf16.msra.mxu0 %v4149_v22  ;;  %v4217_v22 = vld [vmem:[%s5421_s20 + $0x430] sm:$0xff]  }
  0x5b   :  { %3759 = vmatpush3.bf16.msra.mxu1 %v4150_v23  ;;  %3738 = vmatprep.subr.bf16.mxu0 %v4151_v24  ;;  %v4218_v23 = vld [vmem:[%s5421_s20 + $0x4b0] sm:$0xff]   ;;  %v4219_v24 = vld [vmem:[%s5421_s20 + $0x468] sm:$0xff]  }
  0x5c   :  { %3760 = vmatprep.subr.bf16.mxu1 %v4152_v25  ;;  %v4220_v25 = vld [vmem:[%s5421_s20 + $0x4e8] sm:$0xff]  }
  0x5e   :  { %3739 = vmatpush3.bf16.msra.mxu0 %v4153_v26  ;;  %v4221_v26 = vld [vmem:[%s5421_s20 + $0x428] sm:$0xff]  }
  0x5f   :  { %3761 = vmatpush3.bf16.msra.mxu1 %v4154_v27  ;;  %3740 = vmatprep.subr.bf16.mxu0 %v4155_v28  ;;  %v4222_v27 = vld [vmem:[%s5421_s20 + $0x4a8] sm:$0xff]   ;;  %v4223_v28 = vld [vmem:[%s5421_s20 + $0x460] sm:$0xff]  }
  0x60   :  { %3762 = vmatprep.subr.bf16.mxu1 %v4156_v29  ;;  %v4224_v29 = vld [vmem:[%s5421_s20 + $0x4e0] sm:$0xff]  }
  0x62   :  { %3741 = vmatpush3.bf16.msra.mxu0 %v4157_v30  ;;  %v4225_v30 = vld [vmem:[%s5421_s20 + $0x420] sm:$0xff]  }
  0x63   :  { %3763 = vmatpush3.bf16.msra.mxu1 %v4158_v31  ;;  %3742 = vmatprep.subr.bf16.mxu0 %v4159_v32  ;;  %v4226_v31 = vld [vmem:[%s5421_s20 + $0x4a0] sm:$0xff]   ;;  %v4227_v32 = vld [vmem:[%s5421_s20 + $0x458] sm:$0xff]  }
  0x64   :  { %3764 = vmatprep.subr.bf16.mxu1 %v4160_v33  ;;  %v4228_v33 = vld [vmem:[%s5421_s20 + $0x4d8] sm:$0xff]  }
  0x66   :  { %3743 = vmatpush3.bf16.msra.mxu0 %v4161_v34  ;;  %v4229_v34 = vld [vmem:[%s5421_s20 + $0x418] sm:$0xff]  }
  0x67   :  { %3765 = vmatpush3.bf16.msra.mxu1 %v4162_v35  ;;  %3744 = vmatprep.subr.bf16.mxu0 %v4163_v36  ;;  %v4230_v35 = vld [vmem:[%s5421_s20 + $0x498] sm:$0xff]   ;;  %v4231_v36 = vld [vmem:[%s5421_s20 + $0x450] sm:$0xff]  }
  0x68   :  { %3766 = vmatprep.subr.bf16.mxu1 %v4164_v37  ;;  %v4232_v37 = vld [vmem:[%s5421_s20 + $0x4d0] sm:$0xff]  }
  0x6a   :  { %3745 = vmatpush3.bf16.msra.mxu0 %v4165_v38  ;;  %v4233_v38 = vld [vmem:[%s5421_s20 + $0x410] sm:$0xff]  }
  0x6b   :  { %3767 = vmatpush3.bf16.msra.mxu1 %v4166_v39  ;;  %3774 = vmatprep.subr.bf16.mxu0 %v4173_v44  ;;  %v4234_v39 = vld [vmem:[%s5421_s20 + $0x490] sm:$0xff]   ;;  %v4239_v44 = vld [vmem:[%s5421_s20 + $0x440] sm:$0xff]  }
  0x6c   :  { %3796 = vmatprep.subr.bf16.mxu1 %v4174_v45  ;;  %v4240_v45 = vld [vmem:[%s5421_s20 + $0x4c0] sm:$0xff]  }
  0x6d   :  { %1990 = vmatmul.mubr.bf16.vlgmr.msra.gmra.mxu0 %v4167_v40  ;;  %v4235_v40 = vld [vmem:[%s5421_s20 + $0x448] sm:$0xff]  }
  0x6e   :  { %2031 = vmatmul.mubr.bf16.vlgmr.msra.gmra.mxu1 %v4170_v42  ;;  %3775 = vmatpush3.bf16.msra.mxu0 %v4175_v46  ;;  %v4237_v42 = vld [vmem:[%s5421_s20 + $0x408] sm:$0xff]   ;;  %v4241_v46 = vld [vmem:[%s5421_s20 + $0x400] sm:$0xff]  }
  0x6f   :  { %3797 = vmatpush3.bf16.msra.mxu1 %v4176_v47  ;;  %3776 = vmatprep.subr.bf16.mxu0 %v4177_v48  ;;  %v4242_v47 = vld [vmem:[%s5421_s20 + $0x480] sm:$0xff]  }
  0x70   :  { %3798 = vmatprep.subr.bf16.mxu1 %v4178_v49  ;;  %2071 = vmatprep.mubr.bf16.mxu0 %v4207_v13  ;;  %v4243_v48 = vld [vmem:[%s5422_s26 + $0x40] ss:$100 sps:$4 sm:$0xff]   ;;  %v4274_v13 = vld [vmem:[%s5421_s20 + $0x5c8] sm:$0xff]  }
  0x71   :  { %2112 = vmatprep.mubr.bf16.mxu1 %v4210_v15  ;;  %v4245_v49 = vld [vmem:[%s5422_s26 + $0x44] ss:$100 sps:$4 sm:$0xff]  }
  0x72   :  { %3777 = vmatpush3.bf16.msra.mxu0 %v4179_v50  ;;  %v4246_v50 = vld [vmem:[%s5422_s26 + $0x48] ss:$100 sps:$4 sm:$0xff]  }
  0x73   :  { %3799 = vmatpush3.bf16.msra.mxu1 %v4180_v51  ;;  %3778 = vmatprep.subr.bf16.mxu0 %v4181_v52  ;;  %v4248_v51 = vld [vmem:[%s5422_s26 + $0x4c] ss:$100 sps:$4 sm:$0xff]   ;;  %v4249_v52 = vld [vmem:[%s5421_s20 + $0x578] sm:$0xff]  }
  0x74   :  { %3800 = vmatprep.subr.bf16.mxu1 %v4182_v53  ;;  %v4250_v53 = vld [vmem:[%s5421_s20 + $0x5f8] sm:$0xff]   ;;  %v4276_v15 = vld [vmem:[%s5421_s20 + $0x588] sm:$0xff]  }
  0x76   :  { %3779 = vmatpush3.bf16.msra.mxu0 %v4183_v54  ;;  %v4251_v54 = vld [vmem:[%s5421_s20 + $0x538] sm:$0xff]  }
  0x77   :  { %3801 = vmatpush3.bf16.msra.mxu1 %v4184_v55  ;;  %3780 = vmatprep.subr.bf16.mxu0 %v4185_v56  ;;  %v4252_v55 = vld [vmem:[%s5421_s20 + $0x5b8] sm:$0xff]   ;;  %v4253_v56 = vld [vmem:[%s5421_s20 + $0x570] sm:$0xff]  }
  0x78   :  { %3802 = vmatprep.subr.bf16.mxu1 %v4186_v57  ;;  %v4254_v57 = vld [vmem:[%s5421_s20 + $0x5f0] sm:$0xff]  }
  0x7a   :  { %3781 = vmatpush3.bf16.msra.mxu0 %v4187_v58  ;;  %v4255_v58 = vld [vmem:[%s5421_s20 + $0x530] sm:$0xff]  }
  0x7b   :  { %3803 = vmatpush3.bf16.msra.mxu1 %v4188_v59  ;;  %3782 = vmatprep.subr.bf16.mxu0 %v4189_v60  ;;  %v4256_v59 = vld [vmem:[%s5421_s20 + $0x5b0] sm:$0xff]   ;;  %v4257_v60 = vld [vmem:[%s5421_s20 + $0x568] sm:$0xff]  }
  0x7c   :  { %3804 = vmatprep.subr.bf16.mxu1 %v4190_v61  ;;  %v4258_v61 = vld [vmem:[%s5421_s20 + $0x5e8] sm:$0xff]  }
  0x7e   :  { %3783 = vmatpush3.bf16.msra.mxu0 %v4191_v62  ;;  %v4259_v62 = vld [vmem:[%s5421_s20 + $0x528] sm:$0xff]  }
  0x7f   :  { %3805 = vmatpush3.bf16.msra.mxu1 %v4192_v63  ;;  %3784 = vmatprep.subr.bf16.mxu0 %v4193_v0  ;;  %v4260_v63 = vld [vmem:[%s5421_s20 + $0x5a8] sm:$0xff]   ;;  %v4261_v0 = vld [vmem:[%s5421_s20 + $0x560] sm:$0xff]  }
  0x80   :  { %3806 = vmatprep.subr.bf16.mxu1 %v4194_v1  ;;  %v4262_v1 = vld [vmem:[%s5421_s20 + $0x5e0] sm:$0xff]  }
  0x82   :  { %3785 = vmatpush3.bf16.msra.mxu0 %v4195_v2  ;;  %v4263_v2 = vld [vmem:[%s5421_s20 + $0x520] sm:$0xff]  }
  0x83   :  { %3807 = vmatpush3.bf16.msra.mxu1 %v4196_v3  ;;  %3786 = vmatprep.subr.bf16.mxu0 %v4197_v4  ;;  %v4264_v3 = vld [vmem:[%s5421_s20 + $0x5a0] sm:$0xff]   ;;  %v4265_v4 = vld [vmem:[%s5421_s20 + $0x558] sm:$0xff]  }
  0x84   :  { %3808 = vmatprep.subr.bf16.mxu1 %v4198_v5  ;;  %v4266_v5 = vld [vmem:[%s5421_s20 + $0x5d8] sm:$0xff]  }
  0x86   :  { %3787 = vmatpush3.bf16.msra.mxu0 %v4199_v6  ;;  %v4267_v6 = vld [vmem:[%s5421_s20 + $0x518] sm:$0xff]  }
  0x87   :  { %3809 = vmatpush3.bf16.msra.mxu1 %v4200_v7  ;;  %3788 = vmatprep.subr.bf16.mxu0 %v4201_v8  ;;  %v4268_v7 = vld [vmem:[%s5421_s20 + $0x598] sm:$0xff]   ;;  %v4269_v8 = vld [vmem:[%s5421_s20 + $0x550] sm:$0xff]  }
  0x88   :  { %3810 = vmatprep.subr.bf16.mxu1 %v4202_v9  ;;  %v4270_v9 = vld [vmem:[%s5421_s20 + $0x5d0] sm:$0xff]  }
  0x8a   :  { %3789 = vmatpush3.bf16.msra.mxu0 %v4203_v10  ;;  %v4271_v10 = vld [vmem:[%s5421_s20 + $0x510] sm:$0xff]  }
  0x8b   :  { %3811 = vmatpush3.bf16.msra.mxu1 %v4204_v11  ;;  %3818 = vmatprep.subr.bf16.mxu0 %v4211_v16  ;;  %v4272_v11 = vld [vmem:[%s5421_s20 + $0x590] sm:$0xff]   ;;  %v4277_v16 = vld [vmem:[%s5421_s20 + $0x540] sm:$0xff]  }
  0x8c   :  { %3840 = vmatprep.subr.bf16.mxu1 %v4212_v17  ;;  %v4278_v17 = vld [vmem:[%s5421_s20 + $0x5c0] sm:$0xff]  }
  0x8d   :  { %2072 = vmatmul.mubr.bf16.vlgmr.msra.gmra.mxu0 %v4205_v12  ;;  %v4273_v12 = vld [vmem:[%s5421_s20 + $0x548] sm:$0xff]  }
  0x8e   :  { %2113 = vmatmul.mubr.bf16.vlgmr.msra.gmra.mxu1 %v4208_v14  ;;  %3819 = vmatpush3.bf16.msra.mxu0 %v4213_v18  ;;  %v4275_v14 = vld [vmem:[%s5421_s20 + $0x508] sm:$0xff]   ;;  %v4279_v18 = vld [vmem:[%s5421_s20 + $0x500] sm:$0xff]  }
  0x8f   :  { %3841 = vmatpush3.bf16.msra.mxu1 %v4214_v19  ;;  %3820 = vmatprep.subr.bf16.mxu0 %v4215_v20  ;;  %v4280_v19 = vld [vmem:[%s5421_s20 + $0x580] sm:$0xff]   ;;  %v4281_v20 = vld [vmem:[%s5422_s26 + $0x50] ss:$100 sps:$4 sm:$0xff]  }
  0x90   :  { %3842 = vmatprep.subr.bf16.mxu1 %v4216_v21  ;;  %2153 = vmatprep.mubr.bf16.mxu0 %v4245_v49  ;;  %v4283_v21 = vld [vmem:[%s5422_s26 + $0x54] ss:$100 sps:$4 sm:$0xff]   ;;  %v4311_v49 = vld [vmem:[%s5423_s30 + $0xa8] sm:$0xff]  }
  0x91   :  { %2194 = vmatprep.mubr.bf16.mxu1 %v4248_v51  ;;  %v4313_v51 = vld [vmem:[%s5423_s30 + $0xe0] sm:$0xff]  }
  0x92   :  { %3821 = vmatpush3.bf16.msra.mxu0 %v4217_v22  ;;  %v4284_v22 = vld [vmem:[%s5422_s26 + $0x58] ss:$100 sps:$4 sm:$0xff]  }
  0x93   :  { %3843 = vmatpush3.bf16.msra.mxu1 %v4218_v23  ;;  %3822 = vmatprep.subr.bf16.mxu0 %v4219_v24  ;;  %v4286_v23 = vld [vmem:[%s5422_s26 + $0x5c] ss:$100 sps:$4 sm:$0xff]   ;;  %v4365_v24 = vmov 0.0  }
  0x94   :  { %3844 = vmatprep.subr.bf16.mxu1 %v4220_v25  ;;  %v4287_v25 = vld [vmem:[%s5423_s30 + $0x78] sm:$0xff]  }
  0x96   :  { %3823 = vmatpush3.bf16.msra.mxu0 %v4221_v26  ;;  %v4288_v26 = vld [vmem:[%s5421_s20 + $0x618] sm:$0xff]  }
  0x97   :  { %3845 = vmatpush3.bf16.msra.mxu1 %v4222_v27  ;;  %3824 = vmatprep.subr.bf16.mxu0 %v4223_v28  ;;  %v4289_v27 = vld [vmem:[%s5423_s30 + $0x38] sm:$0xff]   ;;  %v4290_v28 = vld [vmem:[%s5423_s30 + $0x70] sm:$0xff]  }
  0x98   :  { %3846 = vmatprep.subr.bf16.mxu1 %v4224_v29  ;;  %v4291_v29 = vld [vmem:[%s5421_s20 + $0x610] sm:$0xff]  }
  0x9a   :  { %3825 = vmatpush3.bf16.msra.mxu0 %v4225_v30  ;;  %v4292_v30 = vld [vmem:[%s5423_s30 + $0x30] sm:$0xff]  }
  0x9b   :  { %3847 = vmatpush3.bf16.msra.mxu1 %v4226_v31  ;;  %3826 = vmatprep.subr.bf16.mxu0 %v4227_v32  ;;  %v4293_v31 = vld [vmem:[%s5423_s30 + $0x68] sm:$0xff]  }
  0x9c   :  { %3848 = vmatprep.subr.bf16.mxu1 %v4228_v33  ;;  %v4294_v32 = vld [vmem:[%s5421_s20 + $0x608] sm:$0xff]  }
  0x9d   :  { %v4295_v33 = vld [vmem:[%s5423_s30 + $0x28] sm:$0xff]  }
  0x9e   :  { %3827 = vmatpush3.bf16.msra.mxu0 %v4229_v34  ;;  %v4296_v34 = vld [vmem:[%s5423_s30 + $0x60] sm:$0xff]  }
  0x9f   :  { %3849 = vmatpush3.bf16.msra.mxu1 %v4230_v35  ;;  %3828 = vmatprep.subr.bf16.mxu0 %v4231_v36  ;;  %v4297_v35 = vld [vmem:[%s5421_s20 + $0x600] sm:$0xff]  }
  0xa0   :  { %3850 = vmatprep.subr.bf16.mxu1 %v4232_v37  ;;  %v4298_v36 = vld [vmem:[%s5423_s30 + $0x20] sm:$0xff]  }
  0xa1   :  { %v4299_v37 = vld [vmem:[%s5422_s26 + $0x60] ss:$100 sps:$4 sm:$0xff]  }
  0xa2   :  { %3829 = vmatpush3.bf16.msra.mxu0 %v4233_v38  ;;  %v4300_v38 = vld [vmem:[%s5423_s30 + $0x58] sm:$0xff]  }
  0xa3   :  { %3851 = vmatpush3.bf16.msra.mxu1 %v4234_v39  ;;  %3830 = vmatprep.subr.bf16.mxu0 %v4235_v40  ;;  %v4301_v39 = vld [vmem:[%s5423_s30 + $0xf8] sm:$0xff]  }
  0xa4   :  { %3852 = vmatprep.subr.bf16.mxu1 %v4236_v41  ;;  %v4302_v40 = vld [vmem:[%s5423_s30 + $0x18] sm:$0xff]  }
  0xa5   :  { %v4303_v41 = vld [vmem:[%s5423_s30 + $0xb8] sm:$0xff]  }
  0xa6   :  { %3831 = vmatpush3.bf16.msra.mxu0 %v4237_v42  ;;  %v4304_v42 = vld [vmem:[%s5423_s30 + $0x50] sm:$0xff]  }
  0xa7   :  { %3853 = vmatpush3.bf16.msra.mxu1 %v4238_v43  ;;  %3832 = vmatprep.subr.bf16.mxu0 %v4239_v44  ;;  %v4305_v43 = vld [vmem:[%s5423_s30 + $0xf0] sm:$0xff]  }
  0xa8   :  { %3854 = vmatprep.subr.bf16.mxu1 %v4240_v45  ;;  %v4306_v44 = vld [vmem:[%s5423_s30 + $0x10] sm:$0xff]  }
  0xa9   :  { %v4307_v45 = vld [vmem:[%s5423_s30 + $0xb0] sm:$0xff]  }
  0xaa   :  { %3833 = vmatpush3.bf16.msra.mxu0 %v4241_v46  ;;  %v4308_v46 = vld [vmem:[%s5423_s30 + $0x48] sm:$0xff]  }
  0xab   :  { %3855 = vmatpush3.bf16.msra.mxu1 %v4242_v47  ;;  %3862 = vmatprep.subr.bf16.mxu0 %v4249_v52  ;;  %v4309_v47 = vld [vmem:[%s5423_s30 + $0xe8] sm:$0xff]   ;;  %v4314_v52 = vld [vmem:[%s5423_s30] sm:$0xff]  }
  0xac   :  { %3884 = vmatprep.subr.bf16.mxu1 %v4250_v53  ;;  %v4315_v53 = vld [vmem:[%s5423_s30 + $0xa0] sm:$0xff]  }
  0xad   :  { %2154 = vmatmul.mubr.bf16.vlgmr.msra.gmra.mxu0 %v4243_v48  ;;  %v4310_v48 = vld [vmem:[%s5423_s30 + $0x8] sm:$0xff]  }
  0xae   :  { %2195 = vmatmul.mubr.bf16.vlgmr.msra.gmra.mxu1 %v4246_v50  ;;  %3863 = vmatpush3.bf16.msra.mxu0 %v4251_v54  ;;  %v4312_v50 = vld [vmem:[%s5423_s30 + $0x40] sm:$0xff]  }
  0xaf   :  { %3885 = vmatpush3.bf16.msra.mxu1 %v4252_v55  ;;  %3864 = vmatprep.subr.bf16.mxu0 %v4253_v56  ;;  %v4316_v54 = vld [vmem:[%s5424_s24] ss:$24 sps:$4 sm:$0xff]   ;;  %v4318_v55 = vld [vmem:[%s5424_s24 + $0x4] ss:$24 sps:$4 sm:$0xff]  }
  0xb0   :  { %3886 = vmatprep.subr.bf16.mxu1 %v4254_v57  ;;  %2235 = vmatprep.mubr.bf16.mxu0 %v4283_v21  ;;  %v4319_v56 = vld [vmem:[%s5423_s30 + $0xd8] sm:$0xff]   ;;  %v4348_v21 = vld [vmem:[%s5424_s24 + $0x10] ss:$24 sps:$4 sm:$0xff]  }
  0xb1   :  { %2276 = vmatprep.mubr.bf16.mxu1 %v4286_v23  ;;  %v4320_v57 = vld [vmem:[%s5423_s30 + $0x178] sm:$0xff]   ;;  %v4352_v23 = vld [vmem:[%s5399_s11] sm:$0xff]  }
  0xb2   :  { %3865 = vmatpush3.bf16.msra.mxu0 %v4255_v58  ;;  %v4321_v58 = vld [vmem:[%s5423_s30 + $0x98] sm:$0xff]  }
  0xb3   :  { %3887 = vmatpush3.bf16.msra.mxu1 %v4256_v59  ;;  %3866 = vmatprep.subr.bf16.mxu0 %v4257_v60  ;;  %v4322_v59 = vld [vmem:[%s5423_s30 + $0x138] sm:$0xff]   ;;  %v4323_v60 = vld [vmem:[%s5423_s30 + $0xd0] sm:$0xff]  }
  0xb4   :  { %3888 = vmatprep.subr.bf16.mxu1 %v4258_v61  ;;  %v4324_v61 = vld [vmem:[%s5423_s30 + $0x170] sm:$0xff]  }
  0xb6   :  { %3867 = vmatpush3.bf16.msra.mxu0 %v4259_v62  ;;  %v4325_v62 = vld [vmem:[%s5423_s30 + $0x90] sm:$0xff]  }
  0xb7   :  { %3889 = vmatpush3.bf16.msra.mxu1 %v4260_v63  ;;  %3868 = vmatprep.subr.bf16.mxu0 %v4261_v0  ;;  %v4326_v63 = vld [vmem:[%s5423_s30 + $0x130] sm:$0xff]   ;;  %v4327_v0 = vld [vmem:[%s5423_s30 + $0xc8] sm:$0xff]  }
  0xb8   :  { %3890 = vmatprep.subr.bf16.mxu1 %v4262_v1  ;;  %v4328_v1 = vld [vmem:[%s5423_s30 + $0x168] sm:$0xff]  }
  0xba   :  { %3869 = vmatpush3.bf16.msra.mxu0 %v4263_v2  ;;  %v4329_v2 = vld [vmem:[%s5423_s30 + $0x88] sm:$0xff]  }
  0xbb   :  { %3891 = vmatpush3.bf16.msra.mxu1 %v4264_v3  ;;  %3870 = vmatprep.subr.bf16.mxu0 %v4265_v4  ;;  %v4330_v3 = vld [vmem:[%s5423_s30 + $0x128] sm:$0xff]   ;;  %v4331_v4 = vld [vmem:[%s5423_s30 + $0xc0] sm:$0xff]  }
  0xbc   :  { %3892 = vmatprep.subr.bf16.mxu1 %v4266_v5  ;;  %v4332_v5 = vld [vmem:[%s5423_s30 + $0x160] sm:$0xff]  }
  0xbe   :  { %3871 = vmatpush3.bf16.msra.mxu0 %v4267_v6  ;;  %v4333_v6 = vld [vmem:[%s5423_s30 + $0x80] sm:$0xff]  }
  0xbf   :  { %3893 = vmatpush3.bf16.msra.mxu1 %v4268_v7  ;;  %3872 = vmatprep.subr.bf16.mxu0 %v4269_v8  ;;  %v4334_v7 = vld [vmem:[%s5423_s30 + $0x120] sm:$0xff]  }
  0xc0   :  { %3894 = vmatprep.subr.bf16.mxu1 %v4270_v9  ;;  %v4335_v8 = vld [vmem:[%s5424_s24 + $0x8] ss:$24 sps:$4 sm:$0xff]   ;;  %v4337_v9 = vld [vmem:[%s5424_s24 + $0xc] ss:$24 sps:$4 sm:$0xff]  }
  0xc2   :  { %3873 = vmatpush3.bf16.msra.mxu0 %v4271_v10  ;;  %v4338_v10 = vld [vmem:[%s5423_s30 + $0x158] sm:$0xff]  }
  0xc3   :  { %3895 = vmatpush3.bf16.msra.mxu1 %v4272_v11  ;;  %3874 = vmatprep.subr.bf16.mxu0 %v4273_v12  ;;  %v4339_v11 = vld [vmem:[%s5423_s30 + $0x118] sm:$0xff]   ;;  %v4340_v12 = vld [vmem:[%s5397_s7] sm:$0xff]  }
  0xc4   :  { %3896 = vmatprep.subr.bf16.mxu1 %v4274_v13  ;;  %v4341_v13 = vld [vmem:[%s5423_s30 + $0x150] sm:$0xff]  }
  0xc6   :  { %3875 = vmatpush3.bf16.msra.mxu0 %v4275_v14  ;;  %v4342_v14 = vld [vmem:[%s5423_s30 + $0x110] sm:$0xff]  }
  0xc7   :  { %3897 = vmatpush3.bf16.msra.mxu1 %v4276_v15  ;;  %3876 = vmatprep.subr.bf16.mxu0 %v4277_v16  ;;  %v4343_v15 = vld [vmem:[%s5423_s30 + $0x148] sm:$0xff]   ;;  %v4344_v16 = vld [vmem:[%s5398_s2] sm:$0xff]  }
  0xc8   :  { %3898 = vmatprep.subr.bf16.mxu1 %v4278_v17  ;;  %v4345_v17 = vld [vmem:[%s5423_s30 + $0x108] sm:$0xff]  }
  0xca   :  { %3877 = vmatpush3.bf16.msra.mxu0 %v4279_v18  ;;  %v4346_v18 = vld [vmem:[%s5423_s30 + $0x140] sm:$0xff]  }
  0xcb   :  { %3899 = vmatpush3.bf16.msra.mxu1 %v4280_v19  ;;  %3995 = vmatprep.subr.bf16.mxu0 %v4365_v24  ;;  %v4350_v19 = vld [vmem:[%s5424_s24 + $0x14] ss:$24 sps:$4 sm:$0xff]  }
  0xcc   :  { %3911 = vmatprep.subr.bf16.mxu1 %v4287_v25 }
  0xcd   :  { %2236 = vmatmul.mubr.bf16.vlgmr.msra.gmra.mxu0 %v4281_v20  ;;  %v4347_v20 = vld [vmem:[%s5423_s30 + $0x100] sm:$0xff]  }
  0xce   :  { %2277 = vmatmul.mubr.bf16.vlgmr.msra.gmra.mxu1 %v4284_v22  ;;  %3996 = vmatpush3.bf16.msra.mxu0 %v4288_v26  ;;  %v4351_v22 = vld [vmem:[%s5399_s11 + $0x8] sm:$0xff]  }
  0xcf   :  { %4003 = vmatprep.mubr.msk.bf16.mxu0 %vm4366_vm0, %v4365_v24  ;;  %3912 = vmatpush3.bf16.msra.mxu1 %v4289_v27 }
  0xd0   :  { %3997 = vmatprep.subr.bf16.mxu0 %v4365_v24  ;;  %3913 = vmatprep.subr.bf16.mxu1 %v4290_v28 }
  0xd1   :  { %2785 = vmatprep.mubr.bf16.mxu1 %v4318_v55 }
  0xd2   :  { %3998 = vmatpush3.bf16.msra.mxu0 %v4291_v29  ;;  %v4353_v29 = vld [vmem:[%s5400_s9] sm:$0xff]  }
  0xd3   :  { %3914 = vmatpush3.bf16.msra.mxu1 %v4292_v30  ;;  %3999 = vmatprep.subr.bf16.mxu0 %v4365_v24 }
  0xd4   :  { %3915 = vmatprep.subr.bf16.mxu1 %v4293_v31 }
  0xd6   :  { %4000 = vmatpush3.bf16.msra.mxu0 %v4294_v32 }
  0xd7   :  { %3916 = vmatpush3.bf16.msra.mxu1 %v4295_v33  ;;  %4001 = vmatprep.subr.bf16.mxu0 %v4365_v24 }
  0xd8   :  { %3917 = vmatprep.subr.bf16.mxu1 %v4296_v34 }
  0xda   :  { %4002 = vmatpush3.bf16.msra.mxu0 %v4297_v35 }
  0xdb   :  { %3918 = vmatpush3.bf16.msra.mxu1 %v4298_v36  ;;  %3933 = vmatprep.subr.bf16.mxu0 %v4301_v39 }
  0xdc   :  { %3919 = vmatprep.subr.bf16.mxu1 %v4300_v38 }
  0xdd   :  { %4004 = vmatmul.mubr.msk.bf16.vlgmr.msra.gmra.mxu0 %vm1789_vm1, %v4299_v37 }
  0xde   :  { %3934 = vmatpush3.bf16.msra.mxu0 %v4303_v41  ;;  %2826 = vmatprep.mubr.bf16.mxu0 %v4337_v9 }
  0xdf   :  { %3920 = vmatpush3.bf16.msra.mxu1 %v4302_v40  ;;  %3935 = vmatprep.subr.bf16.mxu0 %v4305_v43 }
  0xe0   :  { %3921 = vmatprep.subr.bf16.mxu1 %v4304_v42 }
  0xe2   :  { %3936 = vmatpush3.bf16.msra.mxu0 %v4307_v45 }
  0xe3   :  { %3922 = vmatpush3.bf16.msra.mxu1 %v4306_v44  ;;  %3937 = vmatprep.subr.bf16.mxu0 %v4309_v47 }
  0xe4   :  { %3923 = vmatprep.subr.bf16.mxu1 %v4308_v46 }
  0xe6   :  { %3938 = vmatpush3.bf16.msra.mxu0 %v4311_v49 }
  0xe7   :  { %3924 = vmatpush3.bf16.msra.mxu1 %v4310_v48  ;;  %3939 = vmatprep.subr.bf16.mxu0 %v4313_v51 }
  0xe8   :  { %3925 = vmatprep.subr.bf16.mxu1 %v4312_v50 }
  0xea   :  { %3940 = vmatpush3.bf16.msra.mxu0 %v4315_v53 }
  0xeb   :  { %3926 = vmatpush3.bf16.msra.mxu1 %v4314_v52  ;;  %3941 = vmatprep.subr.bf16.mxu0 %v4319_v56 }
  0xec   :  { %3955 = vmatprep.subr.bf16.mxu1 %v4320_v57 }
  0xed   :  { %v3658_v25 = vpop.f32.mrf.mxu0 }
  0xee   :  { %2786 = vmatmul.mubr.bf16.vlgmr.msra.gmra.mxu1 %v4316_v54  ;;  %3942 = vmatpush3.bf16.msra.mxu0 %v4321_v58  ;;  %v3680_v26 = vpop.f32.mrf.mxu1  ;;  %v3340_v58 = vld [vmem:[%s5402_s4] ss:$0 sm:$0xff] }
  0xef   :  { %3956 = vmatpush3.bf16.msra.mxu1 %v4322_v59  ;;  %3943 = vmatprep.subr.bf16.mxu0 %v4323_v60  ;;  %v3659_v27 = vpop.f32.mrf.mxu0 }
  0xf0   :  { %3957 = vmatprep.subr.bf16.mxu1 %v4324_v61  ;;  %2867 = vmatprep.mubr.bf16.mxu1 %v4350_v19  ;;  %v3681_v28 = vpop.f32.mrf.mxu1  ;;  %v3660_v56 = vadd.f32 %v3659_v27, %v3658_v25 }
  0xf1   :  { %v3661_v30 = vpop.f32.mrf.mxu0 }
  0xf2   :  { %3944 = vmatpush3.bf16.msra.mxu0 %v4325_v62  ;;  %v3683_v31 = vpop.f32.mrf.mxu1  ;;  %v1828_v61 = vadd.f32 %v3660_v56, %v3340_v58  ;;  %v3682_v62 = vadd.f32 %v3681_v28, %v3680_v26 }
  0xf3   :  { %3958 = vmatpush3.bf16.msra.mxu1 %v4326_v63  ;;  %3945 = vmatprep.subr.bf16.mxu0 %v4327_v0  ;;  %v3662_v32 = vpop.f32.mrf.mxu0 }
  0xf4   :  { %3959 = vmatprep.subr.bf16.mxu1 %v4328_v1  ;;  %v3684_v33 = vpop.f32.mrf.mxu1  ;;  %v3663_v57 = vadd.f32 %v3662_v32, %v3661_v30 }
  0xf5   :  { %v3685_v0 = vadd.f32 %v3684_v33, %v3683_v31 }
  0xf6   :  { %3946 = vmatpush3.bf16.msra.mxu0 %v4329_v2  ;;  %v1831_v63 = vadd.f32 %v3663_v57, %v3340_v58 }
  0xf7   :  { %3960 = vmatpush3.bf16.msra.mxu1 %v4330_v3  ;;  %3947 = vmatprep.subr.bf16.mxu0 %v4331_v4 }
  0xf8   :  { %3961 = vmatprep.subr.bf16.mxu1 %v4332_v5  ;;  %v1869_v5 = vadd.f32 %v3682_v62, %v1828_v61 }
  0xfa   :  { %3948 = vmatpush3.bf16.msra.mxu0 %v4333_v6  ;;  %v1872_v6 = vadd.f32 %v3685_v0, %v1831_v63 }
  0xfb   :  { %3962 = vmatpush3.bf16.msra.mxu1 %v4334_v7  ;;  %4007 = vmatprep.subr.bf16.mxu0 %v4365_v24 }
  0xfc   :  { %3963 = vmatprep.subr.bf16.mxu1 %v4338_v10 }
  0xfd   :  { %2827 = vmatmul.mubr.bf16.vlgmr.msra.gmra.mxu0 %v4335_v8 }
  0xfe   :  { %4009 = vmatprep.mubr.msk.bf16.mxu0 %vm4366_vm0, %v4365_v24  ;;  %4008 = vmatpush3.bf16.msra.mxu0 %v4340_v12 }
  0xff   :  { %3964 = vmatpush3.bf16.msra.mxu1 %v4339_v11  ;;  %4013 = vmatprep.subr.bf16.mxu0 %v4365_v24 }
 0x100   :  { %3965 = vmatprep.subr.bf16.mxu1 %v4341_v13 }
 0x103   :  { %3966 = vmatpush3.bf16.msra.mxu1 %v4342_v14 }
 0x104   :  { %3967 = vmatprep.subr.bf16.mxu1 %v4343_v15 }
 0x105   :  { %4010 = vmatmul.mubr.msk.bf16.vlgmr.msra.gmra.mxu0 %vm2898_vm2, %v4344_v16 }
 0x106   :  { %4015 = vmatprep.mubr.msk.bf16.mxu0 %vm4366_vm0, %v4365_v24  ;;  %4014 = vmatpush3.bf16.msra.mxu0 %v4353_v29 }
 0x107   :  { %3968 = vmatpush3.bf16.msra.mxu1 %v4345_v17  ;;  %4019 = vmatprep.subr.bf16.mxu0 %v4365_v24 }
 0x108   :  { %3969 = vmatprep.subr.bf16.mxu1 %v4346_v18 }
 0x10b   :  { %3970 = vmatpush3.bf16.msra.mxu1 %v4347_v20 }
 0x10c   :  { %4027 = vmatprep.subr.bf16.mxu1 %v4365_v24 }
 0x10d   :  { %v3702_v34 = vpop.f32.mrf.mxu0 }
 0x10e   :  { %2868 = vmatmul.mubr.bf16.vlgmr.msra.gmra.mxu1 %v4348_v21  ;;  %v3724_v35 = vpop.f32.mrf.mxu1 }
 0x10f   :  { %4031 = vmatprep.mubr.msk.bf16.mxu1 %vm4366_vm0, %v4365_v24  ;;  %4028 = vmatpush3.bf16.msra.mxu1 %v4351_v22  ;;  %v3703_v36 = vpop.f32.mrf.mxu0 }
 0x110   :  { %4029 = vmatprep.subr.bf16.mxu1 %v4365_v24  ;;  %v3725_v37 = vpop.f32.mrf.mxu1  ;;  %v3704_v3 = vadd.f32 %v3703_v36, %v3702_v34 }
 0x111   :  { %v3705_v38 = vpop.f32.mrf.mxu0  ;;  %v3726_v10 = vadd.f32 %v3725_v37, %v3724_v35 }
 0x112   :  { %v3727_v39 = vpop.f32.mrf.mxu1  ;;  %v1910_v9 = vadd.f32 %v3704_v3, %v1869_v5 }
 0x113   :  { %4030 = vmatpush3.bf16.msra.mxu1 %v4352_v23  ;;  %v3706_v40 = vpop.f32.mrf.mxu0 }
 0x114   :  { %4043 = vmatprep.subr.bf16.mxu1 %v4365_v24  ;;  %v3728_v41 = vpop.f32.mrf.mxu1  ;;  %v3707_v4 = vadd.f32 %v3706_v40, %v3705_v38  ;;  %v1951_v17 = vadd.f32 %v3726_v10, %v1910_v9  ;;  %v3618_v9 = vld [vmem:[%s5403_s8] ss:$0 sm:$0xff] }
 0x115   :  { %v3729_v12 = vadd.f32 %v3728_v41, %v3727_v39 }
 0x116   :  { %v1913_v11 = vadd.f32 %v3707_v4, %v1872_v6 }
 0x118   :  { %v1954_v18 = vadd.f32 %v3729_v12, %v1913_v11 }
 0x12d   :  { %v3746_v42 = vpop.f32.mrf.mxu0 }
 0x12e   :  { %v3768_v43 = vpop.f32.mrf.mxu1 }
 0x12f   :  { %v3747_v44 = vpop.f32.mrf.mxu0 }
 0x130   :  { %v3769_v45 = vpop.f32.mrf.mxu1  ;;  %v3748_v13 = vadd.f32 %v3747_v44, %v3746_v42 }
 0x131   :  { %v3749_v46 = vpop.f32.mrf.mxu0  ;;  %v3770_v20 = vadd.f32 %v3769_v45, %v3768_v43 }
 0x132   :  { %v3771_v47 = vpop.f32.mrf.mxu1  ;;  %v1992_v19 = vadd.f32 %v3748_v13, %v1951_v17 }
 0x133   :  { %v3750_v48 = vpop.f32.mrf.mxu0 }
 0x134   :  { %v3772_v49 = vpop.f32.mrf.mxu1  ;;  %v3751_v14 = vadd.f32 %v3750_v48, %v3749_v46  ;;  %v2033_v30 = vadd.f32 %v3770_v20, %v1992_v19 }
 0x135   :  { %v3773_v22 = vadd.f32 %v3772_v49, %v3771_v47 }
 0x136   :  { %v1995_v21 = vadd.f32 %v3751_v14, %v1954_v18 }
 0x138   :  { %v2036_v31 = vadd.f32 %v3773_v22, %v1995_v21  ;;  %v3563_v21 = vld [vmem:[%s5404_s6] ss:$0 sm:$0xff] }
 0x14d   :  { %v3790_v50 = vpop.f32.mrf.mxu0 }
 0x14e   :  { %v3812_v51 = vpop.f32.mrf.mxu1 }
 0x14f   :  { %v3791_v52 = vpop.f32.mrf.mxu0 }
 0x150   :  { %v3813_v53 = vpop.f32.mrf.mxu1  ;;  %v3792_v26 = vadd.f32 %v3791_v52, %v3790_v50 }
 0x151   :  { %v3793_v54 = vpop.f32.mrf.mxu0  ;;  %v3814_v34 = vadd.f32 %v3813_v53, %v3812_v51 }
 0x152   :  { %v3815_v55 = vpop.f32.mrf.mxu1  ;;  %v2074_v33 = vadd.f32 %v3792_v26, %v2033_v30 }
 0x153   :  { %v3794_v59 = vpop.f32.mrf.mxu0 }
 0x154   :  { %v3816_v60 = vpop.f32.mrf.mxu1  ;;  %v3795_v27 = vadd.f32 %v3794_v59, %v3793_v54  ;;  %v2115_v41 = vadd.f32 %v3814_v34, %v2074_v33 }
 0x155   :  { %v3817_v36 = vadd.f32 %v3816_v60, %v3815_v55 }
 0x156   :  { %v2077_v35 = vadd.f32 %v3795_v27, %v2036_v31 }
 0x158   :  { %v2118_v42 = vadd.f32 %v3817_v36, %v2077_v35 }
 0x16d   :  { %v3834_v1 = vpop.f32.mrf.mxu0 }
 0x16e   :  { %v3856_v2 = vpop.f32.mrf.mxu1 }
 0x16f   :  { %v3835_v7 = vpop.f32.mrf.mxu0 }
 0x170   :  { %v3857_v8 = vpop.f32.mrf.mxu1  ;;  %v3836_v39 = vadd.f32 %v3835_v7, %v3834_v1 }
 0x171   :  { %v3837_v15 = vpop.f32.mrf.mxu0  ;;  %v3858_v46 = vadd.f32 %v3857_v8, %v3856_v2 }
 0x172   :  { %v3859_v16 = vpop.f32.mrf.mxu1  ;;  %v2156_v45 = vadd.f32 %v3836_v39, %v2115_v41 }
 0x173   :  { %v3838_v23 = vpop.f32.mrf.mxu0 }
 0x174   :  { %v3860_v25 = vpop.f32.mrf.mxu1  ;;  %v3839_v40 = vadd.f32 %v3838_v23, %v3837_v15  ;;  %v2197_v54 = vadd.f32 %v3858_v46, %v2156_v45  ;;  %v4354_v23 = vld [vmem:[%s5401_s12 + $0x8] sm:$0xff]  }
 0x175   :  { %v3861_v48 = vadd.f32 %v3860_v25, %v3859_v16 }
 0x176   :  { %v2159_v47 = vadd.f32 %v3839_v40, %v2118_v42  ;;  %v4356_v42 = vld [vmem:[%s5405_s13 + $0x8] sm:$0xff]  }
 0x178   :  { %v2200_v56 = vadd.f32 %v3861_v48, %v2159_v47 }
 0x18d   :  { %v3878_v28 = vpop.f32.mrf.mxu0 }
 0x18e   :  { %v3900_v29 = vpop.f32.mrf.mxu1 }
 0x18f   :  { %v3879_v32 = vpop.f32.mrf.mxu0 }
 0x190   :  { %v3901_v38 = vpop.f32.mrf.mxu1  ;;  %v3880_v49 = vadd.f32 %v3879_v32, %v3878_v28  ;;  %v4355_v32 = vld [vmem:[%s5401_s12] sm:$0xff]  }
 0x191   :  { %v3881_v37 = vpop.f32.mrf.mxu0  ;;  %v3902_v53 = vadd.f32 %v3901_v38, %v3900_v29 }
 0x192   :  { %v3903_v44 = vpop.f32.mrf.mxu1  ;;  %v2238_v51 = vadd.f32 %v3880_v49, %v2197_v54  ;;  %v3622_v49 = vld [vmem:[%s5406_s10] ss:$0 sm:$0xff] }
 0x193   :  { %v3882_v43 = vpop.f32.mrf.mxu0 }
 0x194   :  { %v3883_v50 = vadd.f32 %v3882_v43, %v3881_v37  ;;  %v3904_v52 = vpop.f32.mrf.mxu1  ;;  %v2279_v60 = vadd.f32 %v3902_v53, %v2238_v51  ;;  %v4357_v43 = vld [vmem:[%s5405_s13] sm:$0xff]  }
 0x195   :  { %v3905_v57 = vadd.f32 %v3904_v52, %v3903_v44 }
 0x196   :  { %v2241_v55 = vadd.f32 %v3883_v50, %v2200_v56 }
 0x198   :  { %v2282_v61 = vadd.f32 %v3905_v57, %v2241_v55 }
 0x19d   :  { %v2319_v58 = vpop.f32.mrf.mxu0 }
 0x19e   :  { %v2320_v63 = vadd.f32 %v2319_v58, %v2279_v60 }
 0x19f   :  { %v4005_v59 = vpop.f32.mrf.mxu0 }
 0x1a1   :  { %v2322_v62 = vpop.f32.mrf.mxu0 }
 0x1a2   :  { %v2323_v0 = vadd.f32 %v2322_v62, %v2282_v61  ;;  %v4358_v62 = vld [vmem:[%s5407_s15 + $0x8] sm:$0xff]  }
 0x1a3   :  { %v4006_v1 = vpop.f32.mrf.mxu0 }
 0x1a4   :  { %v3005_v2 = vpack.c.bf16 %v2323_v0, %v2320_v63  ;;  %v4359_v63 = vld [vmem:[%s5407_s15] sm:$0xff]  }
 0x1a6   :  { %4032 = vmatmul.mubr.msk.bf16.vlgmr.msra.gmra.mxu1 %vm3027_vm3, %v3005_v2  ;;  %v3634_v2 = vld [vmem:[%s5408_s14] ss:$0 sm:$0xff] }
 0x1a7   :  { %4047 = vmatprep.mubr.msk.bf16.mxu1 %vm4366_vm0, %v4365_v24  ;;  %4044 = vmatpush3.bf16.msra.mxu1 %v4358_v62 }
 0x1a8   :  { %4045 = vmatprep.subr.bf16.mxu1 %v4365_v24 }
 0x1ab   :  { %4046 = vmatpush3.bf16.msra.mxu1 %v4359_v63 }
 0x1ae   :  { %v3927_v4 = vpop.f32.mrf.mxu1 }
 0x1b0   :  { %v3928_v7 = vpop.f32.mrf.mxu1 }
 0x1b1   :  { %v3929_v18 = vadd.f32 %v3928_v7, %v3927_v4 }
 0x1b2   :  { %v3930_v11 = vpop.f32.mrf.mxu1 }
 0x1b3   :  { %v2788_v27 = vadd.f32 %v3929_v18, %v3563_v21 }
 0x1b4   :  { %v3931_v15 = vpop.f32.mrf.mxu1 }
 0x1b5   :  { %v3932_v22 = vadd.f32 %v3931_v15, %v3930_v11  ;;  %v4360_v11 = vld [vmem:[%s5409_s17] sm:$0xff]  }
 0x1b7   :  { %v2791_v30 = vadd.f32 %v3932_v22, %v3563_v21  ;;  %v3639_v22 = vld [vmem:[%s5411_s18] ss:$0 sm:$0xff] }
 0x1bd   :  { %v3949_v3 = vpop.f32.mrf.mxu0 }
 0x1bf   :  { %v3950_v5 = vpop.f32.mrf.mxu0 }
 0x1c0   :  { %v3951_v29 = vadd.f32 %v3950_v5, %v3949_v3 }
 0x1c1   :  { %v3952_v6 = vpop.f32.mrf.mxu0 }
 0x1c2   :  { %v2829_v36 = vadd.f32 %v3951_v29, %v2788_v27 }
 0x1c3   :  { %v3953_v8 = vpop.f32.mrf.mxu0 }
 0x1c4   :  { %v3954_v31 = vadd.f32 %v3953_v8, %v3952_v6 }
 0x1c5   :  { %v2936_v10 = vpop.f32.mrf.mxu0 }
 0x1c6   :  { %v2937_v13 = vadd.f32 %v3618_v9, %v2936_v10  ;;  %v2832_v37 = vadd.f32 %v3954_v31, %v2791_v30 }
 0x1c7   :  { %v4011_v12 = vpop.f32.mrf.mxu0 }
 0x1c8   :  { %v2943_v19 = vmax.f32 %v2937_v13, 0.0  ;;  %v3635_v12 = vld [vmem:[%s5410_s16] ss:$0 sm:$0xff] }
 0x1c9   :  { %v2939_v14 = vpop.f32.mrf.mxu0 }
 0x1ca   :  { %v2940_v16 = vadd.f32 %v3618_v9, %v2939_v14 }
 0x1cb   :  { %v4012_v17 = vpop.f32.mrf.mxu0 }
 0x1cc   :  { %v2944_v20 = vmax.f32 %v2940_v16, 0.0 }
 0x1ce   :  { %v2945_v25 = vpack.c.bf16 %v2944_v20, %v2943_v19  ;;  %v3971_v26 = vpop.f32.mrf.mxu1 }
 0x1d0   :  { %v3972_v28 = vpop.f32.mrf.mxu1  ;;  %4016 = vmatmul.mubr.msk.bf16.vlgmr.msra.gmra.mxu0 %vm2898_vm2, %v2945_v25 }
 0x1d1   :  { %4020 = vmatpush3.bf16.msra.mxu0 %v4354_v23  ;;  %4023 = vmatprep.mubr.msk.bf16.mxu0 %vm4366_vm0, %v4365_v24  ;;  %v3973_v34 = vadd.f32 %v3972_v28, %v3971_v26 }
 0x1d2   :  { %v3974_v33 = vpop.f32.mrf.mxu1  ;;  %4021 = vmatprep.subr.bf16.mxu0 %v4365_v24 }
 0x1d3   :  { %v2870_v39 = vadd.f32 %v3973_v34, %v2829_v36 }
 0x1d4   :  { %v3975_v35 = vpop.f32.mrf.mxu1 }
 0x1d5   :  { %v3976_v38 = vadd.f32 %v3975_v35, %v3974_v33  ;;  %4022 = vmatpush3.bf16.msra.mxu0 %v4355_v32 }
 0x1d6   :  { %4035 = vmatprep.subr.bf16.mxu0 %v4365_v24 }
 0x1d7   :  { %v2873_v40 = vadd.f32 %v3976_v38, %v2832_v37 }
 0x1d9   :  { %v3010_v41 = vpack.c.bf16 %v2873_v40, %v2870_v39 }
 0x1db   :  { %4024 = vmatmul.mubr.msk.bf16.vlgmr.msra.gmra.mxu0 %vm3027_vm3, %v3010_v41 }
 0x1dc   :  { %4039 = vmatprep.mubr.msk.bf16.mxu0 %vm4366_vm0, %v4365_v24  ;;  %4036 = vmatpush3.bf16.msra.mxu0 %v4356_v42 }
 0x1dd   :  { %4037 = vmatprep.subr.bf16.mxu0 %v4365_v24 }
 0x1e0   :  { %4038 = vmatpush3.bf16.msra.mxu0 %v4357_v43 }
 0x1e1   :  { %4051 = vmatprep.subr.bf16.mxu0 %v4365_v24 }
 0x266   :  { %v3121_v44 = vpop.f32.mrf.mxu1 }
 0x268   :  { %v4033_v45 = vpop.f32.mrf.mxu1 }
 0x26a   :  { %v3124_v46 = vpop.f32.mrf.mxu1 }
 0x26c   :  { %v4034_v47 = vpop.f32.mrf.mxu1 }
 0x290   :  { %v2998_v48 = vpop.f32.mrf.mxu0 }
 0x291   :  { %v2999_v54 = vadd.f32 %v3622_v49, %v2998_v48 }
 0x292   :  { %v4017_v50 = vpop.f32.mrf.mxu0 }
 0x294   :  { %v3001_v52 = vpop.f32.mrf.mxu0 }
 0x295   :  { %v3002_v56 = vadd.f32 %v3622_v49, %v3001_v52 }
 0x296   :  { %v4018_v51 = vpop.f32.mrf.mxu0 }
 0x297   :  { %v3128_v53 = vpack.c.bf16 %v3002_v56, %v2999_v54 }
 0x299   :  { %4040 = vmatmul.mubr.msk.bf16.vlgmr.msra.gmra.mxu0 %vm3027_vm3, %v3128_v53 }
 0x29a   :  { %4053 = vmatprep.mubr.msk.bf16.mxu0 %vm4366_vm0, %v4365_v24  ;;  %4052 = vmatpush3.bf16.msra.mxu0 %v4360_v11 }
 0x29b   :  { %v3065_v55 = vpop.f32.mrf.mxu0 }
 0x29c   :  { %v3122_v57 = vadd.f32 %v3121_v44, %v3065_v55 }
 0x29d   :  { %v4025_v58 = vpop.f32.mrf.mxu0 }
 0x29f   :  { %v3068_v59 = vpop.f32.mrf.mxu0 }
 0x2a0   :  { %v3125_v60 = vadd.f32 %v3124_v46, %v3068_v59 }
 0x2a1   :  { %v4026_v61 = vpop.f32.mrf.mxu0 }
 0x359   :  { %v3182_v0 = vpop.f32.mrf.mxu0 }
 0x35a   :  { %v3189_v1 = vadd.f32 %v3182_v0, %v3122_v57 }
 0x35b   :  { %v4041_v3 = vpop.f32.mrf.mxu0 }
 0x35c   :  { %v3198_v5 = vadd.f32 %v3634_v2, %v3189_v1 }
 0x35d   :  { %v3185_v4 = vpop.f32.mrf.mxu0 }
 0x35e   :  { %v3190_v6 = vadd.f32 %v3185_v4, %v3125_v60  ;;  %v3200_v9 = vmax.f32 %v3198_v5, 0.0 }
 0x35f   :  { %v4042_v7 = vpop.f32.mrf.mxu0 }
 0x360   :  { %v3199_v8 = vadd.f32 %v3634_v2, %v3190_v6 }
 0x362   :  { %v3201_v10 = vmax.f32 %v3199_v8, 0.0 }
 0x364   :  { %v3202_v24 = vpack.c.bf16 %v3201_v10, %v3200_v9 }
 0x366   :  { %4048 = vmatmul.mubr.msk.bf16.vlgmr.msra.gmra.mxu1 %vm3027_vm3, %v3202_v24 }
 0x426   :  { %v3263_v13 = vpop.f32.mrf.mxu1 }
 0x427   :  { %v3264_v15 = vadd.f32 %v3635_v12, %v3263_v13 }
 0x428   :  { %v4049_v14 = vpop.f32.mrf.mxu1 }
 0x429   :  { %v3270_v19 = vmax.f32 %v3264_v15, 0.0 }
 0x42a   :  { %v3266_v16 = vpop.f32.mrf.mxu1 }
 0x42b   :  { %v3267_v17 = vadd.f32 %v3635_v12, %v3266_v16 }
 0x42c   :  { %v4050_v18 = vpop.f32.mrf.mxu1 }
 0x42d   :  { %v3271_v20 = vmax.f32 %v3267_v17, 0.0 }
 0x42f   :  { %v3272_v21 = vpack.c.bf16 %v3271_v20, %v3270_v19 }
 0x431   :  { %4054 = vmatmul.mubr.msk.bf16.vlgmr.msra.gmra.mxu0 %vm2898_vm2, %v3272_v21 }
 0x4f1   :  { %v3325_v23 = vpop.f32.mrf.mxu0 }
 0x4f2   :  { %v3326_v25 = vadd.f32 %v3639_v22, %v3325_v23 }
 0x4f3   :  { %v4055_v26 = vpop.f32.mrf.mxu0 }
 0x4f4   :  { %4361 = vtanh.f32 %v3326_v25 }
 0x4f5   :  { %v3328_v27 = vpop.f32.mrf.mxu0 }
 0x4f6   :  { %v3329_v28 = vadd.f32 %v3639_v22, %v3328_v27 }
 0x4f7   :  { %v4056_v29 = vpop.f32.mrf.mxu0 }
 0x4f8   :  { %4363 = vtanh.f32 %v3329_v28 }
 0x501   :  { %v4362_v30 = vpop.eup %4361 }
 0x502   :  { %3334 = vst [vmem:[%s5412_s19] sm:$0xff] %v4362_v30 }
 0x505   :  { %v4364_v31 = vpop.eup %4363 }
 0x506   :  { %3335 = vst [vmem:[%s5412_s19 + $0x8] sm:$0xff] %v4364_v31 }

</bundles_post_ra>
